<compile_context>
chip_gen: v7x
topology: tpu7x:2x2x1
jax: 0.10.0
libtpu: 0.0.40
codegen_flags: <defaults>
</compile_context>

<pallas_src>
import functools

import jax
import jax.numpy as jnp
from jax import lax
from jax.experimental import pallas as pl
from jax.experimental.pallas import tpu as pltpu

KSIZE = 5
PAD = 2


def _upsample_kernel(xl_ref, xc_ref, xr_ref, w_ref, bp_ref, perm_ref, o_ref,
                     *, w_tile, scale):
    # xl/xc/xr : (1, C_in, W_TILE) f32 previous / current / next width blocks of
    #            the UNPADDED input (neighbour indices clamped at the edges).
    # w_ref    : (C_out, 5*C_in)  fused tap-major conv weight (compute dtype).
    # bp_ref   : (C_out, 2) f32   col 0 = bias, col 1 = PReLU alpha tiled to the
    #                             conv-channel order oc = s*C_in + ic.
    # perm_ref : (S*W_TILE, S*W_TILE) 0/1 permutation folding PixelShuffle1D.
    # o_ref    : (1, C_in, S*W_TILE) final (shuffled + PReLU) output block.
    j = pl.program_id(1)
    cur = xc_ref[0]                                   # (C_in, W_TILE) f32
    prev = xl_ref[0]
    nxt = xr_ref[0]
    in_c = cur.shape[0]
    cdt = w_ref.dtype

    # 0/1 gates: does a real neighbour block exist on the left / right?
    gl = (j > 0).astype(cur.dtype)
    gr = (j < pl.num_programs(1) - 1).astype(cur.dtype)
    lane = lax.broadcasted_iota(jnp.int32, (in_c, w_tile), 1)

    def tap(d):
        # tap(d)[ic, m] == x[ic, j*W_TILE + m + d]  (zero outside [0, W))
        if d == 0:
            return cur
        body = pltpu.roll(cur, shift=(-d) % w_tile, axis=1)
        if d < 0:
            halo = pltpu.roll(prev, shift=(-d) % w_tile, axis=1) * gl
            return jnp.where(lane < -d, halo, body)
        halo = pltpu.roll(nxt, shift=(-d) % w_tile, axis=1) * gr
        return jnp.where(lane >= w_tile - d, halo, body)

    # im2col: row k*C_in + ic holds x[ic, w + k - 2] -> one fused MXU matmul
    # with contraction dim 5*C_in instead of 5 small matmuls + VALU adds.
    xcol = jnp.concatenate([tap(k - PAD) for k in range(KSIZE)], axis=0)
    acc = jnp.dot(w_ref[...], xcol.astype(cdt),
                  preferred_element_type=jnp.float32)   # (C_out, W_TILE) f32

    bias = bp_ref[:, 0:1]
    alpha = bp_ref[:, 1:2]
    acc = acc + bias
    act = jnp.where(acc >= 0.0, acc, alpha * acc)       # PReLU in f32

    # PixelShuffle1D fused as a permutation matmul (MXU slot is nearly free for
    # this memory-bound kernel):  C[ic, s*W_TILE + m] = act[s*C_in + ic, m],
    # out = C @ P with P[s*W_TILE + m, scale*m + s] = 1.
    c_mat = jnp.concatenate(
        [act[s * in_c:(s + 1) * in_c, :] for s in range(scale)], axis=1)
    out = jnp.dot(c_mat.astype(cdt), perm_ref[...],
                  preferred_element_type=jnp.float32)
    o_ref[0] = out.astype(o_ref.dtype)


def upsample_block(x, weight, bias, alpha, scale_factor, *,
                   compute_dtype=jnp.bfloat16, w_tile=None):
    """x: (B, C_in, W) f32 -> (B, C_in, W*scale_factor) f32 (conv+shuffle+PReLU)."""
    B, in_c, W = x.shape
    c_out = in_c * scale_factor
    assert weight.shape == (c_out, in_c, KSIZE)

    if w_tile is None:
        if W % 256 == 0:
            w_tile = 256
        elif W % 128 == 0:
            w_tile = 128
        else:
            w_tile = W            # full-width fallback (block == full dim)
    assert W % w_tile == 0
    nwb = W // w_tile
    wo_tile = scale_factor * w_tile

    # Fused tap-major weight: w_fused[oc, k*C_in + ic] = weight[oc, ic, k]
    w_fused = jnp.transpose(weight, (0, 2, 1)).reshape(
        c_out, KSIZE * in_c).astype(compute_dtype)

    # bias + PReLU alpha (tiled so conv channel oc = s*C_in + ic, i.e. the
    # PixelShuffle1D channel order, gets alpha[ic]) as one (C_out, 2) tile.
    bias_alpha = jnp.stack(
        [bias, jnp.tile(alpha, scale_factor)], axis=1).astype(jnp.float32)

    # Constant 0/1 permutation: row q = s*W_TILE + m maps to column scale*m + s.
    q = jnp.arange(wo_tile)
    perm = jax.nn.one_hot(scale_factor * (q % w_tile) + q // w_tile,
                          wo_tile, dtype=compute_dtype)

    kernel = functools.partial(_upsample_kernel, w_tile=w_tile,
                               scale=scale_factor)

    return pl.pallas_call(
        kernel,
        out_shape=jax.ShapeDtypeStruct((B, in_c, W * scale_factor), jnp.float32),
        grid_spec=pltpu.PrefetchScalarGridSpec(
            num_scalar_prefetch=0,
            grid=(B, nwb),
            in_specs=[
                # previous / current / next width blocks (clamped at the edges)
                pl.BlockSpec((1, in_c, w_tile),
                             lambda b, j: (b, 0, jnp.maximum(j - 1, 0))),
                pl.BlockSpec((1, in_c, w_tile), lambda b, j: (b, 0, j)),
                pl.BlockSpec((1, in_c, w_tile),
                             lambda b, j: (b, 0, jnp.minimum(j + 1, nwb - 1))),
                pl.BlockSpec((c_out, KSIZE * in_c), lambda b, j: (0, 0)),
                pl.BlockSpec((c_out, 2), lambda b, j: (0, 0)),
                pl.BlockSpec((wo_tile, wo_tile), lambda b, j: (0, 0)),
            ],
            out_specs=pl.BlockSpec((1, in_c, wo_tile), lambda b, j: (b, 0, j)),
        ),
        compiler_params=pltpu.CompilerParams(
            dimension_semantics=("parallel", "parallel"),
            vmem_limit_bytes=48 * 1024 * 1024,
        ),
    )(x, x, x, w_fused, bias_alpha, perm)


def upsample_block_ref(x, weight, bias, alpha, scale_factor):
    """Pure-JAX reference mirroring the PyTorch UpsampleBlock forward."""
    y = lax.conv_general_dilated(
        x, weight, window_strides=(1,), padding=[(PAD, PAD)],
        dimension_numbers=("NCH", "OIH", "NCH"),
        precision=lax.Precision.HIGHEST)
    y = y + bias[None, :, None]
    B, c_out, W = y.shape
    in_c = c_out // scale_factor
    # PixelShuffle1D: view (B, S, C, W) -> permute (0,2,3,1) -> (B, C, W*S)
    y = y.reshape(B, scale_factor, in_c, W)
    y = jnp.transpose(y, (0, 2, 3, 1)).reshape(B, in_c, W * scale_factor)
    return jnp.where(y >= 0, y, alpha[None, :, None] * y)


if __name__ == "__main__":
    # UpsampleBlock(in_c=num_channels=64, scale_factor=3) from the generator.
    B, in_c, W, S = 2, 64, 512, 3
    c_out = in_c * S

    key = jax.random.PRNGKey(0)
    kx, kw, kb, ka = jax.random.split(key, 4)
    x = jax.random.normal(kx, (B, in_c, W), dtype=jnp.float32)
    weight = jax.random.normal(kw, (c_out, in_c, KSIZE), dtype=jnp.float32) * 0.05
    bias = jax.random.normal(kb, (c_out,), dtype=jnp.float32) * 0.1
    alpha = 0.25 + 0.2 * jax.random.normal(ka, (in_c,), dtype=jnp.float32)

    ref = upsample_block_ref(x, weight, bias, alpha, S)

    # f32 verification path
    out_f32 = jax.block_until_ready(
        upsample_block(x, weight, bias, alpha, S, compute_dtype=jnp.float32))
    assert out_f32.shape == (B, in_c, W * S)
    err32 = float(jnp.max(jnp.abs(out_f32 - ref)))
    assert err32 < 1e-1, f"f32 kernel mismatch, max abs err {err32}"

    # bf16 fast path (bf16 MXU operands, f32 accumulation)
    out_bf16 = jax.block_until_ready(
        upsample_block(x, weight, bias, alpha, S, compute_dtype=jnp.bfloat16))
    errbf = float(jnp.max(jnp.abs(out_bf16 - ref)))
    assert errbf < 3e-1, f"bf16 kernel mismatch, max abs err {errbf}"

    print("KERNEL_OK")
</pallas_src>

<mosaic_0001>
module attributes {stable_mosaic.version = 11 : i64} {
  func.func @_upsample_kernel(%arg0: i32, %arg1: i32, %arg2: memref<1x64x256xf32, #tpu.memory_space<vmem>>, %arg3: memref<1x64x256xf32, #tpu.memory_space<vmem>>, %arg4: memref<1x64x256xf32, #tpu.memory_space<vmem>>, %arg5: memref<192x320xf32, #tpu.memory_space<vmem>>, %arg6: memref<192x2xf32, #tpu.memory_space<vmem>>, %arg7: memref<768x768xf32, #tpu.memory_space<vmem>>, %arg8: memref<1x64x768xf32, #tpu.memory_space<vmem>>) attributes {dimension_semantics = [#tpu.dimension_semantics<parallel>, #tpu.dimension_semantics<parallel>], iteration_bounds = array<i64: 2, 2>, scalar_prefetch = 0 : i64, scratch_operands = 0 : i64, tpu.core_type = #tpu.core_type<tc>, window_params = [{transform_indices = @transform_0, window_bounds = array<i64: 1, 64, 256>}, {transform_indices = @transform_1, window_bounds = array<i64: 1, 64, 256>}, {transform_indices = @transform_2, window_bounds = array<i64: 1, 64, 256>}, {pipeline_mode = #tpu.pipeline_mode<synchronous>, transform_indices = @transform_3, window_bounds = array<i64: 192, 320>}, {pipeline_mode = #tpu.pipeline_mode<synchronous>, transform_indices = @transform_4, window_bounds = array<i64: 192, 2>}, {pipeline_mode = #tpu.pipeline_mode<synchronous>, transform_indices = @transform_5, window_bounds = array<i64: 768, 768>}, {transform_indices = @transform_6, window_bounds = array<i64: 1, 64, 768>}]} {
    %c0 = arith.constant 0 : index
    %c0_0 = arith.constant 0 : index
    %c0_1 = arith.constant 0 : index
    %0 = vector.load %arg3[%c0, %c0_0, %c0_1] : memref<1x64x256xf32, #tpu.memory_space<vmem>>, vector<1x64x256xf32>
    %1 = vector.shape_cast %0 : vector<1x64x256xf32> to vector<64x256xf32>
    %c0_2 = arith.constant 0 : index
    %c0_3 = arith.constant 0 : index
    %c0_4 = arith.constant 0 : index
    %2 = vector.load %arg2[%c0_2, %c0_3, %c0_4] : memref<1x64x256xf32, #tpu.memory_space<vmem>>, vector<1x64x256xf32>
    %3 = vector.shape_cast %2 : vector<1x64x256xf32> to vector<64x256xf32>
    %c0_5 = arith.constant 0 : index
    %c0_6 = arith.constant 0 : index
    %c0_7 = arith.constant 0 : index
    %4 = vector.load %arg4[%c0_5, %c0_6, %c0_7] : memref<1x64x256xf32, #tpu.memory_space<vmem>>, vector<1x64x256xf32>
    %5 = vector.shape_cast %4 : vector<1x64x256xf32> to vector<64x256xf32>
    %c0_i32 = arith.constant 0 : i32
    %6 = arith.cmpi sgt, %arg1, %c0_i32 : i32
    %7 = arith.extui %6 : i1 to i32
    %8 = arith.sitofp %7 : i32 to f32
    %c1_i32 = arith.constant 1 : i32
    %9 = arith.cmpi slt, %arg1, %c1_i32 : i32
    %10 = arith.extui %9 : i1 to i32
    %11 = arith.sitofp %10 : i32 to f32
    %12 = tpu.iota {dimensions = array<i32: 1>} : vector<64x256xi32>
    %c2_i32 = arith.constant 2 : i32
    %13 = tpu.dynamic_rotate %1 by %c2_i32 dim 1 : vector<64x256xf32>, i32 -> vector<64x256xf32>
    %c2_i32_8 = arith.constant 2 : i32
    %14 = tpu.dynamic_rotate %3 by %c2_i32_8 dim 1 : vector<64x256xf32>, i32 -> vector<64x256xf32>
    %15 = vector.broadcast %8 : f32 to vector<64x256xf32>
    %16 = arith.mulf %14, %15 : vector<64x256xf32>
    %c2_i32_9 = arith.constant 2 : i32
    %17 = vector.broadcast %c2_i32_9 : i32 to vector<64x256xi32>
    %18 = arith.cmpi slt, %12, %17 : vector<64x256xi32>
    %19 = arith.select %18, %16, %13 : vector<64x256xi1>, vector<64x256xf32>
    %c1_i32_10 = arith.constant 1 : i32
    %20 = tpu.dynamic_rotate %1 by %c1_i32_10 dim 1 : vector<64x256xf32>, i32 -> vector<64x256xf32>
    %c1_i32_11 = arith.constant 1 : i32
    %21 = tpu.dynamic_rotate %3 by %c1_i32_11 dim 1 : vector<64x256xf32>, i32 -> vector<64x256xf32>
    %22 = vector.broadcast %8 : f32 to vector<64x256xf32>
    %23 = arith.mulf %21, %22 : vector<64x256xf32>
    %c1_i32_12 = arith.constant 1 : i32
    %24 = vector.broadcast %c1_i32_12 : i32 to vector<64x256xi32>
    %25 = arith.cmpi slt, %12, %24 : vector<64x256xi32>
    %26 = arith.select %25, %23, %20 : vector<64x256xi1>, vector<64x256xf32>
    %c255_i32 = arith.constant 255 : i32
    %27 = tpu.dynamic_rotate %1 by %c255_i32 dim 1 : vector<64x256xf32>, i32 -> vector<64x256xf32>
    %c255_i32_13 = arith.constant 255 : i32
    %28 = tpu.dynamic_rotate %5 by %c255_i32_13 dim 1 : vector<64x256xf32>, i32 -> vector<64x256xf32>
    %29 = vector.broadcast %11 : f32 to vector<64x256xf32>
    %30 = arith.mulf %28, %29 : vector<64x256xf32>
    %c255_i32_14 = arith.constant 255 : i32
    %31 = vector.broadcast %c255_i32_14 : i32 to vector<64x256xi32>
    %32 = arith.cmpi sge, %12, %31 : vector<64x256xi32>
    %33 = arith.select %32, %30, %27 : vector<64x256xi1>, vector<64x256xf32>
    %c254_i32 = arith.constant 254 : i32
    %34 = tpu.dynamic_rotate %1 by %c254_i32 dim 1 : vector<64x256xf32>, i32 -> vector<64x256xf32>
    %c254_i32_15 = arith.constant 254 : i32
    %35 = tpu.dynamic_rotate %5 by %c254_i32_15 dim 1 : vector<64x256xf32>, i32 -> vector<64x256xf32>
    %36 = vector.broadcast %11 : f32 to vector<64x256xf32>
    %37 = arith.mulf %35, %36 : vector<64x256xf32>
    %c254_i32_16 = arith.constant 254 : i32
    %38 = vector.broadcast %c254_i32_16 : i32 to vector<64x256xi32>
    %39 = arith.cmpi sge, %12, %38 : vector<64x256xi32>
    %40 = arith.select %39, %37, %34 : vector<64x256xi1>, vector<64x256xf32>
    %41 = tpu.concatenate %19, %26, %1, %33, %40 in 0 : vector<64x256xf32>, vector<64x256xf32>, vector<64x256xf32>, vector<64x256xf32>, vector<64x256xf32> -> vector<320x256xf32>
    %c0_17 = arith.constant 0 : index
    %c0_18 = arith.constant 0 : index
    %42 = vector.load %arg5[%c0_17, %c0_18] : memref<192x320xf32, #tpu.memory_space<vmem>>, vector<192x320xf32>
    %cst = arith.constant dense<0.000000e+00> : vector<192x256xf32>
    %43 = tpu.matmul %42, %41, %cst {dimension_numbers = #tpu.dot_dimension_numbers<[1], [0], [0], [1], [0, 0, 1, 1], [], []>} : vector<192x320xf32>, vector<320x256xf32>, vector<192x256xf32> -> vector<192x256xf32>
    %c0_19 = arith.constant 0 : index
    %c0_20 = arith.constant 0 : index
    %44 = vector.load %arg6[%c0_19, %c0_20] : memref<192x2xf32, #tpu.memory_space<vmem>>, vector<192x1xf32>
    %c0_21 = arith.constant 0 : index
    %c1 = arith.constant 1 : index
    %45 = vector.load %arg6[%c0_21, %c1] : memref<192x2xf32, #tpu.memory_space<vmem>>, vector<192x1xf32>
    %46 = vector.broadcast %44 : vector<192x1xf32> to vector<192x256xf32>
    %47 = arith.addf %43, %46 : vector<192x256xf32>
    %cst_22 = arith.constant 0.000000e+00 : f32
    %48 = vector.broadcast %cst_22 : f32 to vector<192x256xf32>
    %49 = arith.cmpf oge, %47, %48 : vector<192x256xf32>
    %50 = vector.broadcast %45 : vector<192x1xf32> to vector<192x256xf32>
    %51 = arith.mulf %50, %47 : vector<192x256xf32>
    %52 = arith.select %49, %47, %51 : vector<192x256xi1>, vector<192x256xf32>
    %53 = vector.extract_strided_slice %52 {offsets = [0, 0], sizes = [64, 256], strides = [1, 1]} : vector<192x256xf32> to vector<64x256xf32>
    %54 = vector.extract_strided_slice %52 {offsets = [64, 0], sizes = [64, 256], strides = [1, 1]} : vector<192x256xf32> to vector<64x256xf32>
    %55 = vector.extract_strided_slice %52 {offsets = [128, 0], sizes = [64, 256], strides = [1, 1]} : vector<192x256xf32> to vector<64x256xf32>
    %56 = tpu.concatenate %53, %54, %55 in 1 : vector<64x256xf32>, vector<64x256xf32>, vector<64x256xf32> -> vector<64x768xf32>
    %c0_23 = arith.constant 0 : index
    %c0_24 = arith.constant 0 : index
    %57 = vector.load %arg7[%c0_23, %c0_24] : memref<768x768xf32, #tpu.memory_space<vmem>>, vector<768x768xf32>
    %cst_25 = arith.constant dense<0.000000e+00> : vector<64x768xf32>
    %58 = tpu.matmul %56, %57, %cst_25 {dimension_numbers = #tpu.dot_dimension_numbers<[1], [0], [0], [1], [0, 0, 1, 1], [], []>} : vector<64x768xf32>, vector<768x768xf32>, vector<64x768xf32> -> vector<64x768xf32>
    %c0_26 = arith.constant 0 : index
    %c0_27 = arith.constant 0 : index
    %c0_28 = arith.constant 0 : index
    %59 = vector.load %arg8[%c0_26, %c0_27, %c0_28] : memref<1x64x768xf32, #tpu.memory_space<vmem>>, vector<1x64x768xf32>
    %60 = vector.shape_cast %59 : vector<1x64x768xf32> to vector<64x768xf32>
    %61 = vector.shape_cast %58 : vector<64x768xf32> to vector<1x64x768xf32>
    tpu.vector_store %arg8[%c0_26, %c0_27, %c0_28], %61 {strides = array<i32>} : memref<1x64x768xf32, #tpu.memory_space<vmem>>, vector<1x64x768xf32>,
    return
  }
  func.func @transform_0(%arg0: i32, %arg1: i32) -> (i32, i32, i32) {
    %c1_i32 = arith.constant 1 : i32
    %0 = arith.subi %arg1, %c1_i32 : i32
    %c0_i32 = arith.constant 0 : i32
    %1 = arith.maxsi %0, %c0_i32 : i32
    %c0_i32_0 = arith.constant 0 : i32
    %c0_i32_1 = arith.constant 0 : i32
    return %arg0, %c0_i32_0, %1 : i32, i32, i32
  }
  func.func @transform_1(%arg0: i32, %arg1: i32) -> (i32, i32, i32) {
    %c0_i32 = arith.constant 0 : i32
    %c0_i32_0 = arith.constant 0 : i32
    return %arg0, %c0_i32, %arg1 : i32, i32, i32
  }
  func.func @transform_2(%arg0: i32, %arg1: i32) -> (i32, i32, i32) {
    %c1_i32 = arith.constant 1 : i32
    %0 = arith.addi %arg1, %c1_i32 : i32
    %c1_i32_0 = arith.constant 1 : i32
    %1 = arith.minsi %0, %c1_i32_0 : i32
    %c0_i32 = arith.constant 0 : i32
    %c0_i32_1 = arith.constant 0 : i32
    return %arg0, %c0_i32, %1 : i32, i32, i32
  }
  func.func @transform_3(%arg0: i32, %arg1: i32) -> (i32, i32) {
    %c0_i32 = arith.constant 0 : i32
    %c0_i32_0 = arith.constant 0 : i32
    %c0_i32_1 = arith.constant 0 : i32
    return %c0_i32, %c0_i32_0 : i32, i32
  }
  func.func @transform_4(%arg0: i32, %arg1: i32) -> (i32, i32) {
    %c0_i32 = arith.constant 0 : i32
    %c0_i32_0 = arith.constant 0 : i32
    %c0_i32_1 = arith.constant 0 : i32
    return %c0_i32, %c0_i32_0 : i32, i32
  }
  func.func @transform_5(%arg0: i32, %arg1: i32) -> (i32, i32) {
    %c0_i32 = arith.constant 0 : i32
    %c0_i32_0 = arith.constant 0 : i32
    %c0_i32_1 = arith.constant 0 : i32
    return %c0_i32, %c0_i32_0 : i32, i32
  }
  func.func @transform_6(%arg0: i32, %arg1: i32) -> (i32, i32, i32) {
    %c0_i32 = arith.constant 0 : i32
    %c0_i32_0 = arith.constant 0 : i32
    return %arg0, %c0_i32, %arg1 : i32, i32, i32
  }
}

</mosaic_0001>

<bundles_post_ra>
// kernel: tpu_custom_call.1
= control target key start
LH: loop header
LB: loop body
LE: loop exit
PB: predicated region body
PF: predicated region fallthrough
CT: control target
= control target key end

     0   :  { %s7277_s0 = inlined_call_operand.hbm [shape: f32[2,64,512], index: 0, kind: input, shape index: {}]   ;;  %s7278_s1 = inlined_call_operand.hbm [shape: f32[2,64,512], index: 1, kind: input, shape index: {}]   ;;  %s7279_s2 = inlined_call_operand.hbm [shape: f32[2,64,512], index: 2, kind: input, shape index: {}]   ;;  %s7280_s3 = inlined_call_operand.hbm [shape: f32[192,320], index: 3, kind: input, shape index: {}]   ;;  %s7281_s4 = inlined_call_operand.vmem [shape: f32[192,2], index: 4, kind: input, shape index: {}]   ;;  %s7282_s5 = inlined_call_operand.hbm [shape: f32[768,768], index: 5, kind: input, shape index: {}]   ;;  %s7283_s6 = inlined_call_operand.hbm [shape: f32[2,64,1536], index: 6, kind: output, shape index: {}]  }
   0x1   :  { %7330 = sst [smem:[#allocation44_spill]] %s7277_s0 }
   0x2   :  { %7331 = sst [smem:[#allocation45_spill]] %s7278_s1 }
   0x3   :  { %7332 = sst [smem:[#allocation46_spill]] %s7279_s2 }
   0x4   :  { %7333 = sst [smem:[#allocation47_spill]] %s7280_s3 }
   0x5   :  { %7334 = sst [smem:[#allocation48_spill]] %s7281_s4 }
   0x6   :  { %7335 = sst [smem:[#allocation49_spill]] %s7282_s5 }
   0x7   :  { %7336 = sst [smem:[#allocation50_spill]] %s7283_s6 }
   0x8   :  { %11 = vsyncpa [#allocation3], 0 }
   0x9   :  { %13 = vsyncpa [#allocation3 + $0x1], 0 }
   0xa   :  { %14 = vsyncpa [#allocation6], 0 }
   0xb   :  { %16 = vsyncpa [#allocation6 + $0x1], 0 }
   0xc   :  { %17 = vsyncpa [#allocation9], 0 }
   0xd   :  { %18 = vsyncpa [#allocation4], 0 }
   0xe   :  { %20 = vsyncpa [#allocation4 + $0x1], 0  ;;  %s5412_s21 = smov 0   ;;  %s5414_s22 = smov 0  }
   0xf   :  { %s5416_s23 = smov 0   ;;  %s5418_s24 = smov 0  }
  0x10   :  { %s5420_s25 = smov 0   ;;  %s5422_s26 = smov 0  }
  0x11   :  { %s5424_s27 = smov 0   ;;  %s5426_s28 = smov 0  }
  0x12   :  { %s5428_s29 = smov 0   ;;  %s5430_s30 = smov 0  }
  0x13   :  { %s5432_s7 = smov 0   ;;  %s5434_s8 = smov 0  }
  0x14   :  { %s5436_s9 = smov 0   ;;  %s5438_s10 = smov 0  }
  0x15 LB: > { %7337 = sst [smem:[#allocation17_spill]] %s5312_s24  ;;  %s5481_s11 = sadd.s32 4294967295, %s5352_s10   ;;  %s5352_s10 = sphi %s5438_s10, %s26_s10   ;;  %s5348_s9 = sphi %s5436_s9, %s7443_s9   ;;  %s5344_s8 = sphi %s5434_s8, %s7432_s8   ;;  %s5340_s7 = sphi %s5432_s7, %s7442_s7   ;;  %s5336_s30 = sphi %s5430_s30, %s7431_s30   ;;  %s5332_s29 = sphi %s5428_s29, %s7441_s29   ;;  %s5328_s28 = sphi %s5426_s28, %s7440_s28   ;;  %s5324_s27 = sphi %s5424_s27, %s7439_s27   ;;  %s5320_s26 = sphi %s5422_s26, %s7438_s26   ;;  %s5316_s25 = sphi %s5420_s25, %s7437_s25   ;;  %s5312_s24 = sphi %s5418_s24, %s7430_s24   ;;  %s5308_s23 = sphi %s5416_s23, %s7436_s23   ;;  %s5304_s22 = sphi %s5414_s22, %s7435_s22   ;;  %s5300_s21 = sphi %s5412_s21, %s7434_s21  }
  0x16   : > { %7338 = sst [smem:[#allocation18_spill]] %s5316_s25  ;;  %p128_p0 = scmp.ne.s32.totalorder %s5304_s22, %s5300_s21 }
  0x17   : > { %7339 = sst [smem:[#allocation19_spill]] %s5336_s30  ;;  %p7285_p1 = scmp.eq.s32.totalorder %s5481_s11, 0 }
  0x18   : > { %7340 = sst [smem:[#allocation20_spill]] %s5340_s7  ;;  %p3777_p3 = scmp.ge.s32.totalorder %s5352_s10, 1 }
  0x19   : > { %7341 = sst [smem:[#allocation21_spill]] %s5344_s8  ;;  %p230_p4 = scmp.lt.s32.totalorder %s5352_s10, 5 }
  0x1a   : > { %p5490_p5 = por %p128_p0, %p7285_p1  ;;  %s5354_s14 = smov [#allocation8]  }
  0x1b   : > { %p5494_p6 = pnand %p3777_p3, %p230_p4  ;;  %s242_s15 = sshll.u32 %s5354_s14, 4  ;;  %s243_s15 = int_to_ptr.vmem [resolvable:$true] %s242_s15 }
  0x1c   : > { %s7342_s12 = scalar_select %p5490_p5, 1, 0 }
  0x1d   : > { %s7344_s13 = scalar_select %p5494_p6, 1, 0 }
  0x1e   : > { %7343 = sst [smem:[#allocation22_spill]] %s7342_s12  ;;  %p4693_p7 = pneg %p5494_p6 }
  0x1f   : > { %7345 = sst [smem:[#allocation23_spill]] %s7344_s13  ;;  %s7347_s3 = sld [smem:[#allocation47_spill]] }
  0x20   : > { %p5502_p8 = pnand %p4693_p7, %p7285_p1 }
  0x22   : > { %p7300_p10 = pneg %p5502_p8 }
  0x25   : > { %s5044_s19 = scalar_lea.hbm %s7347_s3, 9216 }
  0x26   : > { %p5045_p9 = scmp.ne.s32.totalorder %s7347_s3, %s5044_s19  ;;  %p5051_p13 = scmp.lt.u32.totalorder %s5044_s19, %s7347_s3 }
  0x28   : > { %p5047_p11 = pnand %p7300_p10, %p5045_p9 }
  0x2a   : > { %p5048_p12 = pneg %p5047_p11 }
  0x2c   : > { %p5053_p0 = pnand %p5051_p13, %p5048_p12 }
  0x2e   : > { %5056 = shalt.err (!%p5053_p0)
}
  0x2f   : > { %s5057_s17 = scalar_lea.vmem %s243_s15, 9216  ;;  %p5065_p1 = scmp.lt.s32.totalorder %s243_s15, %s243_s15 }
  0x30   : > { %p5058_p3 = scmp.ne.s32.totalorder %s243_s15, %s5057_s17  ;;  %p5066_p2 = scmp.lt.s32.totalorder %s5057_s17, %s5057_s17 }
  0x32   : > { %p5060_p4 = pnand %p5058_p3, %p7300_p10  ;;  %p5067_p5 = por %p5066_p2, %p5065_p1 }
  0x34   : > { %p5061_p7 = pneg %p5060_p4 }
  0x36   : > { %p5068_p6 = pnand %p5067_p5, %p5061_p7 }
  0x38   : > { %5071 = shalt.err (!%p5068_p6)
}
  0x39   : > { %s5355_s18 = smov 384   ;;  %s5356_s6 = smov 24  }
  0x3a   : > { %4696 = dma.hbm_to_vmem [thread:$0]  (!%p5502_p8), %s7347_s3, 9216, %s243_s15, [#allocation9], %s5355_s18, %s5355_s18, %s5356_s6  }
  0x3b   : > { %s3774_s21 = sadd.s32 4294967294, %s5352_s10   ;;  %s35_s14 = sadd.s32 1, %s5344_s8 }
  0x3c   : > { %p36_p1 = scmp.ge.s32.totalorder %s35_s14, 2  ;;  %s38_s17 = sadd.s32 1, %s5348_s9 }
  0x3d   : > { %p7299_p2 = scmp.eq.s32.totalorder %s5352_s10, 0  ;;  %p88_p5 = scmp.ne.s32.totalorder %s5320_s26, %s5316_s25 }
  0x3e   : > { %s7445_s14 = smov (%p36_p1, %s35_s14), 0  ;;  %s7447_s17 = smov (!%p36_p1, %s38_s17), %s5348_s9 }
  0x3f   : > { %7348 = sst [smem:[#allocation24_spill]] %s7445_s14  ;;  %p94_p6 = scmp.ne.s32.totalorder %s5316_s25, %s5312_s24 }
  0x40   : > { %p223_p9 = scmp.eq.s32.totalorder %s3774_s21, 3  ;;  %p5546_p11 = por %p88_p5, %p7299_p2 }
  0x41   : > { %p7350_p12 = scmp.eq.s32.totalorder %s5481_s11, 3  ;;  %p7353_p0 = scmp.eq.s32.totalorder %s5481_s11, 0 }
  0x42   : > { %p5562_p4 = por %p223_p9, %p94_p6  ;;  %p7298_p7 = scmp.lt.s32.totalorder %s5352_s10, 4 }
  0x43   : > { %p5552_p13 = por %p7350_p12, %p88_p5  ;;  %p5558_p3 = por %p94_p6, %p7353_p0 }
  0x44   : > { %s7355_s19 = scalar_select %p5562_p4, 1, 0 }
  0x45   : > { %s7351_s18 = scalar_select %p5552_p13, 1, 0 }
  0x46   : > { %s7354_s6 = scalar_select %p5558_p3, 1, 0 }
  0x47   : > { %7352 = sst [smem:[#allocation25_spill]] %s7351_s18  ;;  %s3784_s20 = sshll.u32 %s5348_s9, 5 }
  0x48   : > { %7356 = sst [smem:[#allocation26_spill]] %s7355_s19  ;;  %s298_s21 = sand.u32 1, %s5352_s10  }
  0x49   : > { %s300_s7 = sand.u32 1, %s5320_s26   ;;  %s3787_s3 = sshll.u32 %s5344_s8, 1 }
  0x4a   : > { %s3786_s4 = sshll.u32 %s300_s7, 7  ;;  %s308_s24 = sadd.s32 %s3787_s3, %s3784_s20 }
  0x4b   : > { %s3789_s30 = sshll.u32 %s308_s24, 7  ;;  %s302_s12 = scalar_lea.vmem [#allocation5], %s3786_s4 }
  0x4c   : > { %s311_s25 = sshll.u32 %s302_s12, 4  ;;  %s7357_s1 = sld [smem:[#allocation45_spill]]  ;;  %s5576_s25 = int_to_ptr.vmem [resolvable:$true] %s311_s25 }
  0x4d   : > { %p5582_p1 = pnand %p7298_p7, %p5546_p11  ;;  %s5357_s3 = smov [#allocation10]  }
  0x4e   : > { %s258_s4 = sshll.u32 %s5357_s3, 4  ;;  %s5588_s24 = scalar_lea.sflag [#allocation6], %s298_s21  ;;  %s5586_s4 = int_to_ptr.vmem [resolvable:$true] %s258_s4 }
  0x4f   : > { %p5074_p6 = pneg %p5582_p1 }
  0x52   : > { %s5574_s2 = scalar_lea.hbm %s7357_s1, %s3789_s30  ;;  %s5077_s15 = scalar_lea.hbm %s7357_s1, 8192 }
  0x53   : > { %s5072_s30 = scalar_lea.hbm %s5574_s2, 2048  ;;  %p5078_p11 = scmp.lt.u32.totalorder %s5574_s2, %s7357_s1 }
  0x54   : > { %p5073_p5 = scmp.ne.s32.totalorder %s5574_s2, %s5072_s30  ;;  %p5079_p0 = scmp.lt.u32.totalorder %s5077_s15, %s5072_s30 }
  0x55   : > { %p5081_p2 = scmp.lt.u32.totalorder %s5072_s30, %s5574_s2 }
  0x56   : > { %p5075_p9 = pnand %p5074_p6, %p5073_p5  ;;  %p5080_p7 = por %p5079_p0, %p5078_p11 }
  0x58   : > { %p5076_p12 = pneg %p5075_p9  ;;  %p5082_p10 = por %p5081_p2, %p5080_p7 }
  0x5a   : > { %p5083_p4 = pnand %p5082_p10, %p5076_p12 }
  0x5c   : > { %5086 = shalt.err (!%p5083_p4)
}
  0x5d   : > { %s5087_s21 = scalar_lea.vmem %s5576_s25, 2048  ;;  %s5358_s3 = smov [#allocation5]  }
  0x5e   : > { %p5088_p5 = scmp.ne.s32.totalorder %s5576_s25, %s5087_s21  ;;  %s5092_s12 = sshll.u32 %s5358_s3, 4  ;;  %s5093_s12 = int_to_ptr.vmem [resolvable:$false] %s5092_s12 }
  0x5f   : > { %s5094_s13 = scalar_lea.vmem %s5093_s12, 4096  ;;  %p5095_p3 = scmp.lt.s32.totalorder %s5576_s25, %s5093_s12 }
  0x60   : > { %p5090_p9 = pnand %p5088_p5, %p5074_p6  ;;  %p5096_p11 = scmp.lt.s32.totalorder %s5094_s13, %s5087_s21 }
  0x62   : > { %p5091_p13 = pneg %p5090_p9  ;;  %p5097_p0 = por %p5096_p11, %p5095_p3 }
  0x64   : > { %p5098_p2 = pnand %p5097_p0, %p5091_p13 }
  0x66   : > { %5101 = shalt.err (!%p5098_p2)
}
  0x67   : > { %s7304_s30 = smov 512   ;;  %s7306_s15 = smov 256  }
  0x68   : > { %s7308_s18 = smov 16   ;;  %s7359_s5 = sld [smem:[#allocation49_spill]] }
  0x69   : > { %4706 = dma.hbm_to_vmem [thread:$0]  (!%p5582_p1), %s5574_s2, 2048, %s5576_s25, %s5588_s24, %s7304_s30, %s7306_s15, %s7308_s18  }
  0x6a   : > { %p7360_p13 = pneg %p5502_p8 }
  0x6e   : > { %s5102_s21 = scalar_lea.hbm %s7359_s5, 73728 }
  0x6f   : > { %p5103_p10 = scmp.ne.s32.totalorder %s7359_s5, %s5102_s21  ;;  %p5109_p7 = scmp.lt.u32.totalorder %s5102_s21, %s7359_s5 }
  0x71   : > { %p5105_p3 = pnand %p5103_p10, %p7360_p13 }
  0x73   : > { %p5106_p4 = pneg %p5105_p3 }
  0x75   : > { %p5111_p6 = pnand %p5109_p7, %p5106_p4 }
  0x77   : > { %5114 = shalt.err (!%p5111_p6)
}
  0x78   : > { %s5115_s2 = scalar_lea.vmem %s5586_s4, 73728  ;;  %p7361_p12 = pmov %p7360_p13 }
  0x79   : > { %p5116_p1 = scmp.ne.s32.totalorder %s5586_s4, %s5115_s2  ;;  %p5123_p11 = scmp.lt.s32.totalorder %s5586_s4, %s5586_s4 }
  0x7a   : > { %p5124_p0 = scmp.lt.s32.totalorder %s5115_s2, %s5115_s2 }
  0x7b   : > { %p5118_p5 = pnand %p5116_p1, %p7361_p12 }
  0x7c   : > { %p5125_p2 = por %p5124_p0, %p5123_p11 }
  0x7d   : > { %p5119_p9 = pneg %p5118_p5 }
  0x7f   : > { %p5126_p10 = pnand %p5125_p2, %p5119_p9 }
  0x81   : > { %5129 = shalt.err (!%p5126_p10)
}
  0x82   : > { %s5362_s1 = smov 768   ;;  %s5363_s25 = smov 48  }
  0x83   : > { %4699 = dma.hbm_to_vmem [thread:$0]  (!%p5502_p8), %s7359_s5, 73728, %s5586_s4, [#allocation9], %s5362_s1, %s5362_s1, %s5363_s25  }
  0x84   : > { %p40_p13 = scmp.ge.s32.totalorder %s7447_s17, 2  ;;  %s53_s3 = sadd.s32 1, %s5332_s29 }
  0x85   : > { %p60_p3 = scmp.ne.s32.totalorder %s5332_s29, %s5328_s28  ;;  %p66_p4 = scmp.ne.s32.totalorder %s5328_s28, %s5324_s27 }
  0x86   : > { %s7449_s17 = smov (%p40_p13, %s7447_s17), 0  ;;  %s7363_s16 = ssub.s32 %s5344_s8, %s7445_s14 }
  0x87   : > { %7362 = sst [smem:[#allocation27_spill]] %s7449_s17  ;;  %s5650_s20 = ssub.s32 %s5348_s9, %s7449_s17 }
  0x88   : > { %s78_s21 = sor.u32 %s7363_s16, %s5650_s20  ;;  %p7364_p7 = scmp.eq.s32.totalorder %s5352_s10, 0 }
  0x89   : > { %p7310_p8 = scmp.eq.s32.totalorder %s5650_s20, 0  ;;  %p7366_p1 = scmp.eq.s32.totalorder %s5481_s11, 0 }
  0x8a   : > { %p5663_p6 = por %p7364_p7, %p60_p3  ;;  %p79_p5 = scmp.eq.s32.totalorder %s78_s21, 0 }
  0x8b   : > { %p5670_p12 = por %p7366_p1, %p66_p4  ;;  %s272_s13 = sand.u32 1, %s5332_s29  }
  0x8c   : > { %s5678_s2 = scalar_select %p7310_p8, %s5332_s29, %s53_s3  }
  0x8d   : > { %s7368_s27 = sadd.s32 1, %s5320_s26  ;;  %s3781_s25 = sshll.u32 %s272_s13, 7 }
  0x8e   : > { %s5683_s1 = scalar_select %p79_p5, %s5320_s26, %s7368_s27  }
  0x8f   : > { %s276_s19 = scalar_lea.vmem [#allocation2], %s3781_s25  ;;  %s5294_s16 = sshll.u32 %s5348_s9, 12 }
  0x90   : > { %s288_s7 = sshll.u32 %s276_s19, 4  ;;  %s7369_s0 = sld [smem:[#allocation44_spill]]  ;;  %s5686_s7 = int_to_ptr.vmem [resolvable:$true] %s288_s7 }
  0x91   : > { %p7370_p9 = scmp.lt.s32.totalorder %s5352_s10, 4  ;;  %s5703_s21 = scalar_lea.sflag [#allocation3], %s272_s13 }
  0x93   : > { %p5699_p11 = pnand %p7370_p9, %p5663_p6 }
  0x95   : > { %p5132_p2 = pneg %p5699_p11 }
  0x96   : > { %s5693_s18 = scalar_lea.hbm %s7369_s0, %s5294_s16  ;;  %s5135_s4 = scalar_lea.hbm %s7369_s0, 8192 }
  0x97   : > { %s5130_s27 = scalar_lea.hbm %s5693_s18, 2048  ;;  %p5136_p3 = scmp.lt.u32.totalorder %s5693_s18, %s7369_s0 }
  0x98   : > { %p5131_p0 = scmp.ne.s32.totalorder %s5693_s18, %s5130_s27  ;;  %p5137_p4 = scmp.lt.u32.totalorder %s5135_s4, %s5130_s27 }
  0x99   : > { %p5139_p6 = scmp.lt.u32.totalorder %s5130_s27, %s5693_s18 }
  0x9a   : > { %p5133_p10 = pnand %p5132_p2, %p5131_p0  ;;  %p5138_p7 = por %p5137_p4, %p5136_p3 }
  0x9c   : > { %p5134_p13 = pneg %p5133_p10  ;;  %p5140_p1 = por %p5139_p6, %p5138_p7 }
  0x9e   : > { %p5141_p5 = pnand %p5140_p1, %p5134_p13 }
  0xa0   : > { %5144 = shalt.err (!%p5141_p5)
}
  0xa1   : > { %s5145_s13 = scalar_lea.vmem %s5686_s7, 2048  ;;  %s5364_s30 = smov [#allocation2]  }
  0xa2   : > { %p5146_p9 = scmp.ne.s32.totalorder %s5686_s7, %s5145_s13  ;;  %s5150_s15 = sshll.u32 %s5364_s30, 4  ;;  %s5151_s15 = int_to_ptr.vmem [resolvable:$false] %s5150_s15 }
  0xa3   : > { %s5152_s25 = scalar_lea.vmem %s5151_s15, 4096  ;;  %p5153_p8 = scmp.lt.s32.totalorder %s5686_s7, %s5151_s15 }
  0xa4   : > { %p5148_p0 = pnand %p5146_p9, %p5132_p2  ;;  %p5154_p3 = scmp.lt.s32.totalorder %s5152_s25, %s5145_s13 }
  0xa6   : > { %p5149_p10 = pneg %p5148_p0  ;;  %p5155_p4 = por %p5154_p3, %p5153_p8 }
  0xa8   : > { %p5156_p7 = pnand %p5155_p4, %p5149_p10 }
  0xaa   : > { %5159 = shalt.err (!%p5156_p7)
}
  0xab   : > { %s7372_s27 = smov 16   ;;  %s7373_s4 = smov 256  }
  0xac   : > { %s7374_s19 = smov 512   ;;  %s115_s13 = sadd.s32 1, %s5308_s23 }
  0xad   : > { %4703 = dma.hbm_to_vmem [thread:$0]  (!%p5699_p11), %s5693_s18, 2048, %s5686_s7, %s5703_s21, %s7374_s19, %s7373_s4, %s7372_s27  }
  0xae   : > { %p122_p8 = scmp.ne.s32.totalorder %s5308_s23, %s5304_s22  ;;  %s323_s30 = sand.u32 1, %s5308_s23  }
  0xaf   : > { %p7375_p2 = scmp.eq.s32.totalorder %s5352_s10, 0  ;;  %s3790_s3 = sshll.u32 %s323_s30, 7 }
  0xb0   : > { %s5296_s15 = sadd.s32 256, %s5294_s16  ;;  %s7376_s5 = sld [smem:[#allocation46_spill]] }
  0xb1   : > { %p124_p13 = por %p122_p8, %p7375_p2  ;;  %s325_s14 = scalar_lea.vmem [#allocation7], %s3790_s3 }
  0xb2   : > { %s337_s8 = sshll.u32 %s325_s14, 4  ;;  %p7377_p11 = scmp.eq.s32.totalorder %s5650_s20, 0  ;;  %s5752_s8 = int_to_ptr.vmem [resolvable:$true] %s337_s8 }
  0xb3   : > { %p7378_p6 = scmp.lt.s32.totalorder %s5352_s10, 4 }
  0xb4   : > { %s5750_s18 = scalar_select %p7377_p11, %s5308_s23, %s115_s13  }
  0xb5   : > { %p5756_p1 = pnand %p7378_p6, %p124_p13 }
  0xb6   : > { %s5745_s17 = scalar_lea.hbm %s7376_s5, %s5296_s15  ;;  %s5165_s16 = scalar_lea.hbm %s7376_s5, 8192 }
  0xb7   : > { %s5160_s0 = scalar_lea.hbm %s5745_s17, 2048  ;;  %p5162_p9 = pneg %p5756_p1 }
  0xb8   : > { %p5161_p5 = scmp.ne.s32.totalorder %s5745_s17, %s5160_s0  ;;  %p5166_p3 = scmp.lt.u32.totalorder %s5745_s17, %s7376_s5 }
  0xb9   : > { %p5167_p4 = scmp.lt.u32.totalorder %s5165_s16, %s5160_s0  ;;  %p5169_p8 = scmp.lt.u32.totalorder %s5160_s0, %s5745_s17 }
  0xba   : > { %p5163_p0 = pnand %p5162_p9, %p5161_p5 }
  0xbb   : > { %p5168_p7 = por %p5167_p4, %p5166_p3 }
  0xbc   : > { %p5164_p10 = pneg %p5163_p0 }
  0xbd   : > { %p5170_p2 = por %p5169_p8, %p5168_p7 }
  0xbf   : > { %p5171_p13 = pnand %p5170_p2, %p5164_p10 }
  0xc1   : > { %5174 = shalt.err (!%p5171_p13)
}
  0xc2   : > { %s5175_s30 = scalar_lea.vmem %s5752_s8, 2048  ;;  %s5365_s3 = smov [#allocation7]  }
  0xc3   : > { %p5176_p11 = scmp.ne.s32.totalorder %s5752_s8, %s5175_s30  ;;  %s5180_s15 = sshll.u32 %s5365_s3, 4  ;;  %s5181_s15 = int_to_ptr.vmem [resolvable:$false] %s5180_s15 }
  0xc4   : > { %s5182_s25 = scalar_lea.vmem %s5181_s15, 4096  ;;  %p5183_p0 = scmp.lt.s32.totalorder %s5752_s8, %s5181_s15 }
  0xc5   : > { %p5178_p6 = pnand %p5176_p11, %p5162_p9  ;;  %p5184_p3 = scmp.lt.s32.totalorder %s5182_s25, %s5175_s30 }
  0xc7   : > { %p5179_p5 = pneg %p5178_p6  ;;  %p5185_p4 = por %p5184_p3, %p5183_p0 }
  0xc9   : > { %p5186_p7 = pnand %p5185_p4, %p5179_p5 }
  0xcb   : > { %5189 = shalt.err (!%p5186_p7)
}
  0xcc   : > { %4709 = dma.hbm_to_vmem [thread:$0]  (!%p5756_p1), %s5745_s17, 2048, %s5752_s8, %s5588_s24, %s7374_s19, %s7373_s4, %s7372_s27  }
  0xcd   : > { %s7380_s0 = sld [smem:[#allocation23_spill]] }
  0xd3   : > { %p7381_p9 = scmp.ne.s32.totalorder %s7380_s0, 0 }
  0xd5   : > { %349 = sbr.rel (%p7381_p9) target bundleno = 1405 (0x57d), region = 44 }
  0xdc   : > { %s351_s14 = sand.u32 1, %s5328_s28  }
  0xdd   : > { %s3795_s20 = sshll.u32 %s351_s14, 7  ;;  %s352_s16 = scalar_lea.sflag [#allocation3], %s351_s14 }
  0xde   : > { %s5792_s21 = scalar_lea.vmem [#allocation2], %s3795_s20 }
  0xdf   : > { %5275 = dma.done.wait (%p5670_p12), %s352_s16, 2048  }
  0xe0   : > { %5277 = vsyncadd (%p5670_p12), %s352_s16, 4294965248  ;;  %s7382_s7 = sld [smem:[#allocation18_spill]]  ;;  %s360_s13 = sand.u32 1, %s5481_s11  }
  0xe1   : > { %s361_s24 = scalar_lea.sflag [#allocation6], %s360_s13  ;;  %p7383_p1 = scmp.ne.s32.totalorder %s7354_s6, 0 }
  0xe6   : > { %s5800_s8 = sand.u32 1, %s7382_s7  }
  0xe7   : > { %s3796_s17 = sshll.u32 %s5800_s8, 7 }
  0xe8   : > { %s5803_s27 = scalar_lea.vmem [#allocation5], %s3796_s17 }
  0xe9   : > { %5279 = dma.done.wait (%p7383_p1), %s361_s24, 2048  }
  0xea   : > { %5281 = vsyncadd (%p7383_p1), %s361_s24, 4294965248  ;;  %s7384_s4 = sld [smem:[#allocation22_spill]]  ;;  %s371_s12 = sand.u32 1, %s5304_s22  }
  0xeb   : > { %s3797_s19 = sshll.u32 %s371_s12, 7 }
  0xec   : > { %s5810_s30 = scalar_lea.vmem [#allocation7], %s3797_s19 }
  0xf0   : > { %p7385_p12 = scmp.ne.s32.totalorder %s7384_s4, 0 }
  0xf2   : > { %5283 = dma.done.wait (%p7385_p12), %s361_s24, 2048  }
  0xf3   : > { %5285 = vsyncadd (%p7385_p12), %s361_s24, 4294965248  ;;  %p7386_p10 = scmp.eq.s32.totalorder %s5481_s11, 0 }
  0xf5   : > { %5287 = dma.done.wait (%p7386_p10), [#allocation9], 82944   ;;  %p7387_p8 = pmov %p7386_p10 }
  0xf6   : > { %v5821_v0 = vld [vmem:[%s5792_s21 + $0x8] sm:$0xff]  ;;  %v5824_v1 = vld [vmem:[%s5792_s21] sm:$0xff]  ;;  %v5827_v2 = vld [vmem:[%s5792_s21 + $0x18] sm:$0xff]  ;;  %s5366_s6 = smov 2   ;;  %s5367_s11 = smov 1   ;;  %v484_v48 = vlaneseq  ;;  %vm1227_vm6 = vcmask 523264  }
  0xf7   : > { %5289 = vsyncadd (%p7387_p8), [#allocation9], 4294884352  ;;  %552 = vrot.lane.b32.xlu1 %v5821_v0, %s5366_s6  ;;  %536 = vrot.lane.b32.xlu0 %v5824_v1, %s5366_s6  ;;  %v448_v3 = vld [vmem:[%s5792_s21 + $0x10] sm:$0xff]  ;;  %v5835_v4 = vld [vmem:[%s5803_s27 + $0x8] sm:$0xff]  ;;  %s7388_s3 = sld [smem:[#allocation19_spill]]  ;;  %s5368_s15 = smov 127  }
  0xf8   : > { %v5838_v5 = vld [vmem:[%s5803_s27 + $0x18] sm:$0xff]  ;;  %v5841_v6 = vld [vmem:[%s5803_s27] sm:$0xff]  ;;  %v5844_v7 = vld [vmem:[%s5803_s27 + $0x10] sm:$0xff]  ;;  %v6013_v50 = vand.u32 127, %v484_v48  ;;  %s5369_s14 = smov 126   ;;  %s7389_s13 = sld [smem:[#allocation48_spill]] }
  0xf9   : > { %v5851_v8 = vpack.i.bf16 %v5838_v5, %v5835_v4  ;;  %v5855_v9 = vpack.i.bf16 %v5844_v7, %v5841_v6  ;;  %v452_v10 = vld [vmem:[%s5792_s21 + $0x30] sm:$0xff]  ;;  %v450_v11 = vld [vmem:[%s5792_s21 + $0x20] sm:$0xff]  ;;  %v453_v12 = vld [vmem:[%s5792_s21 + $0x38] sm:$0xff]  ;;  %s7423_s24 = sld [smem:[#allocation25_spill]]  ;;  %s7424_s19 = sld [smem:[#allocation50_spill]] }
  0xfa   : > { %v451_v13 = vld [vmem:[%s5792_s21 + $0x28] sm:$0xff]  ;;  %v5871_v15 = vld [vmem:[%s5803_s27 + $0x38] sm:$0xff]  ;;  %v5874_v16 = vld [vmem:[%s5803_s27 + $0x20] sm:$0xff]  ;;  %vm519_vm0 = vcmp.lt.s32.totalorder %v6013_v50, 2  ;;  %vm650_vm1 = vcmp.lt.s32.totalorder %v6013_v50, 1  ;;  %vm780_vm2 = vcmp.lt.s32.totalorder %v6013_v50, 127 }
  0xfb   : > { %554 = vrot.lane.b32.xlu1 %v5827_v2, %s5366_s6  ;;  %538 = vrot.lane.b32.xlu0 %v448_v3, %s5366_s6  ;;  %v5868_v14 = vld [vmem:[%s5803_s27 + $0x28] sm:$0xff]  ;;  %v5877_v17 = vld [vmem:[%s5803_s27 + $0x30] sm:$0xff]  ;;  %vm912_vm4 = vcmp.lt.s32.totalorder %v6013_v50, 126 }
  0xfc   : > { %v5883_v18 = vpack.i.bf16 %v5871_v15, %v5868_v14  ;;  %v5887_v19 = vpack.i.bf16 %v5877_v17, %v5874_v16  ;;  %v456_v20 = vld [vmem:[%s5792_s21 + $0x50] sm:$0xff]  ;;  %v454_v21 = vld [vmem:[%s5792_s21 + $0x40] sm:$0xff]  ;;  %v457_v22 = vld [vmem:[%s5792_s21 + $0x58] sm:$0xff] }
  0xfd   : > { %v455_v23 = vld [vmem:[%s5792_s21 + $0x48] sm:$0xff]  ;;  %v5903_v25 = vld [vmem:[%s5803_s27 + $0x58] sm:$0xff]  ;;  %v5906_v26 = vld [vmem:[%s5803_s27 + $0x40] sm:$0xff]  ;;  %p478_p2 = scmp.gt.s32.totalorder %s7388_s3, 0  ;;  %p481_p13 = scmp.lt.s32.totalorder %s7388_s3, 1 }
  0xfe   : > { %v5900_v24 = vld [vmem:[%s5803_s27 + $0x48] sm:$0xff]  ;;  %v5909_v27 = vld [vmem:[%s5803_s27 + $0x50] sm:$0xff]  ;;  %v458_v31 = vld [vmem:[%s5792_s21 + $0x60] sm:$0xff] }
  0xff   : > { %4857 = vrot.lane.b32.xlu1 %v5851_v8, %s5366_s6  ;;  %4852 = vrot.lane.b32.xlu0 %v5855_v9, %s5366_s6  ;;  %v5915_v28 = vpack.i.bf16 %v5903_v25, %v5900_v24  ;;  %v5919_v29 = vpack.i.bf16 %v5909_v27, %v5906_v26  ;;  %v460_v30 = vld [vmem:[%s5792_s21 + $0x70] sm:$0xff]  ;;  %v461_v32 = vld [vmem:[%s5792_s21 + $0x78] sm:$0xff]  ;;  %s479_s25 = scalar_select %p478_p2, 1, 0 }
 0x100   : > { %v459_v33 = vld [vmem:[%s5792_s21 + $0x68] sm:$0xff]  ;;  %v5935_v35 = vld [vmem:[%s5803_s27 + $0x78] sm:$0xff]  ;;  %v5938_v36 = vld [vmem:[%s5803_s27 + $0x60] sm:$0xff]  ;;  %s482_s20 = scalar_select %p481_p13, 1, 0 }
 0x101   : > { %v5932_v34 = vld [vmem:[%s5803_s27 + $0x68] sm:$0xff]  ;;  %v5941_v37 = vld [vmem:[%s5803_s27 + $0x70] sm:$0xff]  ;;  %v5972_v41 = vld [vmem:[%s5810_s30] sm:$0xff]  ;;  %s480_s0 = scvt.s32.f32 %s479_s25  ;;  %s3607_s21 = smul.u32 6, %s7388_s3 }
 0x102   : > { %v5947_v38 = vpack.i.bf16 %v5935_v35, %v5932_v34  ;;  %v5951_v39 = vpack.i.bf16 %v5941_v37, %v5938_v36  ;;  %v5969_v40 = vld [vmem:[%s5810_s30 + $0x10] sm:$0xff]  ;;  %v5979_v42 = vld [vmem:[%s5810_s30 + $0x18] sm:$0xff]  ;;  %v5982_v43 = vld [vmem:[%s5810_s30 + $0x8] sm:$0xff]  ;;  %s483_s16 = scvt.s32.f32 %s482_s20  ;;  %p7425_p6 = scmp.ne.s32.totalorder %s7423_s24, 0 }
 0x103   : > { %542 = vrot.lane.b32.xlu1 %v452_v10, %s5366_s6  ;;  %540 = vrot.lane.b32.xlu0 %v450_v11, %s5366_s6  ;;  %v5993_v44 = vld [vmem:[%s5810_s30 + $0x30] sm:$0xff]  ;;  %v5996_v45 = vld [vmem:[%s5810_s30 + $0x20] sm:$0xff] }
 0x104   : > { %v6003_v46 = vld [vmem:[%s5810_s30 + $0x38] sm:$0xff]  ;;  %v6006_v47 = vld [vmem:[%s5810_s30 + $0x28] sm:$0xff]  ;;  %v6020_v52 = vld [vmem:[%s5810_s30 + $0x50] sm:$0xff]  ;;  %v6030_v56 = vstv %s480_s0 }
 0x105   : > { %v6023_v53 = vld [vmem:[%s5810_s30 + $0x40] sm:$0xff]  ;;  %v6037_v59 = vld [vmem:[%s5810_s30 + $0x58] sm:$0xff]  ;;  %v6040_v60 = vld [vmem:[%s5810_s30 + $0x48] sm:$0xff] }
 0x106   : > { %v6068_v48 = vld [vmem:[%s5810_s30 + $0x60] sm:$0xff] }
 0x107   : > { %558 = vrot.lane.b32.xlu1 %v453_v12, %s5366_s6  ;;  %556 = vrot.lane.b32.xlu0 %v451_v13, %s5366_s6 }
 0x10b   : > { %4867 = vrot.lane.b32.xlu1 %v5883_v18, %s5366_s6  ;;  %4862 = vrot.lane.b32.xlu0 %v5887_v19, %s5366_s6 }
 0x10f   : > { %546 = vrot.lane.b32.xlu1 %v456_v20, %s5366_s6  ;;  %544 = vrot.lane.b32.xlu0 %v454_v21, %s5366_s6 }
 0x113   : > { %562 = vrot.lane.b32.xlu1 %v457_v22, %s5366_s6  ;;  %560 = vrot.lane.b32.xlu0 %v455_v23, %s5366_s6 }
 0x117   : > { %4877 = vrot.lane.b32.xlu1 %v5915_v28, %s5366_s6  ;;  %4872 = vrot.lane.b32.xlu0 %v5919_v29, %s5366_s6 }
 0x11b   : > { %550 = vrot.lane.b32.xlu1 %v460_v30, %s5366_s6  ;;  %548 = vrot.lane.b32.xlu0 %v458_v31, %s5366_s6 }
 0x11f   : > { %566 = vrot.lane.b32.xlu1 %v461_v32, %s5366_s6  ;;  %564 = vrot.lane.b32.xlu0 %v459_v33, %s5366_s6 }
 0x123   : > { %4887 = vrot.lane.b32.xlu1 %v5947_v38, %s5366_s6  ;;  %4882 = vrot.lane.b32.xlu0 %v5951_v39, %s5366_s6  ;;  %s3600_s6 = scalar_lea.sflag [#allocation4], %s5800_s8 }
 0x127   : > { %669 = vrot.lane.b32.xlu1 %v448_v3, %s5367_s11  ;;  %667 = vrot.lane.b32.xlu0 %v5824_v1, %s5367_s11 }
 0x12b   : > { %685 = vrot.lane.b32.xlu1 %v5827_v2, %s5367_s11  ;;  %683 = vrot.lane.b32.xlu0 %v5821_v0, %s5367_s11 }
 0x12f   : > { %4897 = vrot.lane.b32.xlu1 %v5851_v8, %s5367_s11  ;;  %4892 = vrot.lane.b32.xlu0 %v5855_v9, %s5367_s11 }
 0x133   : > { %673 = vrot.lane.b32.xlu1 %v452_v10, %s5367_s11  ;;  %671 = vrot.lane.b32.xlu0 %v450_v11, %s5367_s11 }
 0x137   : > { %689 = vrot.lane.b32.xlu1 %v453_v12, %s5367_s11  ;;  %687 = vrot.lane.b32.xlu0 %v451_v13, %s5367_s11 }
 0x13b   : > { %4907 = vrot.lane.b32.xlu1 %v5883_v18, %s5367_s11  ;;  %4902 = vrot.lane.b32.xlu0 %v5887_v19, %s5367_s11 }
 0x13f   : > { %677 = vrot.lane.b32.xlu1 %v456_v20, %s5367_s11  ;;  %675 = vrot.lane.b32.xlu0 %v454_v21, %s5367_s11 }
 0x143   : > { %693 = vrot.lane.b32.xlu1 %v457_v22, %s5367_s11  ;;  %691 = vrot.lane.b32.xlu0 %v455_v23, %s5367_s11 }
 0x147   : > { %4917 = vrot.lane.b32.xlu1 %v5915_v28, %s5367_s11  ;;  %4912 = vrot.lane.b32.xlu0 %v5919_v29, %s5367_s11 }
 0x14b   : > { %681 = vrot.lane.b32.xlu1 %v460_v30, %s5367_s11  ;;  %679 = vrot.lane.b32.xlu0 %v458_v31, %s5367_s11 }
 0x14f   : > { %697 = vrot.lane.b32.xlu1 %v461_v32, %s5367_s11  ;;  %695 = vrot.lane.b32.xlu0 %v459_v33, %s5367_s11  ;;  %v6065_v33 = vld [vmem:[%s5810_s30 + $0x70] sm:$0xff] }
 0x153   : > { %4927 = vrot.lane.b32.xlu1 %v5947_v38, %s5367_s11  ;;  %4922 = vrot.lane.b32.xlu0 %v5951_v39, %s5367_s11 }
 0x157   : > { %799 = vrot.lane.b32.xlu1 %v5969_v40, %s5368_s15  ;;  %797 = vrot.lane.b32.xlu0 %v5972_v41, %s5368_s15 }
 0x15b   : > { %815 = vrot.lane.b32.xlu1 %v5979_v42, %s5368_s15  ;;  %813 = vrot.lane.b32.xlu0 %v5982_v43, %s5368_s15 }
 0x15f   : > { %4937 = vrot.lane.b32.xlu1 %v5851_v8, %s5368_s15  ;;  %4932 = vrot.lane.b32.xlu0 %v5855_v9, %s5368_s15 }
 0x163   : > { %803 = vrot.lane.b32.xlu1 %v5993_v44, %s5368_s15  ;;  %801 = vrot.lane.b32.xlu0 %v5996_v45, %s5368_s15 }
 0x167   : > { %819 = vrot.lane.b32.xlu1 %v6003_v46, %s5368_s15  ;;  %817 = vrot.lane.b32.xlu0 %v6006_v47, %s5368_s15 }
 0x169   : > { %v553_v49 = vpop.permute.xlu1 %552  ;;  %v537_v51 = vpop.permute.xlu0 %536 }
 0x16a   : > { %v576_v57 = vsel %vm519_vm0, %v553_v49, %v537_v51 }
 0x16b   : > { %4947 = vrot.lane.b32.xlu1 %v5883_v18, %s5368_s15  ;;  %4942 = vrot.lane.b32.xlu0 %v5887_v19, %s5368_s15  ;;  %v585_v3 = vmul.f32 %v6030_v56, %v576_v57  ;;  %v6079_v57 = vld [vmem:[%s5810_s30 + $0x78] sm:$0xff] }
 0x16d   : > { %v555_v54 = vpop.permute.xlu1 %554  ;;  %v539_v55 = vpop.permute.xlu0 %538 }
 0x16e   : > { %v577_v58 = vsel %vm519_vm0, %v555_v54, %v539_v55 }
 0x16f   : > { %807 = vrot.lane.b32.xlu1 %v6020_v52, %s5368_s15  ;;  %805 = vrot.lane.b32.xlu0 %v6023_v53, %s5368_s15  ;;  %v587_v10 = vmul.f32 %v6030_v56, %v577_v58  ;;  %v6082_v58 = vld [vmem:[%s5810_s30 + $0x68] sm:$0xff] }
 0x171   : > { %v4858_v61 = vpop.permute.xlu1 %4857  ;;  %v4853_v62 = vpop.permute.xlu0 %4852 }
 0x172   : > { %v4860_v63 = vunpack.i.h.bf16 %v4858_v61  ;;  %v4859_v0 = vunpack.i.l.bf16 %v4858_v61  ;;  %v4855_v1 = vunpack.i.h.bf16 %v4853_v62  ;;  %v4854_v2 = vunpack.i.l.bf16 %v4853_v62 }
 0x173   : > { %823 = vrot.lane.b32.xlu1 %v6037_v59, %s5368_s15  ;;  %821 = vrot.lane.b32.xlu0 %v6040_v60, %s5368_s15 }
 0x174   : > { %v520_v11 = vsel %vm519_vm0, %v4854_v2, %v4859_v0  ;;  %v521_v12 = vsel %vm519_vm0, %v4855_v1, %v4860_v63  ;;  %v528_v13 = vsel %vm519_vm0, %v4859_v0, %v4854_v2  ;;  %v529_v20 = vsel %vm519_vm0, %v4860_v63, %v4855_v1 }
 0x175   : > { %v543_v21 = vpop.permute.xlu1 %542  ;;  %v541_v22 = vpop.permute.xlu0 %540  ;;  %v3827_v23 = vpack.c.bf16 %v521_v12, %v520_v11  ;;  %v602_v30 = vsel %vm519_vm0, %v585_v3, %v528_v13  ;;  %v604_v31 = vsel %vm519_vm0, %v587_v10, %v529_v20  ;;  %v1012_v11 = vld [vmem:[#allocation8 + $0x8] sm:$0xff] }
 0x176   : > { %v3829_v32 = vpack.c.bf16 %v604_v31, %v602_v30  ;;  %1364 = vmatprep.mubr.f32.mxu0 %v1012_v11 }
 0x177   : > { %4957 = vrot.lane.b32.xlu1 %v5915_v28, %s5368_s15  ;;  %4952 = vrot.lane.b32.xlu0 %v5919_v29, %s5368_s15 }
 0x178   : > { %3828 = vmatprep.subr.bf16.mxu0 %v3827_v23 }
 0x179   : > { %3830 = vmatpush1.bf16.msra.mxu0 %v3829_v32  ;;  %v559_v49 = vpop.permute.xlu1 %558  ;;  %v557_v51 = vpop.permute.xlu0 %556 }
 0x17a   : > { %v579_v54 = vsel %vm519_vm0, %v559_v49, %v543_v21  ;;  %v578_v55 = vsel %vm519_vm0, %v557_v51, %v541_v22 }
 0x17b   : > { %811 = vrot.lane.b32.xlu1 %v6065_v33, %s5368_s15  ;;  %809 = vrot.lane.b32.xlu0 %v6068_v48, %s5368_s15  ;;  %v591_v3 = vmul.f32 %v6030_v56, %v579_v54  ;;  %v589_v10 = vmul.f32 %v6030_v56, %v578_v55 }
 0x17d   : > { %v4868_v61 = vpop.permute.xlu1 %4867  ;;  %v4863_v62 = vpop.permute.xlu0 %4862 }
 0x17e   : > { %v4870_v63 = vunpack.i.h.bf16 %v4868_v61  ;;  %v4869_v0 = vunpack.i.l.bf16 %v4868_v61  ;;  %v4865_v1 = vunpack.i.h.bf16 %v4863_v62  ;;  %v4864_v2 = vunpack.i.l.bf16 %v4863_v62 }
 0x17f   : > { %827 = vrot.lane.b32.xlu1 %v6079_v57, %s5368_s15  ;;  %825 = vrot.lane.b32.xlu0 %v6082_v58, %s5368_s15 }
 0x180   : > { %v522_v12 = vsel %vm519_vm0, %v4864_v2, %v4869_v0  ;;  %v523_v13 = vsel %vm519_vm0, %v4865_v1, %v4870_v63  ;;  %v530_v20 = vsel %vm519_vm0, %v4869_v0, %v4864_v2  ;;  %v531_v21 = vsel %vm519_vm0, %v4870_v63, %v4865_v1 }
 0x181   : > { %v547_v22 = vpop.permute.xlu1 %546  ;;  %v545_v23 = vpop.permute.xlu0 %544  ;;  %v3831_v30 = vpack.c.bf16 %v523_v13, %v522_v12  ;;  %v606_v31 = vsel %vm519_vm0, %v589_v10, %v530_v20  ;;  %v608_v32 = vsel %vm519_vm0, %v591_v3, %v531_v21 }
 0x182   : > { %v3833_v49 = vpack.c.bf16 %v608_v32, %v606_v31 }
 0x183   : > { %4967 = vrot.lane.b32.xlu1 %v5947_v38, %s5368_s15  ;;  %4962 = vrot.lane.b32.xlu0 %v5951_v39, %s5368_s15  ;;  %s5373_s15 = smov [#allocation11]  }
 0x184   : > { %3832 = vmatprep.subr.bf16.mxu0 %v3831_v30  ;;  %s5194_s25 = sshll.u32 %s5373_s15, 4  ;;  %s5195_s25 = int_to_ptr.vmem [resolvable:$false] %s5194_s25 }
 0x185   : > { %3834 = vmatpush1.bf16.msra.mxu0 %v3833_v49  ;;  %v563_v51 = vpop.permute.xlu1 %562  ;;  %v561_v54 = vpop.permute.xlu0 %560  ;;  %s5196_s0 = scalar_lea.vmem %s5195_s25, 12288 }
 0x186   : > { %v581_v55 = vsel %vm519_vm0, %v563_v51, %v547_v22  ;;  %v580_v61 = vsel %vm519_vm0, %v561_v54, %v545_v23 }
 0x187   : > { %931 = vrot.lane.b32.xlu1 %v5969_v40, %s5369_s14  ;;  %929 = vrot.lane.b32.xlu0 %v5972_v41, %s5369_s14  ;;  %v595_v10 = vmul.f32 %v6030_v56, %v581_v55  ;;  %v593_v11 = vmul.f32 %v6030_v56, %v580_v61 }
 0x189   : > { %v4878_v62 = vpop.permute.xlu1 %4877  ;;  %v4873_v63 = vpop.permute.xlu0 %4872 }
 0x18a   : > { %v4880_v0 = vunpack.i.h.bf16 %v4878_v62  ;;  %v4879_v1 = vunpack.i.l.bf16 %v4878_v62  ;;  %v4875_v2 = vunpack.i.h.bf16 %v4873_v63  ;;  %v4874_v3 = vunpack.i.l.bf16 %v4873_v63 }
 0x18b   : > { %947 = vrot.lane.b32.xlu1 %v5979_v42, %s5369_s14  ;;  %945 = vrot.lane.b32.xlu0 %v5982_v43, %s5369_s14 }
 0x18c   : > { %v524_v40 = vsel %vm519_vm0, %v4874_v3, %v4879_v1  ;;  %v525_v41 = vsel %vm519_vm0, %v4875_v2, %v4880_v0  ;;  %v532_v12 = vsel %vm519_vm0, %v4879_v1, %v4874_v3  ;;  %v533_v13 = vsel %vm519_vm0, %v4880_v0, %v4875_v2 }
 0x18d   : > { %v551_v20 = vpop.permute.xlu1 %550  ;;  %v549_v21 = vpop.permute.xlu0 %548  ;;  %v3835_v22 = vpack.c.bf16 %v525_v41, %v524_v40  ;;  %v610_v42 = vsel %vm519_vm0, %v593_v11, %v532_v12  ;;  %v612_v43 = vsel %vm519_vm0, %v595_v10, %v533_v13 }
 0x18e   : > { %v3837_v23 = vpack.c.bf16 %v612_v43, %v610_v42 }
 0x18f   : > { %4977 = vrot.lane.b32.xlu1 %v5851_v8, %s5369_s14  ;;  %4972 = vrot.lane.b32.xlu0 %v5855_v9, %s5369_s14 }
 0x190   : > { %3836 = vmatprep.subr.bf16.mxu0 %v3835_v22 }
 0x191   : > { %3838 = vmatpush1.bf16.msra.mxu0 %v3837_v23  ;;  %v567_v30 = vpop.permute.xlu1 %566  ;;  %v565_v31 = vpop.permute.xlu0 %564 }
 0x192   : > { %v583_v32 = vsel %vm519_vm0, %v567_v30, %v551_v20  ;;  %v582_v49 = vsel %vm519_vm0, %v565_v31, %v549_v21 }
 0x193   : > { %935 = vrot.lane.b32.xlu1 %v5993_v44, %s5369_s14  ;;  %933 = vrot.lane.b32.xlu0 %v5996_v45, %s5369_s14  ;;  %v599_v62 = vmul.f32 %v6030_v56, %v583_v32  ;;  %v597_v63 = vmul.f32 %v6030_v56, %v582_v49 }
 0x195   : > { %v4888_v8 = vpop.permute.xlu1 %4887  ;;  %v4883_v51 = vpop.permute.xlu0 %4882 }
 0x196   : > { %v4890_v54 = vunpack.i.h.bf16 %v4888_v8  ;;  %v4889_v9 = vunpack.i.l.bf16 %v4888_v8  ;;  %v4885_v55 = vunpack.i.h.bf16 %v4883_v51  ;;  %v4884_v61 = vunpack.i.l.bf16 %v4883_v51 }
 0x197   : > { %951 = vrot.lane.b32.xlu1 %v6003_v46, %s5369_s14  ;;  %949 = vrot.lane.b32.xlu0 %v6006_v47, %s5369_s14 }
 0x198   : > { %v526_v44 = vsel %vm519_vm0, %v4884_v61, %v4889_v9  ;;  %v527_v45 = vsel %vm519_vm0, %v4885_v55, %v4890_v54  ;;  %v534_v0 = vsel %vm519_vm0, %v4889_v9, %v4884_v61  ;;  %v535_v1 = vsel %vm519_vm0, %v4890_v54, %v4885_v55 }
 0x199   : > { %v670_v2 = vpop.permute.xlu1 %669  ;;  %v668_v3 = vpop.permute.xlu0 %667  ;;  %v3839_v10 = vpack.c.bf16 %v527_v45, %v526_v44  ;;  %v614_v46 = vsel %vm519_vm0, %v597_v63, %v534_v0  ;;  %v616_v47 = vsel %vm519_vm0, %v599_v62, %v535_v1 }
 0x19a   : > { %v3841_v11 = vpack.c.bf16 %v616_v47, %v614_v46 }
 0x19b   : > { %3840 = vmatprep.subr.bf16.mxu0 %v3839_v10  ;;  %4987 = vrot.lane.b32.xlu1 %v5883_v18, %s5369_s14 }
 0x19c   : > { %3842 = vmatpush1.bf16.msra.mxu0 %v3841_v11  ;;  %4982 = vrot.lane.b32.xlu0 %v5887_v19, %s5369_s14 }
 0x19d   : > { %v686_v40 = vpop.permute.xlu1 %685  ;;  %v684_v41 = vpop.permute.xlu0 %683 }
 0x19e   : > { %v708_v12 = vsel %vm650_vm1, %v686_v40, %v670_v2  ;;  %v707_v13 = vsel %vm650_vm1, %v684_v41, %v668_v3 }
 0x19f   : > { %939 = vrot.lane.b32.xlu1 %v6020_v52, %s5369_s14  ;;  %v717_v43 = vmul.f32 %v708_v12, %v6030_v56  ;;  %v715_v23 = vmul.f32 %v707_v13, %v6030_v56 }
 0x1a0   : > { %937 = vrot.lane.b32.xlu0 %v6023_v53, %s5369_s14 }
 0x1a1   : > { %v4898_v18 = vpop.permute.xlu1 %4897  ;;  %v4893_v20 = vpop.permute.xlu0 %4892 }
 0x1a2   : > { %v4900_v21 = vunpack.i.h.bf16 %v4898_v18  ;;  %v4899_v19 = vunpack.i.l.bf16 %v4898_v18  ;;  %v4895_v22 = vunpack.i.h.bf16 %v4893_v20  ;;  %v4894_v42 = vunpack.i.l.bf16 %v4893_v20 }
 0x1a3   : > { %955 = vrot.lane.b32.xlu1 %v6037_v59, %s5369_s14 }
 0x1a4   : > { %v651_v52 = vsel %vm650_vm1, %v4894_v42, %v4899_v19  ;;  %v652_v30 = vsel %vm650_vm1, %v4895_v22, %v4900_v21  ;;  %v659_v53 = vsel %vm650_vm1, %v4899_v19, %v4894_v42  ;;  %v660_v31 = vsel %vm650_vm1, %v4900_v21, %v4895_v22  ;;  %953 = vrot.lane.b32.xlu0 %v6040_v60, %s5369_s14 }
 0x1a5   : > { %v674_v32 = vpop.permute.xlu1 %673  ;;  %v672_v49 = vpop.permute.xlu0 %671  ;;  %v3843_v8 = vpack.c.bf16 %v652_v30, %v651_v52  ;;  %v732_v59 = vsel %vm650_vm1, %v715_v23, %v659_v53  ;;  %v734_v51 = vsel %vm650_vm1, %v717_v43, %v660_v31 }
 0x1a6   : > { %v3845_v54 = vpack.c.bf16 %v734_v51, %v732_v59 }
 0x1a7   : > { %3844 = vmatprep.subr.bf16.mxu0 %v3843_v8  ;;  %4997 = vrot.lane.b32.xlu1 %v5915_v28, %s5369_s14 }
 0x1a8   : > { %3846 = vmatpush1.bf16.msra.mxu0 %v3845_v54  ;;  %4992 = vrot.lane.b32.xlu0 %v5919_v29, %s5369_s14 }
 0x1a9   : > { %v690_v9 = vpop.permute.xlu1 %689  ;;  %v688_v60 = vpop.permute.xlu0 %687 }
 0x1aa   : > { %v710_v55 = vsel %vm650_vm1, %v690_v9, %v674_v32  ;;  %v709_v61 = vsel %vm650_vm1, %v688_v60, %v672_v49 }
 0x1ab   : > { %943 = vrot.lane.b32.xlu1 %v6065_v33, %s5369_s14  ;;  %v721_v0 = vmul.f32 %v710_v55, %v6030_v56  ;;  %v719_v1 = vmul.f32 %v709_v61, %v6030_v56 }
 0x1ac   : > { %941 = vrot.lane.b32.xlu0 %v6068_v48, %s5369_s14 }
 0x1ad   : > { %v4908_v62 = vpop.permute.xlu1 %4907  ;;  %v4903_v28 = vpop.permute.xlu0 %4902 }
 0x1ae   : > { %v4910_v63 = vunpack.i.h.bf16 %v4908_v62  ;;  %v4909_v44 = vunpack.i.l.bf16 %v4908_v62  ;;  %v4905_v45 = vunpack.i.h.bf16 %v4903_v28  ;;  %v4904_v29 = vunpack.i.l.bf16 %v4903_v28 }
 0x1af   : > { %959 = vrot.lane.b32.xlu1 %v6079_v57, %s5369_s14 }
 0x1b0   : > { %v662_v33 = vsel %vm650_vm1, %v4910_v63, %v4905_v45  ;;  %v661_v2 = vsel %vm650_vm1, %v4909_v44, %v4904_v29  ;;  %v653_v48 = vsel %vm650_vm1, %v4904_v29, %v4909_v44  ;;  %v654_v3 = vsel %vm650_vm1, %v4905_v45, %v4910_v63  ;;  %957 = vrot.lane.b32.xlu0 %v6082_v58, %s5369_s14 }
 0x1b1   : > { %v678_v10 = vpop.permute.xlu1 %677  ;;  %v676_v46 = vpop.permute.xlu0 %675  ;;  %v3847_v47 = vpack.c.bf16 %v654_v3, %v653_v48  ;;  %v736_v57 = vsel %vm650_vm1, %v719_v1, %v661_v2  ;;  %v738_v11 = vsel %vm650_vm1, %v721_v0, %v662_v33 }
 0x1b2   : > { %v3849_v40 = vpack.c.bf16 %v738_v11, %v736_v57  ;;  %v3861_v11 = vpack.c.bf16 %v5844_v7, %v5841_v6  ;;  %v6276_v6 = vadd.s32 128, %v6013_v50  ;;  %v1051_v50 = vld [vmem:[#allocation8 + $0x140] sm:$0xff] }
 0x1b3   : > { %3848 = vmatprep.subr.bf16.mxu0 %v3847_v47  ;;  %5007 = vrot.lane.b32.xlu1 %v5947_v38, %s5369_s14  ;;  %v3859_v47 = vpack.c.bf16 %v5838_v5, %v5835_v4  ;;  %v3865_v4 = vpack.c.bf16 %v5877_v17, %v5874_v16  ;;  %v3869_v17 = vpack.c.bf16 %v5909_v27, %v5906_v26 }
 0x1b4   : > { %3850 = vmatpush1.bf16.msra.mxu0 %v3849_v40  ;;  %5002 = vrot.lane.b32.xlu0 %v5951_v39, %s5369_s14  ;;  %vm863_vm3 = vcmp.ge.s32.totalorder %v6276_v6, 255  ;;  %v3873_v26 = vpack.c.bf16 %v5941_v37, %v5938_v36  ;;  %vm994_vm5 = vcmp.ge.s32.totalorder %v6276_v6, 254  ;;  %v1050_v6 = vld [vmem:[#allocation8 + $0x138] sm:$0xff]  ;;  %s4675_s14 = smul.u32 384, %s5800_s8 }
 0x1b5   : > { %v694_v41 = vpop.permute.xlu1 %693  ;;  %v692_v58 = vpop.permute.xlu0 %691 }
 0x1b6   : > { %v712_v12 = vsel %vm650_vm1, %v694_v41, %v678_v10  ;;  %v711_v13 = vsel %vm650_vm1, %v692_v58, %v676_v46  ;;  %v3863_v58 = vpack.c.bf16 %v5871_v15, %v5868_v14  ;;  %v6278_v15 = vstv %s483_s16  ;;  %s7136_s20 = scalar_lea.vmem [#allocation11], %s4675_s14  ;;  %s7422_s16 = sld [smem:[#allocation20_spill]] }
 0x1b7   : > { %v725_v38 = vmul.f32 %v712_v12, %v6030_v56  ;;  %v723_v43 = vmul.f32 %v711_v13, %v6030_v56  ;;  %v3867_v13 = vpack.c.bf16 %v5903_v25, %v5900_v24  ;;  %s3615_s4 = sshll.u32 %s7136_s20, 4  ;;  %s7197_s4 = int_to_ptr.vmem [resolvable:$true] %s3615_s4 }
 0x1b8   : > { %s5190_s11 = scalar_lea.vmem %s7197_s4, 6144  ;;  %p5197_p3 = scmp.lt.s32.totalorder %s7197_s4, %s5195_s25 }
 0x1b9   : > { %v4918_v18 = vpop.permute.xlu1 %4917  ;;  %v4913_v20 = vpop.permute.xlu0 %4912  ;;  %p5191_p11 = scmp.ne.s32.totalorder %s7197_s4, %s5190_s11  ;;  %p5198_p4 = scmp.lt.s32.totalorder %s5196_s0, %s5190_s11 }
 0x1ba   : > { %v4920_v21 = vunpack.i.h.bf16 %v4918_v18  ;;  %v4919_v19 = vunpack.i.l.bf16 %v4918_v18  ;;  %v4915_v22 = vunpack.i.h.bf16 %v4913_v20  ;;  %v4914_v42 = vunpack.i.l.bf16 %v4913_v20 }
 0x1bb   : > { %p5192_p5 = pnand %p5191_p11, %p7425_p6  ;;  %p5199_p7 = por %p5198_p4, %p5197_p3 }
 0x1bc   : > { %v664_v39 = vsel %vm650_vm1, %v4920_v21, %v4915_v22  ;;  %v663_v23 = vsel %vm650_vm1, %v4919_v19, %v4914_v42  ;;  %v655_v52 = vsel %vm650_vm1, %v4914_v42, %v4919_v19  ;;  %v656_v30 = vsel %vm650_vm1, %v4915_v22, %v4920_v21  ;;  %s4676_s7 = smul.u32 96, %s7422_s16 }
 0x1bd   : > { %v682_v53 = vpop.permute.xlu1 %681  ;;  %v680_v31 = vpop.permute.xlu0 %679  ;;  %v3851_v32 = vpack.c.bf16 %v656_v30, %v655_v52  ;;  %v740_v49 = vsel %vm650_vm1, %v723_v43, %v663_v23  ;;  %v742_v8 = vsel %vm650_vm1, %v725_v38, %v664_v39  ;;  %v3871_v42 = vpack.c.bf16 %v5935_v35, %v5932_v34  ;;  %p5193_p0 = pneg %p5192_p5 }
 0x1be   : > { %v3853_v59 = vpack.c.bf16 %v742_v8, %v740_v49  ;;  %s3612_s17 = sadd.s32 %s4676_s7, %s3607_s21 }
 0x1bf   : > { %3852 = vmatprep.subr.bf16.mxu0 %v3851_v32  ;;  %s3824_s27 = sshll.u32 %s3612_s17, 7  ;;  %p5200_p9 = pnand %p5199_p7, %p5193_p0 }
 0x1c0   : > { %3854 = vmatpush1.bf16.msra.mxu0 %v3853_v59  ;;  %s7195_s30 = scalar_lea.hbm %s7424_s19, %s3824_s27 }
 0x1c1   : > { %v698_v51 = vpop.permute.xlu1 %697  ;;  %v696_v54 = vpop.permute.xlu0 %695 }
 0x1c2   : > { %v714_v9 = vsel %vm650_vm1, %v698_v51, %v682_v53  ;;  %v713_v60 = vsel %vm650_vm1, %v696_v54, %v680_v31 }
 0x1c3   : > { %v729_v45 = vmul.f32 %v714_v9, %v6030_v56  ;;  %v727_v29 = vmul.f32 %v713_v60, %v6030_v56 }
 0x1c5   : > { %v4928_v55 = vpop.permute.xlu1 %4927  ;;  %v4923_v61 = vpop.permute.xlu0 %4922 }
 0x1c6   : > { %v4930_v62 = vunpack.i.h.bf16 %v4928_v55  ;;  %v4929_v28 = vunpack.i.l.bf16 %v4928_v55  ;;  %v4925_v63 = vunpack.i.h.bf16 %v4923_v61  ;;  %v4924_v44 = vunpack.i.l.bf16 %v4923_v61 }
 0x1c8   : > { %v666_v0 = vsel %vm650_vm1, %v4930_v62, %v4925_v63  ;;  %v665_v1 = vsel %vm650_vm1, %v4929_v28, %v4924_v44  ;;  %v657_v33 = vsel %vm650_vm1, %v4924_v44, %v4929_v28  ;;  %v658_v2 = vsel %vm650_vm1, %v4925_v63, %v4930_v62 }
 0x1c9   : > { %v800_v48 = vpop.permute.xlu1 %799  ;;  %v798_v3 = vpop.permute.xlu0 %797  ;;  %v3855_v10 = vpack.c.bf16 %v658_v2, %v657_v33  ;;  %v744_v46 = vsel %vm650_vm1, %v727_v29, %v665_v1  ;;  %v746_v56 = vsel %vm650_vm1, %v729_v45, %v666_v0 }
 0x1ca   : > { %v3857_v57 = vpack.c.bf16 %v746_v56, %v744_v46 }
 0x1cb   : > { %3856 = vmatprep.subr.bf16.mxu0 %v3855_v10 }
 0x1cc   : > { %3858 = vmatpush1.bf16.msra.mxu0 %v3857_v57 }
 0x1cd   : > { %v816_v40 = vpop.permute.xlu1 %815  ;;  %v814_v41 = vpop.permute.xlu0 %813  ;;  %3860 = vmatprep.subr.bf16.mxu0 %v3859_v47 }
 0x1ce   : > { %v838_v21 = vsel %vm780_vm2, %v816_v40, %v800_v48  ;;  %v837_v16 = vsel %vm780_vm2, %v814_v41, %v798_v3 }
 0x1cf   : > { %v849_v38 = vmul.f32 %v6278_v15, %v838_v21  ;;  %v847_v43 = vmul.f32 %v6278_v15, %v837_v16 }
 0x1d0   : > { %3862 = vmatpush1.bf16.msra.mxu0 %v3861_v11 }
 0x1d1   : > { %v4938_v5 = vpop.permute.xlu1 %4937  ;;  %v4933_v12 = vpop.permute.xlu0 %4932  ;;  %3864 = vmatprep.subr.bf16.mxu0 %v3863_v58 }
 0x1d2   : > { %v4940_v7 = vunpack.i.h.bf16 %v4938_v5  ;;  %v4939_v18 = vunpack.i.l.bf16 %v4938_v5  ;;  %v4935_v20 = vunpack.i.h.bf16 %v4933_v12  ;;  %v4934_v14 = vunpack.i.l.bf16 %v4933_v12 }
 0x1d4   : > { %3866 = vmatpush1.bf16.msra.mxu0 %v3865_v4  ;;  %v790_v24 = vsel %vm780_vm2, %v4940_v7, %v4935_v20  ;;  %v789_v25 = vsel %vm780_vm2, %v4939_v18, %v4934_v14  ;;  %v781_v34 = vsel %vm780_vm2, %v4934_v14, %v4939_v18  ;;  %v782_v35 = vsel %vm780_vm2, %v4935_v20, %v4940_v7 }
 0x1d5   : > { %v804_v19 = vpop.permute.xlu1 %803  ;;  %v802_v22 = vpop.permute.xlu0 %801  ;;  %3868 = vmatprep.subr.bf16.mxu0 %v3867_v13  ;;  %v865_v27 = vsel %vm863_vm3, %v847_v43, %v789_v25  ;;  %v867_v39 = vsel %vm863_vm3, %v849_v38, %v790_v24  ;;  %v3877_v32 = vpack.c.bf16 %v782_v35, %v781_v34 }
 0x1d6   : > { %v3875_v30 = vpack.c.bf16 %v867_v39, %v865_v27 }
 0x1d8   : > { %3870 = vmatpush1.bf16.msra.mxu0 %v3869_v17 }
 0x1d9   : > { %v820_v23 = vpop.permute.xlu1 %819  ;;  %v818_v52 = vpop.permute.xlu0 %817  ;;  %3872 = vmatprep.subr.bf16.mxu0 %v3871_v42 }
 0x1da   : > { %v840_v53 = vsel %vm780_vm2, %v820_v23, %v804_v19  ;;  %v839_v36 = vsel %vm780_vm2, %v818_v52, %v802_v22 }
 0x1db   : > { %v853_v54 = vmul.f32 %v6278_v15, %v840_v53  ;;  %v851_v9 = vmul.f32 %v6278_v15, %v839_v36 }
 0x1dc   : > { %3874 = vmatpush1.bf16.msra.mxu0 %v3873_v26 }
 0x1dd   : > { %v4948_v37 = vpop.permute.xlu1 %4947  ;;  %v4943_v31 = vpop.permute.xlu0 %4942  ;;  %3876 = vmatprep.subr.bf16.mxu0 %v3875_v30 }
 0x1de   : > { %v4950_v49 = vunpack.i.h.bf16 %v4948_v37  ;;  %v4949_v8 = vunpack.i.l.bf16 %v4948_v37  ;;  %v4945_v59 = vunpack.i.h.bf16 %v4943_v31  ;;  %v4944_v51 = vunpack.i.l.bf16 %v4943_v31 }
 0x1e0   : > { %v792_v60 = vsel %vm780_vm2, %v4950_v49, %v4945_v59  ;;  %v791_v55 = vsel %vm780_vm2, %v4949_v8, %v4944_v51  ;;  %3878 = vmatpush1.bf16.msra.mxu0 %v3877_v32  ;;  %v783_v61 = vsel %vm780_vm2, %v4944_v51, %v4949_v8  ;;  %v784_v62 = vsel %vm780_vm2, %v4945_v59, %v4950_v49  ;;  %v1011_v8 = vld [vmem:[#allocation8] sm:$0xff] }
 0x1e1   : > { %v808_v28 = vpop.permute.xlu1 %807  ;;  %v806_v63 = vpop.permute.xlu0 %805  ;;  %v869_v44 = vsel %vm863_vm3, %v851_v9, %v791_v55  ;;  %v871_v45 = vsel %vm863_vm3, %v853_v54, %v792_v60  ;;  %v3881_v0 = vpack.c.bf16 %v784_v62, %v783_v61  ;;  %v1015_v54 = vld [vmem:[#allocation8 + $0x20] sm:$0xff]  ;;  %v1014_v62 = vld [vmem:[#allocation8 + $0x18] sm:$0xff] }
 0x1e2   : > { %v3879_v29 = vpack.c.bf16 %v871_v45, %v869_v44 }
 0x1e4   : > { %3880 = vmatprep.subr.bf16.mxu0 %v3879_v29  ;;  %v1018_v29 = vld [vmem:[#allocation8 + $0x38] sm:$0xff] }
 0x1e5   : > { %v824_v1 = vpop.permute.xlu1 %823  ;;  %v822_v33 = vpop.permute.xlu0 %821  ;;  %3882 = vmatpush1.bf16.msra.mxu0 %v3881_v0 }
 0x1e6   : > { %v842_v2 = vsel %vm780_vm2, %v824_v1, %v808_v28  ;;  %v841_v48 = vsel %vm780_vm2, %v822_v33, %v806_v63 }
 0x1e7   : > { %v857_v11 = vmul.f32 %v6278_v15, %v842_v2  ;;  %v855_v40 = vmul.f32 %v6278_v15, %v841_v48  ;;  %v1083_v48 = vld [vmem:[%s7389_s13] sm:$0xff] }
 0x1e9   : > { %v4958_v3 = vpop.permute.xlu1 %4957  ;;  %v4953_v10 = vpop.permute.xlu0 %4952 }
 0x1ea   : > { %v4960_v46 = vunpack.i.h.bf16 %v4958_v3  ;;  %v4959_v56 = vunpack.i.l.bf16 %v4958_v3  ;;  %v4955_v47 = vunpack.i.h.bf16 %v4953_v10  ;;  %v4954_v57 = vunpack.i.l.bf16 %v4953_v10  ;;  %v1017_v10 = vld [vmem:[#allocation8 + $0x30] sm:$0xff] }
 0x1ec   : > { %v794_v41 = vsel %vm780_vm2, %v4960_v46, %v4955_v47  ;;  %v793_v58 = vsel %vm780_vm2, %v4959_v56, %v4954_v57  ;;  %v785_v4 = vsel %vm780_vm2, %v4954_v57, %v4959_v56  ;;  %v786_v5 = vsel %vm780_vm2, %v4955_v47, %v4960_v46 }
 0x1ed   : > { %v812_v12 = vpop.permute.xlu1 %811  ;;  %v810_v13 = vpop.permute.xlu0 %809  ;;  %v873_v7 = vsel %vm863_vm3, %v855_v40, %v793_v58  ;;  %v875_v18 = vsel %vm863_vm3, %v857_v11, %v794_v41  ;;  %v3885_v14 = vpack.c.bf16 %v786_v5, %v785_v4  ;;  %v1021_v40 = vld [vmem:[#allocation8 + $0x50] sm:$0xff]  ;;  %v5370_v41 = vmov 1   ;;  %v1020_v58 = vld [vmem:[#allocation8 + $0x48] sm:$0xff] }
 0x1ee   : > { %v3883_v20 = vpack.c.bf16 %v875_v18, %v873_v7  ;;  %5012 = vset.pattern.permute.xlu1 %v5370_v41  ;;  %v5371_v7 = vmov 0  }
 0x1ef   : > { %1767 = vperm.xlu1 %5012, %v1083_v48   ;;  %5011 = vset.pattern.permute.xlu0 %v5371_v7 }
 0x1f0   : > { %3884 = vmatprep.subr.bf16.mxu0 %v3883_v20  ;;  %1109 = vperm.xlu0 %5011, %v1083_v48  }
 0x1f1   : > { %v828_v21 = vpop.permute.xlu1 %827  ;;  %v826_v16 = vpop.permute.xlu0 %825  ;;  %3886 = vmatpush1.bf16.msra.mxu0 %v3885_v14  ;;  %v1023_v14 = vld [vmem:[#allocation8 + $0x60] sm:$0xff] }
 0x1f2   : > { %v844_v17 = vsel %vm780_vm2, %v828_v21, %v812_v12  ;;  %v843_v24 = vsel %vm780_vm2, %v826_v16, %v810_v13  ;;  %v1084_v12 = vld [vmem:[%s7389_s13 + $0x8] sm:$0xff]  ;;  %v1085_v16 = vld [vmem:[%s7389_s13 + $0x10] sm:$0xff] }
 0x1f3   : > { %v861_v26 = vmul.f32 %v6278_v15, %v844_v17  ;;  %v859_v27 = vmul.f32 %v6278_v15, %v843_v24  ;;  %v1024_v13 = vld [vmem:[#allocation8 + $0x68] sm:$0xff]  ;;  %5013 = vset.pattern.permute.xlu1 %v5371_v7 }
 0x1f4   : > { %1114 = vperm.xlu1 %5013, %v1084_v12   ;;  %5014 = vset.pattern.permute.xlu0 %v5370_v41 }
 0x1f5   : > { %v4968_v25 = vpop.permute.xlu1 %4967  ;;  %v4963_v19 = vpop.permute.xlu0 %4962  ;;  %1771 = vperm.xlu0 %5014, %v1084_v12  }
 0x1f6   : > { %v4970_v22 = vunpack.i.h.bf16 %v4968_v25  ;;  %v4969_v42 = vunpack.i.l.bf16 %v4968_v25  ;;  %v4965_v38 = vunpack.i.h.bf16 %v4963_v19  ;;  %v4964_v43 = vunpack.i.l.bf16 %v4963_v19 }
 0x1f8   : > { %v796_v39 = vsel %vm780_vm2, %v4970_v22, %v4965_v38  ;;  %v795_v23 = vsel %vm780_vm2, %v4969_v42, %v4964_v43  ;;  %v787_v52 = vsel %vm780_vm2, %v4964_v43, %v4969_v42  ;;  %v788_v34 = vsel %vm780_vm2, %v4965_v38, %v4970_v22  ;;  %v1027_v42 = vld [vmem:[#allocation8 + $0x80] sm:$0xff]  ;;  %1119 = vperm.xlu1 %5013, %v1085_v16  }
 0x1f9   : > { %v932_v35 = vpop.permute.xlu1 %931  ;;  %v930_v30 = vpop.permute.xlu0 %929  ;;  %v877_v53 = vsel %vm863_vm3, %v859_v27, %v795_v23  ;;  %v879_v36 = vsel %vm863_vm3, %v861_v26, %v796_v39  ;;  %v3889_v31 = vpack.c.bf16 %v788_v34, %v787_v52  ;;  %v1026_v52 = vld [vmem:[#allocation8 + $0x78] sm:$0xff]  ;;  %5016 = vset.pattern.permute.xlu0 %v5371_v7 }
 0x1fa   : > { %v3887_v37 = vpack.c.bf16 %v879_v36, %v877_v53 }
 0x1fc   : > { %3888 = vmatprep.subr.bf16.mxu0 %v3887_v37  ;;  %5015 = vset.pattern.permute.xlu1 %v5370_v41 }
 0x1fd   : > { %v948_v32 = vpop.permute.xlu1 %947  ;;  %v946_v49 = vpop.permute.xlu0 %945  ;;  %3890 = vmatpush1.bf16.msra.mxu0 %v3889_v31  ;;  %1775 = vperm.xlu1 %5015, %v1085_v16  }
 0x1fe   : > { %v970_v59 = vsel %vm912_vm4, %v948_v32, %v932_v35  ;;  %v969_v51 = vsel %vm912_vm4, %v946_v49, %v930_v30  ;;  %v1030_v30 = vld [vmem:[#allocation8 + $0x98] sm:$0xff]  ;;  %v1029_v32 = vld [vmem:[#allocation8 + $0x90] sm:$0xff] }
 0x1ff   : > { %v980_v9 = vmul.f32 %v970_v59, %v6278_v15  ;;  %v978_v60 = vmul.f32 %v969_v51, %v6278_v15 }
 0x200   : > { %1365 = vmatmul.mubr.f32.vlgmr.msra.gmra.mrb[0].mxu0 %v1011_v8  ;;  %v1033_v8 = vld [vmem:[#allocation8 + $0xb0] sm:$0xff] }
 0x201   : > { %v4978_v55 = vpop.permute.xlu1 %4977  ;;  %v4973_v61 = vpop.permute.xlu0 %4972  ;;  %1370 = vmatprep.mubr.f32.mxu0 %v1015_v54 }
 0x202   : > { %v4980_v28 = vunpack.i.h.bf16 %v4978_v55  ;;  %v4979_v63 = vunpack.i.l.bf16 %v4978_v55  ;;  %v4975_v44 = vunpack.i.h.bf16 %v4973_v61  ;;  %v4974_v45 = vunpack.i.l.bf16 %v4973_v61  ;;  %v1036_v61 = vld [vmem:[#allocation8 + $0xc8] sm:$0xff] }
 0x204   : > { %v914_v0 = vsel %vm912_vm4, %v4975_v44, %v4980_v28  ;;  %v922_v1 = vsel %vm912_vm4, %v4980_v28, %v4975_v44  ;;  %v913_v33 = vsel %vm912_vm4, %v4974_v45, %v4979_v63  ;;  %v921_v2 = vsel %vm912_vm4, %v4979_v63, %v4974_v45  ;;  %1371 = vmatmul.mubr.f32.gmra.mrb[2].mxu0 %v1014_v62 }
 0x205   : > { %v3893_v3 = vpack.c.bf16 %v914_v0, %v913_v33  ;;  %1376 = vmatprep.mubr.f32.mxu0 %v1018_v29  ;;  %v996_v46 = vsel %vm994_vm5, %v978_v60, %v921_v2  ;;  %v998_v56 = vsel %vm994_vm5, %v980_v9, %v922_v1  ;;  %v936_v47 = vpop.permute.xlu1 %935  ;;  %v934_v57 = vpop.permute.xlu0 %933  ;;  %v1086_v9 = vld [vmem:[%s7389_s13 + $0x18] sm:$0xff]  ;;  %v1032_v60 = vld [vmem:[#allocation8 + $0xa8] sm:$0xff]  ;;  %v1087_v1 = vld [vmem:[%s7389_s13 + $0x20] sm:$0xff] }
 0x206   : > { %v3891_v11 = vpack.c.bf16 %v998_v56, %v996_v46  ;;  %1124 = vperm.xlu0 %5016, %v1086_v9   ;;  %1779 = vperm.xlu1 %5015, %v1086_v9   ;;  %v1035_v33 = vld [vmem:[#allocation8 + $0xc0] sm:$0xff]  ;;  %v1060_v9 = vld [vmem:[#allocation8 + $0x188] sm:$0xff] }
 0x207   : > { %v1039_v56 = vld [vmem:[#allocation8 + $0xe0] sm:$0xff] }
 0x208   : > { %1377 = vmatmul.mubr.f32.gmra.mrb[4].mxu0 %v1017_v10  ;;  %3892 = vmatprep.subr.bf16.mxu0 %v3891_v11 }
 0x209   : > { %3894 = vmatpush1.bf16.msra.mxu0 %v3893_v3  ;;  %1382 = vmatprep.mubr.f32.mxu0 %v1021_v40  ;;  %v952_v4 = vpop.permute.xlu1 %951  ;;  %v950_v5 = vpop.permute.xlu0 %949 }
 0x20a   : > { %v972_v18 = vsel %vm912_vm4, %v952_v4, %v936_v47  ;;  %v971_v20 = vsel %vm912_vm4, %v950_v5, %v934_v57  ;;  %5018 = vset.pattern.permute.xlu0 %v5370_v41  ;;  %5017 = vset.pattern.permute.xlu1 %v5371_v7  ;;  %v1088_v4 = vld [vmem:[%s7389_s13 + $0x28] sm:$0xff]  ;;  %v1038_v5 = vld [vmem:[#allocation8 + $0xd8] sm:$0xff] }
 0x20b   : > { %v984_v17 = vmul.f32 %v972_v18, %v6278_v15  ;;  %v982_v24 = vmul.f32 %v971_v20, %v6278_v15  ;;  %1783 = vperm.xlu0 %5018, %v1087_v1   ;;  %1129 = vperm.xlu1 %5017, %v1087_v1  }
 0x20c   : > { %1383 = vmatmul.mubr.f32.gmra.mrb[6].mxu0 %v1020_v58 }
 0x20d   : > { %1388 = vmatprep.mubr.f32.mxu0 %v1024_v13  ;;  %v4988_v21 = vpop.permute.xlu1 %4987  ;;  %v1042_v13 = vld [vmem:[#allocation8 + $0xf8] sm:$0xff] }
 0x20e   : > { %v4990_v25 = vunpack.i.h.bf16 %v4988_v21  ;;  %v4989_v19 = vunpack.i.l.bf16 %v4988_v21  ;;  %v4983_v22 = vpop.permute.xlu0 %4982  ;;  %v1041_v21 = vld [vmem:[#allocation8 + $0xf0] sm:$0xff] }
 0x20f   : > { %v4985_v38 = vunpack.i.h.bf16 %v4983_v22  ;;  %v4984_v43 = vunpack.i.l.bf16 %v4983_v22  ;;  %5020 = vset.pattern.permute.xlu0 %v5371_v7  ;;  %1134 = vperm.xlu1 %5017, %v1088_v4  }
 0x210   : > { %1389 = vmatmul.mubr.f32.gmra.mrb[8].mxu0 %v1023_v14 }
 0x211   : > { %v916_v26 = vsel %vm912_vm4, %v4985_v38, %v4990_v25  ;;  %v924_v27 = vsel %vm912_vm4, %v4990_v25, %v4985_v38  ;;  %v915_v39 = vsel %vm912_vm4, %v4984_v43, %v4989_v19  ;;  %v923_v23 = vsel %vm912_vm4, %v4989_v19, %v4984_v43  ;;  %1394 = vmatprep.mubr.f32.mxu0 %v1027_v42  ;;  %v940_v34 = vpop.permute.xlu1 %939 }
 0x212   : > { %v3897_v35 = vpack.c.bf16 %v916_v26, %v915_v39  ;;  %v1000_v53 = vsel %vm994_vm5, %v982_v24, %v923_v23  ;;  %v1002_v36 = vsel %vm994_vm5, %v984_v17, %v924_v27  ;;  %v938_v37 = vpop.permute.xlu0 %937  ;;  %v1045_v17 = vld [vmem:[#allocation8 + $0x110] sm:$0xff]  ;;  %v1044_v26 = vld [vmem:[#allocation8 + $0x108] sm:$0xff] }
 0x213   : > { %v3895_v31 = vpack.c.bf16 %v1002_v36, %v1000_v53  ;;  %5019 = vset.pattern.permute.xlu1 %v5370_v41 }
 0x214   : > { %1395 = vmatmul.mubr.f32.gmra.mrb[10].mxu0 %v1026_v52  ;;  %1787 = vperm.xlu1 %5019, %v1088_v4   ;;  %v1089_v52 = vld [vmem:[%s7389_s13 + $0x30] sm:$0xff]  ;;  %v1989_v4 = vld [vmem:[#allocation10 + $0xf8] sm:$0xff] }
 0x215   : > { %1400 = vmatprep.mubr.f32.mxu0 %v1030_v30  ;;  %3896 = vmatprep.subr.bf16.mxu0 %v3895_v31  ;;  %v956_v49 = vpop.permute.xlu1 %955  ;;  %v1090_v31 = vld [vmem:[%s7389_s13 + $0x38] sm:$0xff] }
 0x216   : > { %3898 = vmatpush1.bf16.msra.mxu0 %v3897_v35  ;;  %v954_v59 = vpop.permute.xlu0 %953  ;;  %v974_v51 = vsel %vm912_vm4, %v956_v49, %v940_v34  ;;  %v1048_v34 = vld [vmem:[#allocation8 + $0x128] sm:$0xff]  ;;  %1139 = vperm.xlu0 %5020, %v1089_v52   ;;  %v1091_v49 = vld [vmem:[%s7389_s13 + $0x40] sm:$0xff] }
 0x217   : > { %v973_v54 = vsel %vm912_vm4, %v954_v59, %v938_v37  ;;  %v988_v62 = vmul.f32 %v974_v51, %v6278_v15  ;;  %v1047_v37 = vld [vmem:[#allocation8 + $0x120] sm:$0xff]  ;;  %v1057_v59 = vld [vmem:[#allocation8 + $0x170] sm:$0xff]  ;;  %v1056_v51 = vld [vmem:[#allocation8 + $0x168] sm:$0xff] }
 0x218   : > { %1401 = vmatmul.mubr.f32.gmra.mrb[12].mxu0 %v1029_v32  ;;  %v986_v28 = vmul.f32 %v973_v54, %v6278_v15  ;;  %1791 = vperm.xlu1 %5019, %v1089_v52   ;;  %v1054_v32 = vld [vmem:[#allocation8 + $0x158] sm:$0xff]  ;;  %v1092_v54 = vld [vmem:[%s7389_s13 + $0x48] sm:$0xff]  ;;  %v2006_v52 = vld [vmem:[#allocation10 + $0x180] sm:$0xff] }
 0x219   : > { %1406 = vmatprep.mubr.f32.mxu0 %v1033_v8  ;;  %v4998_v55 = vpop.permute.xlu1 %4997  ;;  %v1053_v8 = vld [vmem:[#allocation8 + $0x150] sm:$0xff] }
 0x21a   : > { %v5000_v63 = vunpack.i.h.bf16 %v4998_v55  ;;  %v4999_v44 = vunpack.i.l.bf16 %v4998_v55  ;;  %v4993_v45 = vpop.permute.xlu0 %4992  ;;  %5022 = vset.pattern.permute.xlu0 %v5370_v41  ;;  %v1063_v55 = vld [vmem:[#allocation8 + $0x1a0] sm:$0xff] }
 0x21b   : > { %v4995_v29 = vunpack.i.h.bf16 %v4993_v45  ;;  %v4994_v0 = vunpack.i.l.bf16 %v4993_v45  ;;  %1795 = vperm.xlu0 %5022, %v1090_v31   ;;  %v1967_v45 = vld [vmem:[#allocation10 + $0x48] sm:$0xff] }
 0x21c   : > { %1407 = vmatmul.mubr.f32.gmra.mrb[14].mxu0 %v1032_v60  ;;  %5021 = vset.pattern.permute.xlu1 %v5371_v7  ;;  %v1059_v60 = vld [vmem:[#allocation8 + $0x180] sm:$0xff] }
 0x21d   : > { %1412 = vmatprep.mubr.f32.mxu0 %v1036_v61  ;;  %v918_v2 = vsel %vm912_vm4, %v4995_v29, %v5000_v63  ;;  %v926_v48 = vsel %vm912_vm4, %v5000_v63, %v4995_v29  ;;  %v917_v3 = vsel %vm912_vm4, %v4994_v0, %v4999_v44  ;;  %v925_v10 = vsel %vm912_vm4, %v4999_v44, %v4994_v0  ;;  %v944_v46 = vpop.permute.xlu1 %943  ;;  %v1093_v61 = vld [vmem:[%s7389_s13 + $0x50] sm:$0xff]  ;;  %v1961_v44 = vld [vmem:[#allocation10 + $0x18] sm:$0xff]  ;;  %v1958_v29 = vld [vmem:[#allocation10] sm:$0xff] }
 0x21e   : > { %v3901_v47 = vpack.c.bf16 %v918_v2, %v917_v3  ;;  %v1004_v57 = vsel %vm994_vm5, %v986_v28, %v925_v10  ;;  %v1006_v11 = vsel %vm994_vm5, %v988_v62, %v926_v48  ;;  %v942_v40 = vpop.permute.xlu0 %941  ;;  %1144 = vperm.xlu1 %5021, %v1090_v31   ;;  %v1959_v62 = vld [vmem:[#allocation10 + $0x8] sm:$0xff]  ;;  %v1965_v28 = vld [vmem:[#allocation10 + $0x38] sm:$0xff]  ;;  %v4099_v1 = vpack.c.bf16 %v1967_v45, %v1961_v44  ;;  %v1960_v45 = vld [vmem:[#allocation10 + $0x10] sm:$0xff] }
 0x21f   : > { %v3899_v58 = vpack.c.bf16 %v1006_v11, %v1004_v57  ;;  %5024 = vset.pattern.permute.xlu0 %v5371_v7  ;;  %v3907_v63 = vpack.c.bf16 %v1965_v28, %v1959_v62  ;;  %v1062_v0 = vld [vmem:[#allocation8 + $0x198] sm:$0xff]  ;;  %v1971_v3 = vld [vmem:[#allocation10 + $0x68] sm:$0xff]  ;;  %v1976_v11 = vld [vmem:[#allocation10 + $0x90] sm:$0xff] }
 0x220   : > { %1413 = vmatmul.mubr.f32.gmra.mrb[16].mxu0 %v1035_v33  ;;  %1154 = vperm.xlu0 %5024, %v1092_v54   ;;  %v1964_v33 = vld [vmem:[#allocation10 + $0x30] sm:$0xff]  ;;  %v1066_v2 = vld [vmem:[#allocation8 + $0x1b8] sm:$0xff]  ;;  %v1080_v28 = vld [vmem:[#allocation8 + $0x228] sm:$0xff] }
 0x221   : > { %1418 = vmatprep.mubr.f32.mxu0 %v1039_v56  ;;  %3900 = vmatprep.subr.bf16.mxu0 %v3899_v58  ;;  %v960_v12 = vpop.permute.xlu1 %959  ;;  %v3909_v48 = vpack.c.bf16 %v1964_v33, %v1958_v29  ;;  %v1977_v10 = vld [vmem:[#allocation10 + $0x98] sm:$0xff]  ;;  %v1983_v58 = vld [vmem:[#allocation10 + $0xc8] sm:$0xff]  ;;  %v2036_v62 = vld [vmem:[#allocation10 + $0x270] sm:$0xff] }
 0x222   : > { %3902 = vmatpush1.bf16.msra.mxu0 %v3901_v47  ;;  %v958_v18 = vpop.permute.xlu0 %957  ;;  %v976_v20 = vsel %vm912_vm4, %v960_v12, %v944_v46  ;;  %1149 = vperm.xlu1 %5021, %v1091_v49   ;;  %v1095_v46 = vld [vmem:[%s7389_s13 + $0x60] sm:$0xff]  ;;  %v3911_v56 = vpack.c.bf16 %v1977_v10, %v1971_v3  ;;  %v1094_v57 = vld [vmem:[%s7389_s13 + $0x58] sm:$0xff]  ;;  %v2048_v3 = vld [vmem:[#allocation10 + $0x2d0] sm:$0xff]  ;;  %v5372_v10 = vmov 0.0  }
 0x223   : > { %v975_v14 = vsel %vm912_vm4, %v958_v18, %v942_v40  ;;  %v992_v24 = vmul.f32 %v976_v20, %v6278_v15  ;;  %3908 = vmatprep.subr.bf16.mxu1 %v3907_v63  ;;  %v1970_v47 = vld [vmem:[#allocation10 + $0x60] sm:$0xff]  ;;  %v1065_v40 = vld [vmem:[#allocation8 + $0x1b0] sm:$0xff]  ;;  %v2043_v63 = vld [vmem:[#allocation10 + $0x2a8] sm:$0xff] }
 0x224   : > { %1419 = vmatmul.mubr.f32.gmra.mrb[18].mxu0 %v1038_v5  ;;  %v990_v25 = vmul.f32 %v975_v14, %v6278_v15  ;;  %5026 = vset.pattern.permute.xlu0 %v5370_v41  ;;  %v1069_v5 = vld [vmem:[#allocation8 + $0x1d0] sm:$0xff]  ;;  %v3913_v12 = vpack.c.bf16 %v1976_v11, %v1970_v47  ;;  %v1982_v18 = vld [vmem:[#allocation10 + $0xc0] sm:$0xff]  ;;  %v1096_v14 = vld [vmem:[%s7389_s13 + $0x68] sm:$0xff] }
 0x225   : > { %1424 = vmatprep.mubr.f32.mxu0 %v1042_v13  ;;  %v5008_v16 = vpop.permute.xlu1 %5007  ;;  %1807 = vperm.xlu0 %5026, %v1093_v61   ;;  %v3915_v13 = vpack.c.bf16 %v1989_v4, %v1983_v58  ;;  %v1988_v20 = vld [vmem:[#allocation10 + $0xf0] sm:$0xff]  ;;  %v2049_v44 = vld [vmem:[#allocation10 + $0x2d8] sm:$0xff]  ;;  %v1966_v29 = vld [vmem:[#allocation10 + $0x40] sm:$0xff] }
 0x226   : > { %v5010_v19 = vunpack.i.h.bf16 %v5008_v16  ;;  %v5009_v22 = vunpack.i.l.bf16 %v5008_v16  ;;  %v5003_v42 = vpop.permute.xlu0 %5002  ;;  %5023 = vset.pattern.permute.xlu1 %v5370_v41  ;;  %3910 = vmatpush1.bf16.msra.mxu1 %v3909_v48  ;;  %v2001_v16 = vld [vmem:[#allocation10 + $0x158] sm:$0xff]  ;;  %v2042_v48 = vld [vmem:[#allocation10 + $0x2a0] sm:$0xff]  ;;  %v4101_v47 = vpack.c.bf16 %v1966_v29, %v1960_v45  ;;  %v1972_v11 = vld [vmem:[#allocation10 + $0x70] sm:$0xff] }
 0x227   : > { %v5005_v38 = vunpack.i.h.bf16 %v5003_v42  ;;  %v5004_v43 = vunpack.i.l.bf16 %v5003_v42  ;;  %1799 = vperm.xlu1 %5023, %v1091_v49   ;;  %3912 = vmatprep.subr.bf16.mxu1 %v3911_v56  ;;  %v2000_v42 = vld [vmem:[#allocation10 + $0x150] sm:$0xff]  ;;  %v2031_v49 = vld [vmem:[#allocation10 + $0x248] sm:$0xff]  ;;  %v6525_v56 = vld [vmem:[%s7389_s13 + $0x98] sm:$0xff] }
 0x228   : > { %1425 = vmatmul.mubr.f32.gmra.mrb[20].mxu0 %v1041_v21  ;;  %v1995_v21 = vld [vmem:[#allocation10 + $0x128] sm:$0xff]  ;;  %v1985_v58 = vld [vmem:[#allocation10 + $0xd8] sm:$0xff]  ;;  %v2020_v45 = vld [vmem:[#allocation10 + $0x1f0] sm:$0xff] }
 0x229   : > { %1430 = vmatprep.mubr.f32.mxu0 %v1045_v17  ;;  %v920_v27 = vsel %vm912_vm4, %v5005_v38, %v5010_v19  ;;  %v928_v39 = vsel %vm912_vm4, %v5010_v19, %v5005_v38  ;;  %v919_v15 = vsel %vm912_vm4, %v5004_v43, %v5009_v22  ;;  %v927_v23 = vsel %vm912_vm4, %v5009_v22, %v5004_v43  ;;  %v1068_v17 = vld [vmem:[#allocation8 + $0x1c8] sm:$0xff]  ;;  %v1994_v22 = vld [vmem:[#allocation10 + $0x120] sm:$0xff]  ;;  %v2013_v43 = vld [vmem:[#allocation10 + $0x1b8] sm:$0xff] }
 0x22a   : > { %v3905_v35 = vpack.c.bf16 %v920_v27, %v919_v15  ;;  %v1008_v30 = vsel %vm994_vm5, %v990_v25, %v927_v23  ;;  %v1010_v53 = vsel %vm994_vm5, %v992_v24, %v928_v39  ;;  %5028 = vset.pattern.permute.xlu0 %v5371_v7  ;;  %v1072_v24 = vld [vmem:[#allocation8 + $0x1e8] sm:$0xff]  ;;  %3914 = vmatpush1.bf16.msra.mxu1 %v3913_v12  ;;  %v6497_v27 = vld [vmem:[%s7389_s13 + $0x78] sm:$0xff]  ;;  %v1075_v39 = vld [vmem:[#allocation8 + $0x200] sm:$0xff] }
 0x22b   : > { %v3903_v36 = vpack.c.bf16 %v1010_v53, %v1008_v30  ;;  %1803 = vperm.xlu1 %5023, %v1092_v54   ;;  %1169 = vperm.xlu0 %5028, %v1095_v46   ;;  %v3917_v25 = vpack.c.bf16 %v1988_v20, %v1982_v18  ;;  %v3919_v19 = vpack.c.bf16 %v2001_v16, %v1995_v21  ;;  %v2007_v38 = vld [vmem:[#allocation10 + $0x188] sm:$0xff]  ;;  %v2025_v30 = vld [vmem:[#allocation10 + $0x218] sm:$0xff]  ;;  %v1097_v54 = vld [vmem:[%s7389_s13 + $0x70] sm:$0xff] }
 0x22c   : > { %1431 = vmatmul.mubr.f32.gmra.mrb[22].mxu0 %v1044_v26  ;;  %3916 = vmatprep.subr.bf16.mxu1 %v3915_v13  ;;  %v1071_v26 = vld [vmem:[#allocation8 + $0x1e0] sm:$0xff]  ;;  %v3921_v15 = vpack.c.bf16 %v2000_v42, %v1994_v22  ;;  %v3923_v23 = vpack.c.bf16 %v2013_v43, %v2007_v38  ;;  %v1074_v53 = vld [vmem:[#allocation8 + $0x1f8] sm:$0xff]  ;;  %v1991_v4 = vld [vmem:[#allocation10 + $0x108] sm:$0xff] }
 0x22d   : > { %1436 = vmatprep.mubr.f32.mxu0 %v1048_v34  ;;  %3904 = vmatprep.subr.bf16.mxu0 %v3903_v36  ;;  %v2012_v34 = vld [vmem:[#allocation10 + $0x1b0] sm:$0xff]  ;;  %v1078_v36 = vld [vmem:[#allocation8 + $0x218] sm:$0xff]  ;;  %v2055_v12 = vld [vmem:[#allocation10 + $0x308] sm:$0xff] }
 0x22e   : > { %3906 = vmatpush1.bf16.msra.mxu0 %v3905_v35  ;;  %3918 = vmatpush1.bf16.msra.mxu1 %v3917_v25  ;;  %v2019_v35 = vld [vmem:[#allocation10 + $0x1e8] sm:$0xff]  ;;  %v2061_v13 = vld [vmem:[#allocation10 + $0x338] sm:$0xff]  ;;  %v1984_v21 = vld [vmem:[#allocation10 + $0xd0] sm:$0xff] }
 0x22f   : > { %5025 = vset.pattern.permute.xlu1 %v5371_v7  ;;  %4100 = vmatprep.subr.bf16.mxu0 %v4099_v1  ;;  %v3927_v31 = vpack.c.bf16 %v2025_v30, %v2019_v35  ;;  %v1979_v1 = vld [vmem:[#allocation10 + $0xa8] sm:$0xff]  ;;  %v1990_v16 = vld [vmem:[#allocation10 + $0x100] sm:$0xff]  ;;  %v2060_v42 = vld [vmem:[#allocation10 + $0x330] sm:$0xff] }
 0x230   : > { %1437 = vmatmul.mubr.f32.gmra.mrb[24].mxu0 %v1047_v37  ;;  %1159 = vperm.xlu1 %5025, %v1093_v61   ;;  %v6504_v37 = vld [vmem:[%s7389_s13 + $0x80] sm:$0xff]  ;;  %v1016_v18 = vld [vmem:[#allocation8 + $0x28] sm:$0xff]  ;;  %v4109_v43 = vpack.c.bf16 %v1990_v16, %v1984_v21  ;;  %v2108_v16 = vld [vmem:[#allocation10 + $0x4b0] sm:$0xff] }
 0x231   : > { %1442 = vmatprep.mubr.f32.mxu0 %v1051_v50  ;;  %5030 = vset.pattern.permute.xlu0 %v5370_v41  ;;  %v3925_v50 = vpack.c.bf16 %v2012_v34, %v2006_v52  ;;  %v2030_v61 = vld [vmem:[#allocation10 + $0x240] sm:$0xff]  ;;  %v2003_v25 = vld [vmem:[#allocation10 + $0x168] sm:$0xff]  ;;  %v2009_v52 = vld [vmem:[#allocation10 + $0x198] sm:$0xff] }
 0x232   : > { %1819 = vperm.xlu0 %5030, %v1096_v14   ;;  %3920 = vmatprep.subr.bf16.mxu1 %v3919_v19  ;;  %v3933_v33 = vpack.c.bf16 %v2036_v62, %v2030_v61  ;;  %v3939_v19 = vpack.c.bf16 %v2061_v13, %v2055_v12  ;;  %v2054_v22 = vld [vmem:[#allocation10 + $0x300] sm:$0xff]  ;;  %v2015_v34 = vld [vmem:[#allocation10 + $0x1c8] sm:$0xff]  ;;  %v2084_v62 = vld [vmem:[#allocation10 + $0x3f0] sm:$0xff] }
 0x233   : > { %3922 = vmatpush1.bf16.msra.mxu1 %v3921_v15  ;;  %v1019_v38 = vld [vmem:[#allocation8 + $0x40] sm:$0xff]  ;;  %v1996_v15 = vld [vmem:[#allocation10 + $0x130] sm:$0xff]  ;;  %v3941_v35 = vpack.c.bf16 %v2060_v42, %v2054_v22  ;;  %v1100_v30 = vld [vmem:[%s7389_s13 + $0x88] sm:$0xff] }
 0x234   : > { %1443 = vmatmul.mubr.f32.gmra.mrb[26].mxu0 %v1050_v6  ;;  %1164 = vperm.xlu1 %5025, %v1094_v57   ;;  %v2018_v6 = vld [vmem:[#allocation10 + $0x1e0] sm:$0xff]  ;;  %v2045_v12 = vld [vmem:[#allocation10 + $0x2b8] sm:$0xff] }
 0x235   : > { %1448 = vmatprep.mubr.f32.mxu0 %v1054_v32  ;;  %3924 = vmatprep.subr.bf16.mxu1 %v3923_v23  ;;  %v2024_v32 = vld [vmem:[#allocation10 + $0x210] sm:$0xff]  ;;  %v2002_v23 = vld [vmem:[#allocation10 + $0x160] sm:$0xff] }
 0x236   : > { %5032 = vset.pattern.permute.xlu0 %v5371_v7  ;;  %v2078_v61 = vld [vmem:[#allocation10 + $0x3c0] sm:$0xff] }
 0x237   : > { %1184 = vperm.xlu0 %5032, %v6497_v27   ;;  %3926 = vmatpush1.bf16.msra.mxu1 %v3925_v50  ;;  %v2072_v50 = vld [vmem:[#allocation10 + $0x390] sm:$0xff]  ;;  %v2026_v29 = vld [vmem:[#allocation10 + $0x220] sm:$0xff] }
 0x238   : > { %1449 = vmatmul.mubr.f32.gmra.mrb[28].mxu0 %v1053_v8  ;;  %5027 = vset.pattern.permute.xlu1 %v5370_v41  ;;  %v2037_v8 = vld [vmem:[#allocation10 + $0x278] sm:$0xff]  ;;  %v2102_v21 = vld [vmem:[#allocation10 + $0x480] sm:$0xff] }
 0x239   : > { %1454 = vmatprep.mubr.f32.mxu0 %v1057_v59  ;;  %1811 = vperm.xlu1 %5027, %v1094_v57   ;;  %v1077_v59 = vld [vmem:[#allocation8 + $0x210] sm:$0xff] }
 0x23a   : > { %3928 = vmatprep.subr.bf16.mxu1 %v3927_v31  ;;  %v1022_v31 = vld [vmem:[#allocation8 + $0x58] sm:$0xff] }
 0x23b   : > { %5034 = vset.pattern.permute.xlu0 %v5370_v41 }
 0x23c   : > { %1455 = vmatmul.mubr.f32.gmra.mrb[30].mxu0 %v1056_v51  ;;  %1831 = vperm.xlu0 %5034, %v6504_v37   ;;  %v1081_v51 = vld [vmem:[#allocation8 + $0x230] sm:$0xff] }
 0x23d   : > { %1460 = vmatprep.mubr.f32.mxu0 %v1060_v9  ;;  %1815 = vperm.xlu1 %5027, %v1095_v46   ;;  %v3929_v9 = vpack.c.bf16 %v2024_v32, %v2018_v6  ;;  %v1013_v46 = vld [vmem:[#allocation8 + $0x10] sm:$0xff]  ;;  %v4115_v32 = vpack.c.bf16 %v2015_v34, %v2009_v52  ;;  %v1034_v34 = vld [vmem:[#allocation8 + $0xb8] sm:$0xff] }
 0x23e   : > { %v6551_v6 = vld [vmem:[%s7389_s13 + $0xb0] sm:$0xff] }
 0x23f   : > { %3930 = vmatpush1.bf16.msra.mxu1 %v3929_v9  ;;  %v2079_v9 = vld [vmem:[#allocation10 + $0x3c8] sm:$0xff]  ;;  %v2120_v52 = vld [vmem:[#allocation10 + $0x510] sm:$0xff] }
 0x240   : > { %1461 = vmatmul.mubr.f32.gmra.mrb[32].mxu0 %v1059_v60  ;;  %v6515_v60 = vld [vmem:[%s7389_s13 + $0x90] sm:$0xff]  ;;  %5036 = vset.pattern.permute.xlu0 %v5371_v7 }
 0x241   : > { %1466 = vmatprep.mubr.f32.mxu0 %v1063_v55  ;;  %5029 = vset.pattern.permute.xlu1 %v5371_v7  ;;  %v3931_v55 = vpack.c.bf16 %v2037_v8, %v2031_v49  ;;  %v2008_v49 = vld [vmem:[#allocation10 + $0x190] sm:$0xff]  ;;  %v2014_v8 = vld [vmem:[#allocation10 + $0x1c0] sm:$0xff] }
 0x242   : > { %1174 = vperm.xlu1 %5029, %v1096_v14   ;;  %1199 = vperm.xlu0 %5036, %v6515_v60   ;;  %v4107_v14 = vpack.c.bf16 %v1991_v4, %v1985_v58  ;;  %v2032_v58 = vld [vmem:[#allocation10 + $0x250] sm:$0xff]  ;;  %v2038_v4 = vld [vmem:[#allocation10 + $0x280] sm:$0xff] }
 0x243   : > { %3932 = vmatprep.subr.bf16.mxu1 %v3931_v55  ;;  %v2085_v55 = vld [vmem:[#allocation10 + $0x3f8] sm:$0xff]  ;;  %v4125_v22 = vpack.c.bf16 %v2038_v4, %v2032_v58  ;;  %v2111_v58 = vld [vmem:[#allocation10 + $0x4c8] sm:$0xff] }
 0x244   : > { %1467 = vmatmul.mubr.f32.gmra.mrb[34].mxu0 %v1062_v0  ;;  %v1973_v0 = vld [vmem:[#allocation10 + $0x78] sm:$0xff]  ;;  %3934 = vmatpush1.bf16.msra.mxu1 %v3933_v33  ;;  %v2039_v33 = vld [vmem:[#allocation10 + $0x288] sm:$0xff] }
 0x245   : > { %1472 = vmatprep.mubr.f32.mxu0 %v1066_v2  ;;  %v3935_v2 = vpack.c.bf16 %v2049_v44, %v2043_v63  ;;  %v4103_v57 = vpack.c.bf16 %v1979_v1, %v1973_v0  ;;  %v4117_v63 = vpack.c.bf16 %v2014_v8, %v2008_v49  ;;  %v2033_v0 = vld [vmem:[#allocation10 + $0x258] sm:$0xff]  ;;  %v3947_v1 = vpack.c.bf16 %v2085_v55, %v2079_v9  ;;  %v2075_v8 = vld [vmem:[#allocation10 + $0x3a8] sm:$0xff] }
 0x246   : > { %1179 = vperm.xlu1 %5029, %v1097_v54   ;;  %5038 = vset.pattern.permute.xlu0 %v5370_v41  ;;  %v1046_v4 = vld [vmem:[#allocation8 + $0x118] sm:$0xff] }
 0x247   : > { %1843 = vperm.xlu0 %5038, %v6525_v56   ;;  %3936 = vmatprep.subr.bf16.mxu1 %v3935_v2  ;;  %v3949_v2 = vpack.c.bf16 %v2084_v62, %v2078_v61  ;;  %v2068_v61 = vld [vmem:[#allocation10 + $0x370] sm:$0xff]  ;;  %v2074_v62 = vld [vmem:[#allocation10 + $0x3a0] sm:$0xff] }
 0x248   : > { %1473 = vmatmul.mubr.f32.gmra.mrb[36].mxu0 %v1065_v40  ;;  %v1978_v40 = vld [vmem:[#allocation10 + $0xa0] sm:$0xff] }
 0x249   : > { %1478 = vmatprep.mubr.f32.mxu0 %v1069_v5  ;;  %v3937_v5 = vpack.c.bf16 %v2048_v3, %v2042_v48  ;;  %v4105_v20 = vpack.c.bf16 %v1978_v40, %v1972_v11  ;;  %v2091_v48 = vld [vmem:[#allocation10 + $0x428] sm:$0xff]  ;;  %v2097_v3 = vld [vmem:[#allocation10 + $0x458] sm:$0xff]  ;;  %v4121_v11 = vpack.c.bf16 %v2026_v29, %v2020_v45  ;;  %v4123_v40 = vpack.c.bf16 %v2039_v33, %v2033_v0  ;;  %v2086_v33 = vld [vmem:[#allocation10 + $0x400] sm:$0xff] }
 0x24a   : > { %5031 = vset.pattern.permute.xlu1 %v5370_v41  ;;  %v1040_v45 = vld [vmem:[#allocation8 + $0xe8] sm:$0xff]  ;;  %v4137_v29 = vpack.c.bf16 %v2074_v62, %v2068_v61  ;;  %v2153_v61 = vld [vmem:[#allocation10 + $0x618] sm:$0xff] }
 0x24b   : > { %1823 = vperm.xlu1 %5031, %v1097_v54   ;;  %5040 = vset.pattern.permute.xlu0 %v5371_v7  ;;  %v1082_v62 = vld [vmem:[#allocation8 + $0x238] sm:$0xff] }
 0x24c   : > { %1479 = vmatmul.mubr.f32.gmra.mrb[38].mxu0 %v1068_v17  ;;  %v6534_v17 = vld [vmem:[%s7389_s13 + $0xa8] sm:$0xff]  ;;  %3938 = vmatpush1.bf16.msra.mxu1 %v3937_v5  ;;  %v3951_v5 = vpack.c.bf16 %v2097_v3, %v2091_v48  ;;  %v1043_v3 = vld [vmem:[#allocation8 + $0x100] sm:$0xff] }
 0x24d   : > { %1484 = vmatprep.mubr.f32.mxu0 %v1072_v24  ;;  %v1997_v24 = vld [vmem:[#allocation10 + $0x138] sm:$0xff]  ;;  %1214 = vperm.xlu0 %5040, %v6534_v17   ;;  %v2099_v48 = vld [vmem:[#allocation10 + $0x468] sm:$0xff] }
 0x24e   : > { %3940 = vmatprep.subr.bf16.mxu1 %v3939_v19  ;;  %v2121_v19 = vld [vmem:[#allocation10 + $0x518] sm:$0xff] }
 0x24f   : > { %1827 = vperm.xlu1 %5031, %v6497_v27   ;;  %v2073_v27 = vld [vmem:[#allocation10 + $0x398] sm:$0xff] }
 0x250   : > { %1485 = vmatmul.mubr.f32.gmra.mrb[40].mxu0 %v1071_v26  ;;  %v2067_v26 = vld [vmem:[#allocation10 + $0x368] sm:$0xff]  ;;  %3942 = vmatpush1.bf16.msra.mxu1 %v3941_v35 }
 0x251   : > { %1490 = vmatprep.mubr.f32.mxu0 %v1075_v39  ;;  %v4111_v39 = vpack.c.bf16 %v2003_v25, %v1997_v24  ;;  %5042 = vset.pattern.permute.xlu0 %v5370_v41  ;;  %v1031_v24 = vld [vmem:[#allocation8 + $0xa0] sm:$0xff]  ;;  %v2115_v25 = vld [vmem:[#allocation10 + $0x4e8] sm:$0xff] }
 0x252   : > { %1855 = vperm.xlu0 %5042, %v6551_v6   ;;  %v2127_v35 = vld [vmem:[#allocation10 + $0x548] sm:$0xff] }
 0x253   : > { %5033 = vset.pattern.permute.xlu1 %v5371_v7 }
 0x254   : > { %1491 = vmatmul.mubr.f32.gmra.mrb[42].mxu0 %v1074_v53  ;;  %1189 = vperm.xlu1 %5033, %v6504_v37   ;;  %v3943_v53 = vpack.c.bf16 %v2073_v27, %v2067_v26  ;;  %v4113_v37 = vpack.c.bf16 %v2002_v23, %v1996_v15  ;;  %v2050_v26 = vld [vmem:[#allocation10 + $0x2e0] sm:$0xff]  ;;  %v2057_v27 = vld [vmem:[#allocation10 + $0x318] sm:$0xff]  ;;  %v3959_v15 = vpack.c.bf16 %v2121_v19, %v2115_v25  ;;  %v2135_v19 = vld [vmem:[#allocation10 + $0x588] sm:$0xff] }
 0x255   : > { %1496 = vmatprep.mubr.f32.mxu0 %v1078_v36  ;;  %v2066_v36 = vld [vmem:[#allocation10 + $0x360] sm:$0xff]  ;;  %v2129_v25 = vld [vmem:[#allocation10 + $0x558] sm:$0xff] }
 0x256   : > { %v3945_v54 = vpack.c.bf16 %v2072_v50, %v2066_v36  ;;  %3944 = vmatprep.subr.bf16.mxu1 %v3943_v53  ;;  %v2114_v23 = vld [vmem:[#allocation10 + $0x4e0] sm:$0xff] }
 0x257   : > { %v1103_v53 = vld [vmem:[%s7389_s13 + $0xa0] sm:$0xff]  ;;  %v3961_v49 = vpack.c.bf16 %v2120_v52, %v2114_v23  ;;  %v1076_v23 = vld [vmem:[#allocation8 + $0x208] sm:$0xff]  ;;  %v2128_v52 = vld [vmem:[#allocation10 + $0x550] sm:$0xff] }
 0x258   : > { %1497 = vmatmul.mubr.f32.gmra.mrb[44].mxu0 %v1077_v59  ;;  %v2021_v59 = vld [vmem:[#allocation10 + $0x1f8] sm:$0xff]  ;;  %1194 = vperm.xlu1 %5033, %v1100_v30  }
 0x259   : > { %1502 = vmatprep.mubr.f32.mxu0 %v1081_v51  ;;  %v2027_v51 = vld [vmem:[#allocation10 + $0x228] sm:$0xff]  ;;  %3946 = vmatpush1.bf16.msra.mxu1 %v3945_v54  ;;  %v1037_v54 = vld [vmem:[#allocation8 + $0xd0] sm:$0xff] }
 0x25a   : > { %v4119_v44 = vpack.c.bf16 %v2027_v51, %v2021_v59  ;;  %3948 = vmatprep.subr.bf16.mxu1 %v3947_v1  ;;  %v2126_v59 = vld [vmem:[#allocation10 + $0x540] sm:$0xff]  ;;  %v2132_v51 = vld [vmem:[#allocation10 + $0x570] sm:$0xff] }
 0x25b   : > { %v2080_v1 = vld [vmem:[#allocation10 + $0x3d0] sm:$0xff] }
 0x25c   : > { %1503 = vmatmul.mubr.f32.gmra.mrb[46].mxu0 %v1080_v28  ;;  %v1025_v28 = vld [vmem:[#allocation8 + $0x70] sm:$0xff]  ;;  %5035 = vset.pattern.permute.xlu1 %v5370_v41 }
 0x25d   : > { %1573 = vmatprep.mubr.f32.mxu0 %v5372_v10  ;;  %1835 = vperm.xlu1 %5035, %v1100_v30   ;;  %v2133_v30 = vld [vmem:[#allocation10 + $0x578] sm:$0xff] }
 0x25e   : > { %3950 = vmatpush1.bf16.msra.mxu1 %v3949_v2  ;;  %v2093_v2 = vld [vmem:[#allocation10 + $0x438] sm:$0xff] }
 0x25f   : > { %3952 = vmatprep.subr.bf16.mxu1 %v3951_v5 }
 0x260   : > { %3800 = vmatmul.mubr.msk.f32.vlgmr.msra.gmra.mrb[0].mxu0 %vm1227_vm6, %v1013_v46  ;;  %v2090_v46 = vld [vmem:[#allocation10 + $0x420] sm:$0xff] }
 0x261   : > { %1579 = vmatprep.mubr.f32.mxu0 %v5372_v10  ;;  %4102 = vmatpush1.bf16.msra.mxu0 %v4101_v47  ;;  %v2096_v47 = vld [vmem:[#allocation10 + $0x450] sm:$0xff] }
 0x262   : > { %4104 = vmatprep.subr.bf16.mxu0 %v4103_v57  ;;  %v1028_v57 = vld [vmem:[#allocation8 + $0x88] sm:$0xff]  ;;  %v3953_v13 = vpack.c.bf16 %v2096_v47, %v2090_v46  ;;  %1839 = vperm.xlu1 %5035, %v6515_v60   ;;  %v4141_v46 = vpack.c.bf16 %v2086_v33, %v2080_v1  ;;  %v4143_v47 = vpack.c.bf16 %v2099_v48, %v2093_v2 }
 0x263   : > { %v2063_v60 = vld [vmem:[#allocation10 + $0x348] sm:$0xff] }
 0x264   : > { %3801 = vmatmul.mubr.msk.f32.gmra.mrb[2].mxu0 %vm1227_vm6, %v1016_v18  ;;  %v2103_v18 = vld [vmem:[#allocation10 + $0x488] sm:$0xff]  ;;  %3954 = vmatpush1.bf16.msra.mxu1 %v3953_v13  ;;  %v4131_v50 = vpack.c.bf16 %v2063_v60, %v2057_v27  ;;  %v2110_v13 = vld [vmem:[#allocation10 + $0x4c0] sm:$0xff]  ;;  %v1070_v60 = vld [vmem:[#allocation8 + $0x1d8] sm:$0xff] }
 0x265   : > { %1585 = vmatprep.mubr.f32.mxu0 %v5372_v10  ;;  %4106 = vmatpush1.bf16.msra.mxu0 %v4105_v20  ;;  %v2109_v20 = vld [vmem:[#allocation10 + $0x4b8] sm:$0xff]  ;;  %v1064_v27 = vld [vmem:[#allocation8 + $0x1a8] sm:$0xff] }
 0x266   : > { %4108 = vmatprep.subr.bf16.mxu0 %v4107_v14  ;;  %v2051_v14 = vld [vmem:[#allocation10 + $0x2e8] sm:$0xff]  ;;  %v3955_v42 = vpack.c.bf16 %v2109_v20, %v2103_v18  ;;  %5037 = vset.pattern.permute.xlu1 %v5371_v7  ;;  %v1106_v18 = vld [vmem:[%s7389_s13 + $0xb8] sm:$0xff] }
 0x267   : > { %1204 = vperm.xlu1 %5037, %v6525_v56   ;;  %v3963_v56 = vpack.c.bf16 %v2133_v30, %v2127_v35  ;;  %v2117_v20 = vld [vmem:[#allocation10 + $0x4f8] sm:$0xff]  ;;  %v1079_v30 = vld [vmem:[#allocation8 + $0x220] sm:$0xff] }
 0x268   : > { %3802 = vmatmul.mubr.msk.f32.gmra.mrb[4].mxu0 %vm1227_vm6, %v1019_v38  ;;  %v4127_v38 = vpack.c.bf16 %v2051_v14, %v2045_v12  ;;  %3956 = vmatprep.subr.bf16.mxu1 %v3955_v42  ;;  %v2104_v12 = vld [vmem:[#allocation10 + $0x490] sm:$0xff]  ;;  %v2123_v14 = vld [vmem:[#allocation10 + $0x528] sm:$0xff] }
 0x269   : > { %1591 = vmatprep.mubr.f32.mxu0 %v5372_v10  ;;  %4110 = vmatpush1.bf16.msra.mxu0 %v4109_v43  ;;  %v2044_v43 = vld [vmem:[#allocation10 + $0x2b0] sm:$0xff] }
 0x26a   : > { %4112 = vmatprep.subr.bf16.mxu0 %v4111_v39  ;;  %v3957_v39 = vpack.c.bf16 %v2108_v16, %v2102_v21  ;;  %v4129_v36 = vpack.c.bf16 %v2050_v26, %v2044_v43  ;;  %v1049_v21 = vld [vmem:[#allocation8 + $0x130] sm:$0xff]  ;;  %v1055_v43 = vld [vmem:[#allocation8 + $0x160] sm:$0xff]  ;;  %v1058_v26 = vld [vmem:[#allocation8 + $0x178] sm:$0xff] }
 0x26b   : > { %1209 = vperm.xlu1 %5037, %v1103_v53   ;;  %v2116_v16 = vld [vmem:[#allocation10 + $0x4f0] sm:$0xff] }
 0x26c   : > { %3803 = vmatmul.mubr.msk.f32.gmra.mrb[6].mxu0 %vm1227_vm6, %v1022_v31  ;;  %v2056_v31 = vld [vmem:[#allocation10 + $0x310] sm:$0xff]  ;;  %3958 = vmatpush1.bf16.msra.mxu1 %v3957_v39  ;;  %v1067_v39 = vld [vmem:[#allocation8 + $0x1c0] sm:$0xff] }
 0x26d   : > { %1597 = vmatprep.mubr.f32.mxu0 %v5372_v10  ;;  %4114 = vmatpush1.bf16.msra.mxu0 %v4113_v37  ;;  %v2062_v37 = vld [vmem:[#allocation10 + $0x340] sm:$0xff] }
 0x26e   : > { %4116 = vmatprep.subr.bf16.mxu0 %v4115_v32  ;;  %v2069_v32 = vld [vmem:[#allocation10 + $0x378] sm:$0xff]  ;;  %3960 = vmatprep.subr.bf16.mxu1 %v3959_v15  ;;  %v4133_v9 = vpack.c.bf16 %v2062_v37, %v2056_v31  ;;  %v1073_v15 = vld [vmem:[#allocation8 + $0x1f0] sm:$0xff]  ;;  %v2147_v37 = vld [vmem:[#allocation10 + $0x5e8] sm:$0xff] }
 0x26f   : > { %v4135_v55 = vpack.c.bf16 %v2075_v8, %v2069_v32  ;;  %5039 = vset.pattern.permute.xlu1 %v5370_v41  ;;  %v2138_v32 = vld [vmem:[#allocation10 + $0x5a0] sm:$0xff] }
 0x270   : > { %3804 = vmatmul.mubr.msk.f32.gmra.mrb[8].mxu0 %vm1227_vm6, %v1025_v28  ;;  %3962 = vmatpush1.bf16.msra.mxu1 %v3961_v49  ;;  %v3965_v28 = vpack.c.bf16 %v2132_v51, %v2126_v59  ;;  %v2144_v49 = vld [vmem:[#allocation10 + $0x5d0] sm:$0xff]  ;;  %v2146_v51 = vld [vmem:[#allocation10 + $0x5e0] sm:$0xff] }
 0x271   : > { %1603 = vmatprep.mubr.f32.mxu0 %v5372_v10  ;;  %4118 = vmatpush1.bf16.msra.mxu0 %v4117_v63  ;;  %v2081_v63 = vld [vmem:[#allocation10 + $0x3d8] sm:$0xff]  ;;  %v2140_v59 = vld [vmem:[#allocation10 + $0x5b0] sm:$0xff] }
 0x272   : > { %4120 = vmatprep.subr.bf16.mxu0 %v4119_v44  ;;  %v2087_v44 = vld [vmem:[#allocation10 + $0x408] sm:$0xff]  ;;  %3964 = vmatprep.subr.bf16.mxu1 %v3963_v56  ;;  %v3969_v56 = vpack.c.bf16 %v2144_v49, %v2138_v32  ;;  %v2174_v32 = vld [vmem:[#allocation10 + $0x6c0] sm:$0xff]  ;;  %v2180_v49 = vld [vmem:[#allocation10 + $0x6f0] sm:$0xff] }
 0x273   : > { %1847 = vperm.xlu1 %5039, %v1103_v53   ;;  %v4139_v0 = vpack.c.bf16 %v2087_v44, %v2081_v63  ;;  %v2139_v53 = vld [vmem:[#allocation10 + $0x5a8] sm:$0xff] }
 0x274   : > { %3805 = vmatmul.mubr.msk.f32.gmra.mrb[10].mxu0 %vm1227_vm6, %v1028_v57  ;;  %3966 = vmatpush1.bf16.msra.mxu1 %v3965_v28  ;;  %v2092_v57 = vld [vmem:[#allocation10 + $0x430] sm:$0xff]  ;;  %v2159_v63 = vld [vmem:[#allocation10 + $0x648] sm:$0xff] }
 0x275   : > { %1609 = vmatprep.mubr.f32.mxu0 %v5372_v10  ;;  %4122 = vmatpush1.bf16.msra.mxu0 %v4121_v11  ;;  %v2098_v11 = vld [vmem:[#allocation10 + $0x460] sm:$0xff]  ;;  %v4163_v44 = vpack.c.bf16 %v2159_v63, %v2153_v61  ;;  %v2193_v61 = vld [vmem:[#allocation10 + $0x758] sm:$0xff] }
 0x276   : > { %4124 = vmatprep.subr.bf16.mxu0 %v4123_v40  ;;  %v2105_v40 = vld [vmem:[#allocation10 + $0x498] sm:$0xff]  ;;  %v4145_v5 = vpack.c.bf16 %v2098_v11, %v2092_v57  ;;  %v2150_v57 = vld [vmem:[#allocation10 + $0x600] sm:$0xff]  ;;  %v2156_v11 = vld [vmem:[#allocation10 + $0x630] sm:$0xff] }
 0x277   : > { %1851 = vperm.xlu1 %5039, %v6534_v17   ;;  %v4147_v17 = vpack.c.bf16 %v2111_v58, %v2105_v40  ;;  %v2152_v58 = vld [vmem:[#allocation10 + $0x610] sm:$0xff]  ;;  %v2189_v63 = vld [vmem:[#allocation10 + $0x738] sm:$0xff] }
 0x278   : > { %3806 = vmatmul.mubr.msk.f32.gmra.mrb[12].mxu0 %vm1227_vm6, %v1031_v24  ;;  %v2122_v24 = vld [vmem:[#allocation10 + $0x520] sm:$0xff] }
 0x279   : > { %1615 = vmatprep.mubr.f32.mxu0 %v5372_v10  ;;  %4126 = vmatpush1.bf16.msra.mxu0 %v4125_v22  ;;  %v1052_v22 = vld [vmem:[#allocation8 + $0x148] sm:$0xff]  ;;  %v4153_v42 = vpack.c.bf16 %v2122_v24, %v2116_v16  ;;  %v3973_v16 = vpack.c.bf16 %v2156_v11, %v2150_v57  ;;  %v2186_v11 = vld [vmem:[#allocation10 + $0x720] sm:$0xff] }
 0x27a   : > { %4128 = vmatprep.subr.bf16.mxu0 %v4127_v38  ;;  %v4155_v38 = vpack.c.bf16 %v2135_v19, %v2129_v25  ;;  %v2162_v25 = vld [vmem:[#allocation10 + $0x660] sm:$0xff]  ;;  %v2168_v19 = vld [vmem:[#allocation10 + $0x690] sm:$0xff] }
 0x27b   : > { %5041 = vset.pattern.permute.xlu1 %v5371_v7  ;;  %v4149_v7 = vpack.c.bf16 %v2110_v13, %v2104_v12  ;;  %v2169_v12 = vld [vmem:[#allocation10 + $0x698] sm:$0xff] }
 0x27c   : > { %3807 = vmatmul.mubr.msk.f32.gmra.mrb[14].mxu0 %vm1227_vm6, %v1034_v34  ;;  %1219 = vperm.xlu1 %5041, %v6551_v6   ;;  %v4151_v6 = vpack.c.bf16 %v2123_v14, %v2117_v20  ;;  %v2134_v34 = vld [vmem:[#allocation10 + $0x580] sm:$0xff]  ;;  %v2165_v13 = vld [vmem:[#allocation10 + $0x678] sm:$0xff] }
 0x27d   : > { %1621 = vmatprep.mubr.f32.mxu0 %v5372_v10  ;;  %4130 = vmatpush1.bf16.msra.mxu0 %v4129_v36  ;;  %v4157_v35 = vpack.c.bf16 %v2134_v34, %v2128_v52  ;;  %v2145_v36 = vld [vmem:[#allocation10 + $0x5d8] sm:$0xff]  ;;  %v2183_v34 = vld [vmem:[#allocation10 + $0x708] sm:$0xff] }
 0x27e   : > { %4132 = vmatprep.subr.bf16.mxu0 %v4131_v50  ;;  %v2141_v50 = vld [vmem:[#allocation10 + $0x5b8] sm:$0xff]  ;;  %v3967_v31 = vpack.c.bf16 %v2145_v36, %v2139_v53  ;;  %v3977_v53 = vpack.c.bf16 %v2168_v19, %v2162_v25 }
 0x27f   : > { %v4159_v8 = vpack.c.bf16 %v2147_v37, %v2141_v50  ;;  %v2177_v52 = vld [vmem:[#allocation10 + $0x6d8] sm:$0xff] }
 0x280   : > { %3808 = vmatmul.mubr.msk.f32.gmra.mrb[16].mxu0 %vm1227_vm6, %v1037_v54  ;;  %1224 = vperm.xlu1 %5041, %v1106_v18   ;;  %v4161_v54 = vpack.c.bf16 %v2146_v51, %v2140_v59 }
 0x281   : > { %1627 = vmatprep.mubr.f32.mxu0 %v5372_v10  ;;  %4134 = vmatpush1.bf16.msra.mxu0 %v4133_v9  ;;  %v2151_v9 = vld [vmem:[#allocation10 + $0x608] sm:$0xff] }
 0x282   : > { %4136 = vmatprep.subr.bf16.mxu0 %v4135_v55  ;;  %3968 = vmatprep.subr.bf16.mxu1 %v3967_v31  ;;  %v2157_v55 = vld [vmem:[#allocation10 + $0x638] sm:$0xff] }
 0x283   : > { %3970 = vmatpush1.bf16.msra.mxu1 %v3969_v56  ;;  %v3971_v28 = vpack.c.bf16 %v2157_v55, %v2151_v9  ;;  %v2182_v9 = vld [vmem:[#allocation10 + $0x700] sm:$0xff]  ;;  %v2187_v55 = vld [vmem:[#allocation10 + $0x728] sm:$0xff] }
 0x284   : > { %3809 = vmatmul.mubr.msk.f32.gmra.mrb[18].mxu0 %vm1227_vm6, %v1040_v45  ;;  %5043 = vset.pattern.permute.xlu1 %v5370_v41  ;;  %v1061_v41 = vld [vmem:[#allocation8 + $0x190] sm:$0xff]  ;;  %v1768_v45 = vpop.permute.xlu1 %1767  ;;  %v3983_v57 = vpack.c.bf16 %v2193_v61, %v2187_v55 }
 0x285   : > { %1633 = vmatprep.mubr.f32.mxu0 %v5372_v10  ;;  %4138 = vmatpush1.bf16.msra.mxu0 %v4137_v29 }
 0x286   : > { %4140 = vmatprep.subr.bf16.mxu0 %v4139_v0  ;;  %1859 = vperm.xlu1 %5043, %v1106_v18   ;;  %v2171_v18 = vld [vmem:[#allocation10 + $0x6a8] sm:$0xff] }
 0x287   : > { %3972 = vmatprep.subr.bf16.mxu1 %v3971_v28 }
 0x288   : > { %3810 = vmatmul.mubr.msk.f32.gmra.mrb[20].mxu0 %vm1227_vm6, %v1043_v3  ;;  %v1115_v29 = vpop.permute.xlu1 %1114 }
 0x289   : > { %1639 = vmatprep.mubr.f32.mxu0 %v5372_v10  ;;  %4142 = vmatpush1.bf16.msra.mxu0 %v4141_v46 }
 0x28a   : > { %4144 = vmatprep.subr.bf16.mxu0 %v4143_v47 }
 0x28c   : > { %3811 = vmatmul.mubr.msk.f32.gmra.mrb[22].mxu0 %vm1227_vm6, %v1046_v4  ;;  %v1120_v0 = vpop.permute.xlu1 %1119  ;;  %v2158_v4 = vld [vmem:[#allocation10 + $0x640] sm:$0xff] }
 0x28d   : > { %1645 = vmatprep.mubr.f32.mxu0 %v5372_v10  ;;  %4146 = vmatpush1.bf16.msra.mxu0 %v4145_v5  ;;  %v2163_v5 = vld [vmem:[#allocation10 + $0x668] sm:$0xff]  ;;  %v4165_v24 = vpack.c.bf16 %v2158_v4, %v2152_v58  ;;  %v2188_v58 = vld [vmem:[#allocation10 + $0x730] sm:$0xff] }
 0x28e   : > { %4148 = vmatprep.subr.bf16.mxu0 %v4147_v17 }
 0x290   : > { %3812 = vmatmul.mubr.msk.f32.gmra.mrb[24].mxu0 %vm1227_vm6, %v1049_v21  ;;  %v6610_v1 = vpop.permute.xlu1 %1775 }
 0x291   : > { %1651 = vmatprep.mubr.f32.mxu0 %v5372_v10  ;;  %4150 = vmatpush1.bf16.msra.mxu0 %v4149_v7 }
 0x292   : > { %4152 = vmatprep.subr.bf16.mxu0 %v4151_v6 }
 0x294   : > { %3813 = vmatmul.mubr.msk.f32.gmra.mrb[26].mxu0 %vm1227_vm6, %v1052_v22  ;;  %v6612_v33 = vpop.permute.xlu1 %1779  ;;  %v2164_v22 = vld [vmem:[#allocation10 + $0x670] sm:$0xff] }
 0x295   : > { %1657 = vmatprep.mubr.f32.mxu0 %v5372_v10  ;;  %4154 = vmatpush1.bf16.msra.mxu0 %v4153_v42 }
 0x296   : > { %4156 = vmatprep.subr.bf16.mxu0 %v4155_v38 }
 0x298   : > { %3814 = vmatmul.mubr.msk.f32.gmra.mrb[28].mxu0 %vm1227_vm6, %v1055_v43  ;;  %v6614_v2 = vpop.permute.xlu1 %1129 }
 0x299   : > { %1663 = vmatprep.mubr.f32.mxu0 %v5372_v10  ;;  %4158 = vmatpush1.bf16.msra.mxu0 %v4157_v35 }
 0x29a   : > { %4160 = vmatprep.subr.bf16.mxu0 %v4159_v8  ;;  %v2176_v8 = vld [vmem:[#allocation10 + $0x6d0] sm:$0xff] }
 0x29c   : > { %3815 = vmatmul.mubr.msk.f32.gmra.mrb[30].mxu0 %vm1227_vm6, %v1058_v26  ;;  %v6616_v48 = vpop.permute.xlu1 %1134  ;;  %v3975_v26 = vpack.c.bf16 %v2169_v12, %v2163_v5  ;;  %v2199_v12 = vld [vmem:[#allocation10 + $0x788] sm:$0xff] }
 0x29d   : > { %1669 = vmatprep.mubr.f32.mxu0 %v5372_v10  ;;  %4162 = vmatpush1.bf16.msra.mxu0 %v4161_v54  ;;  %v4171_v54 = vpack.c.bf16 %v2183_v34, %v2177_v52  ;;  %v2206_v52 = vld [vmem:[#allocation10 + $0x7c0] sm:$0xff]  ;;  %v2211_v34 = vld [vmem:[#allocation10 + $0x7e8] sm:$0xff] }
 0x29e   : > { %4164 = vmatprep.subr.bf16.mxu0 %v4163_v44  ;;  %v2195_v44 = vld [vmem:[#allocation10 + $0x768] sm:$0xff] }
 0x2a0   : > { %3816 = vmatmul.mubr.msk.f32.gmra.mrb[32].mxu0 %vm1227_vm6, %v1061_v41  ;;  %v6618_v42 = vpop.permute.xlu1 %1787  ;;  %v4167_v41 = vpack.c.bf16 %v2171_v18, %v2165_v13  ;;  %v2205_v13 = vld [vmem:[#allocation10 + $0x7b8] sm:$0xff] }
 0x2a1   : > { %1675 = vmatprep.mubr.f32.mxu0 %v5372_v10 }
 0x2a4   : > { %3817 = vmatmul.mubr.msk.f32.gmra.mrb[34].mxu0 %vm1227_vm6, %v1064_v27  ;;  %v2170_v27 = vld [vmem:[#allocation10 + $0x6a0] sm:$0xff] }
 0x2a5   : > { %1681 = vmatprep.mubr.f32.mxu0 %v5372_v10  ;;  %v4169_v31 = vpack.c.bf16 %v2170_v27, %v2164_v22  ;;  %v2200_v27 = vld [vmem:[#allocation10 + $0x790] sm:$0xff] }
 0x2a8   : > { %3818 = vmatmul.mubr.msk.f32.gmra.mrb[36].mxu0 %vm1227_vm6, %v1067_v39  ;;  %v2175_v39 = vld [vmem:[#allocation10 + $0x6c8] sm:$0xff] }
 0x2a9   : > { %1687 = vmatprep.mubr.f32.mxu0 %v5372_v10 }
 0x2ac   : > { %3819 = vmatmul.mubr.msk.f32.gmra.mrb[38].mxu0 %vm1227_vm6, %v1070_v60  ;;  %v2181_v60 = vld [vmem:[#allocation10 + $0x6f8] sm:$0xff] }
 0x2ad   : > { %1693 = vmatprep.mubr.f32.mxu0 %v5372_v10  ;;  %v3979_v37 = vpack.c.bf16 %v2181_v60, %v2175_v39 }
 0x2b0   : > { %3820 = vmatmul.mubr.msk.f32.gmra.mrb[40].mxu0 %vm1227_vm6, %v1073_v15 }
 0x2b1   : > { %1699 = vmatprep.mubr.f32.mxu0 %v5372_v10 }
 0x2b4   : > { %3821 = vmatmul.mubr.msk.f32.gmra.mrb[42].mxu0 %vm1227_vm6, %v1076_v23 }
 0x2b5   : > { %1705 = vmatprep.mubr.f32.mxu0 %v5372_v10 }
 0x2b8   : > { %3822 = vmatmul.mubr.msk.f32.gmra.mrb[44].mxu0 %vm1227_vm6, %v1079_v30 }
 0x2b9   : > { %1711 = vmatprep.mubr.f32.mxu0 %v5372_v10  ;;  %v1110_v10 = vpop.permute.xlu0 %1109 }
 0x2bc   : > { %3823 = vmatmul.mubr.msk.f32.gmra.mrb[46].mxu0 %vm1227_vm6, %v1082_v62 }
 0x2bd   : > { %v1772_v21 = vpop.permute.xlu0 %1771 }
 0x2c1   : > { %v1125_v51 = vpop.permute.xlu0 %1124 }
 0x333   : > { %v1575_v3 = vpop.f32.mrb[0].mxu0 }
 0x334   : > { %v4483_v46 = vadd.f32 %v1575_v3, %v1110_v10  ;;  %v1577_v47 = vpop.f32.mrb[1].mxu0 }
 0x335   : > { %v4484_v40 = vadd.f32 %v1577_v47, %v1110_v10  ;;  %v3981_v10 = vpack.c.bf16 %v2180_v49, %v2174_v32  ;;  %v4173_v47 = vpack.c.bf16 %v2182_v9, %v2176_v8  ;;  %v4181_v8 = vpack.c.bf16 %v2206_v52, %v2200_v27  ;;  %v2212_v9 = vld [vmem:[#allocation10 + $0x7f0] sm:$0xff] }
 0x336   : > { %v1862_v17 = vmul.f32 %v4483_v46, %v1768_v45  ;;  %vm1718_vm8 = vcmp.ge.f32.partialorder %v4483_v46, 0.0 }
 0x337   : > { %v1863_v20 = vmul.f32 %v4484_v40, %v1768_v45  ;;  %v1581_v14 = vpop.f32.mrb[2].mxu0  ;;  %vm1719_vm7 = vcmp.ge.f32.partialorder %v4484_v40, 0.0  ;;  %v6637_v45 = vpop.permute.xlu1 %1791 }
 0x338   : > { %v4485_v7 = vadd.f32 %v1581_v14, %v1115_v29  ;;  %v1583_v6 = vpop.f32.mrb[3].mxu0  ;;  %v6625_v23 = vsel %vm1718_vm8, %v4483_v46, %v1862_v17  ;;  %v2194_v17 = vld [vmem:[#allocation10 + $0x760] sm:$0xff]  ;;  %v2201_v14 = vld [vmem:[#allocation10 + $0x798] sm:$0xff] }
 0x339   : > { %v4486_v38 = vadd.f32 %v1583_v6, %v1115_v29  ;;  %v6620_v43 = vsel %vm1719_vm7, %v4484_v40, %v1863_v20  ;;  %v2192_v40 = vld [vmem:[#allocation10 + $0x750] sm:$0xff]  ;;  %v4177_v22 = vpack.c.bf16 %v2194_v17, %v2188_v58 }
 0x33a   : > { %v1864_v15 = vmul.f32 %v4485_v7, %v1772_v21  ;;  %2598 = vmatprep.mubr.f32.mxu1 %v6620_v43  ;;  %2937 = vmatprep.mubr.f32.mxu0 %v6620_v43  ;;  %vm1720_vm10 = vcmp.ge.f32.partialorder %v4485_v7, 0.0 }
 0x33b   : > { %v1865_v35 = vmul.f32 %v4486_v38, %v1772_v21  ;;  %v1587_v30 = vpop.f32.mrb[4].mxu0  ;;  %2599 = vmatmul.mubr.f32.vlgmr.msra.gmra.mrb[0].mxu1 %v6625_v23  ;;  %2938 = vmatmul.mubr.f32.vlgmr.msra.gmra.mrb[48].mxu0 %v6625_v23  ;;  %vm1721_vm9 = vcmp.ge.f32.partialorder %v4486_v38, 0.0  ;;  %v2207_v21 = vld [vmem:[#allocation10 + $0x7c8] sm:$0xff] }
 0x33c   : > { %v4487_v36 = vadd.f32 %v1587_v30, %v1120_v0  ;;  %3974 = vmatpush1.bf16.msra.mxu1 %v3973_v16  ;;  %4166 = vmatpush1.bf16.msra.mxu0 %v4165_v24  ;;  %v1589_v50 = vpop.f32.mrb[5].mxu0  ;;  %v6635_v28 = vsel %vm1720_vm10, %v4485_v7, %v1864_v15  ;;  %v1784_v16 = vpop.permute.xlu0 %1783  ;;  %v3985_v24 = vpack.c.bf16 %v2192_v40, %v2186_v11 }
 0x33d   : > { %v4488_v56 = vadd.f32 %v1589_v50, %v1120_v0  ;;  %v6629_v59 = vsel %vm1721_vm9, %v4486_v38, %v1865_v35  ;;  %3976 = vmatprep.subr.bf16.mxu1 %v3975_v26  ;;  %4168 = vmatprep.subr.bf16.mxu0 %v4167_v41  ;;  %v3987_v38 = vpack.c.bf16 %v2205_v13, %v2199_v12  ;;  %v2198_v26 = vld [vmem:[#allocation10 + $0x780] sm:$0xff]  ;;  %v2204_v41 = vld [vmem:[#allocation10 + $0x7b0] sm:$0xff]  ;;  %v2217_v35 = vld [vmem:[#allocation10 + $0x818] sm:$0xff] }
 0x33e   : > { %v1866_v62 = vmul.f32 %v4487_v36, %v6610_v1  ;;  %2604 = vmatprep.mubr.f32.mxu1 %v6629_v59  ;;  %2943 = vmatprep.mubr.f32.mxu0 %v6629_v59  ;;  %vm1722_vm12 = vcmp.ge.f32.partialorder %v4487_v36, 0.0  ;;  %v4179_v15 = vpack.c.bf16 %v2207_v21, %v2201_v14  ;;  %v2219_v50 = vld [vmem:[#allocation10 + $0x828] sm:$0xff]  ;;  %v2222_v12 = vld [vmem:[#allocation10 + $0x840] sm:$0xff]  ;;  %v2228_v13 = vld [vmem:[#allocation10 + $0x870] sm:$0xff] }
 0x33f   : > { %v1867_v29 = vmul.f32 %v4488_v56, %v6610_v1  ;;  %v1593_v0 = vpop.f32.mrb[6].mxu0  ;;  %2605 = vmatmul.mubr.f32.gmra.mrb[2].mxu1 %v6635_v28  ;;  %2944 = vmatmul.mubr.f32.gmra.mrb[50].mxu0 %v6635_v28  ;;  %vm1723_vm11 = vcmp.ge.f32.partialorder %v4488_v56, 0.0  ;;  %v4175_v1 = vpack.c.bf16 %v2195_v44, %v2189_v63  ;;  %v2218_v44 = vld [vmem:[#allocation10 + $0x820] sm:$0xff]  ;;  %v3997_v27 = vpack.c.bf16 %v2228_v13, %v2222_v12 }
 0x340   : > { %v4489_v3 = vadd.f32 %v1593_v0, %v1125_v51  ;;  %3978 = vmatpush1.bf16.msra.mxu1 %v3977_v53  ;;  %4170 = vmatpush1.bf16.msra.mxu0 %v4169_v31  ;;  %v1595_v46 = vpop.f32.mrb[7].mxu0  ;;  %v6648_v20 = vsel %vm1722_vm12, %v4487_v36, %v1866_v62  ;;  %v2213_v36 = vld [vmem:[#allocation10 + $0x7f8] sm:$0xff]  ;;  %v1140_v62 = vpop.permute.xlu0 %1139 }
 0x341   : > { %v4490_v4 = vadd.f32 %v1595_v46, %v1125_v51  ;;  %v6642_v5 = vsel %vm1723_vm11, %v4488_v56, %v1867_v29  ;;  %3980 = vmatprep.subr.bf16.mxu1 %v3979_v37  ;;  %4172 = vmatprep.subr.bf16.mxu0 %v4171_v54  ;;  %v3989_v37 = vpack.c.bf16 %v2204_v41, %v2198_v26  ;;  %v2210_v51 = vld [vmem:[#allocation10 + $0x7e0] sm:$0xff]  ;;  %v2216_v54 = vld [vmem:[#allocation10 + $0x810] sm:$0xff]  ;;  %v2223_v29 = vld [vmem:[#allocation10 + $0x848] sm:$0xff] }
 0x342   : > { %v1868_v18 = vmul.f32 %v4489_v3, %v6612_v33  ;;  %2610 = vmatprep.mubr.f32.mxu1 %v6642_v5  ;;  %2949 = vmatprep.mubr.f32.mxu0 %v6642_v5  ;;  %vm1724_vm14 = vcmp.ge.f32.partialorder %v4489_v3, 0.0  ;;  %v3991_v56 = vpack.c.bf16 %v2217_v35, %v2211_v34  ;;  %v4183_v63 = vpack.c.bf16 %v2219_v50, %v2213_v36  ;;  %v2229_v0 = vld [vmem:[#allocation10 + $0x878] sm:$0xff]  ;;  %v2234_v35 = vld [vmem:[#allocation10 + $0x8a0] sm:$0xff]  ;;  %v2236_v36 = vld [vmem:[#allocation10 + $0x8b0] sm:$0xff] }
 0x343   : > { %v1869_v7 = vmul.f32 %v4490_v4, %v6612_v33  ;;  %v1599_v6 = vpop.f32.mrb[8].mxu0  ;;  %2611 = vmatmul.mubr.f32.gmra.mrb[4].mxu1 %v6648_v20  ;;  %2950 = vmatmul.mubr.f32.gmra.mrb[52].mxu0 %v6648_v20  ;;  %vm1725_vm13 = vcmp.ge.f32.partialorder %v4490_v4, 0.0  ;;  %v6654_v33 = vpop.permute.xlu1 %1144  ;;  %v2225_v46 = vld [vmem:[#allocation10 + $0x858] sm:$0xff]  ;;  %v3993_v40 = vpack.c.bf16 %v2216_v54, %v2210_v51  ;;  %v3995_v17 = vpack.c.bf16 %v2229_v0, %v2223_v29  ;;  %v2255_v54 = vld [vmem:[#allocation10 + $0x948] sm:$0xff]  ;;  %v2246_v29 = vld [vmem:[#allocation10 + $0x900] sm:$0xff] }
 0x344   : > { %v4491_v25 = vadd.f32 %v1599_v6, %v6614_v2  ;;  %3982 = vmatpush1.bf16.msra.mxu1 %v3981_v10  ;;  %4174 = vmatpush1.bf16.msra.mxu0 %v4173_v47  ;;  %v1601_v19 = vpop.f32.mrb[9].mxu0  ;;  %v6662_v53 = vsel %vm1724_vm14, %v4489_v3, %v1868_v18  ;;  %v2224_v18 = vld [vmem:[#allocation10 + $0x850] sm:$0xff]  ;;  %v2235_v6 = vld [vmem:[#allocation10 + $0x8a8] sm:$0xff]  ;;  %v1796_v41 = vpop.permute.xlu0 %1795  ;;  %v2249_v51 = vld [vmem:[#allocation10 + $0x918] sm:$0xff] }
 0x345   : > { %v4492_v39 = vadd.f32 %v1601_v19, %v6614_v2  ;;  %v6657_v60 = vsel %vm1725_vm13, %v4490_v4, %v1869_v7  ;;  %3984 = vmatprep.subr.bf16.mxu1 %v3983_v57  ;;  %4176 = vmatprep.subr.bf16.mxu0 %v4175_v1  ;;  %v4185_v1 = vpack.c.bf16 %v2218_v44, %v2212_v9  ;;  %v2230_v7 = vld [vmem:[#allocation10 + $0x880] sm:$0xff]  ;;  %v2237_v19 = vld [vmem:[#allocation10 + $0x8b8] sm:$0xff]  ;;  %v2252_v0 = vld [vmem:[#allocation10 + $0x930] sm:$0xff] }
 0x346   : > { %v1870_v30 = vmul.f32 %v4491_v25, %v1784_v16  ;;  %2616 = vmatprep.mubr.f32.mxu1 %v6657_v60  ;;  %2955 = vmatprep.mubr.f32.mxu0 %v6657_v60  ;;  %vm1726_vm0 = vcmp.ge.f32.partialorder %v4491_v25, 0.0  ;;  %v4189_v52 = vpack.c.bf16 %v2230_v7, %v2224_v18 }
 0x347   : > { %v1871_v31 = vmul.f32 %v4492_v39, %v1784_v16  ;;  %v1605_v2 = vpop.f32.mrb[10].mxu0  ;;  %2617 = vmatmul.mubr.f32.gmra.mrb[6].mxu1 %v6662_v53  ;;  %2956 = vmatmul.mubr.f32.gmra.mrb[54].mxu0 %v6662_v53  ;;  %vm1727_vm15 = vcmp.ge.f32.partialorder %v4492_v39, 0.0  ;;  %v6676_v47 = vpop.permute.xlu1 %1149  ;;  %v2241_v16 = vld [vmem:[#allocation10 + $0x8d8] sm:$0xff] }
 0x348   : > { %v4493_v32 = vadd.f32 %v1605_v2, %v6616_v48  ;;  %3986 = vmatpush1.bf16.msra.mxu1 %v3985_v24  ;;  %4178 = vmatpush1.bf16.msra.mxu0 %v4177_v22  ;;  %v1607_v49 = vpop.f32.mrb[11].mxu0  ;;  %v6674_v3 = vsel %vm1726_vm0, %v4491_v25, %v1870_v30  ;;  %v2243_v22 = vld [vmem:[#allocation10 + $0x8e8] sm:$0xff]  ;;  %v3999_v34 = vpack.c.bf16 %v2241_v16, %v2235_v6  ;;  %v2240_v30 = vld [vmem:[#allocation10 + $0x8d0] sm:$0xff]  ;;  %v2258_v6 = vld [vmem:[#allocation10 + $0x960] sm:$0xff] }
 0x349   : > { %v4494_v55 = vadd.f32 %v1607_v49, %v6616_v48  ;;  %v6668_v61 = vsel %vm1727_vm15, %v4492_v39, %v1871_v31  ;;  %3988 = vmatprep.subr.bf16.mxu1 %v3987_v38  ;;  %4180 = vmatprep.subr.bf16.mxu0 %v4179_v15  ;;  %v2231_v48 = vld [vmem:[#allocation10 + $0x888] sm:$0xff]  ;;  %v4191_v2 = vpack.c.bf16 %v2243_v22, %v2237_v19  ;;  %v2253_v49 = vld [vmem:[#allocation10 + $0x938] sm:$0xff]  ;;  %v2264_v16 = vld [vmem:[#allocation10 + $0x990] sm:$0xff] }
 0x34a   : > { %v1872_v10 = vmul.f32 %v4493_v32, %v6618_v42  ;;  %2622 = vmatprep.mubr.f32.mxu1 %v6668_v61  ;;  %2961 = vmatprep.mubr.f32.mxu0 %v6668_v61  ;;  %vm1728_vm2 = vcmp.ge.f32.partialorder %v4493_v32, 0.0 }
 0x34b   : > { %v1873_v57 = vmul.f32 %v4494_v55, %v6618_v42  ;;  %v1611_v11 = vpop.f32.mrb[12].mxu0  ;;  %2623 = vmatmul.mubr.f32.gmra.mrb[8].mxu1 %v6674_v3  ;;  %2962 = vmatmul.mubr.f32.gmra.mrb[56].mxu0 %v6674_v3  ;;  %vm1729_vm1 = vcmp.ge.f32.partialorder %v4494_v55, 0.0  ;;  %v4187_v42 = vpack.c.bf16 %v2231_v48, %v2225_v46  ;;  %v4195_v48 = vpack.c.bf16 %v2255_v54, %v2249_v51  ;;  %v2283_v51 = vld [vmem:[#allocation10 + $0xa28] sm:$0xff]  ;;  %v2289_v54 = vld [vmem:[#allocation10 + $0xa58] sm:$0xff] }
 0x34c   : > { %v4495_v58 = vadd.f32 %v1611_v11, %v1140_v62  ;;  %3990 = vmatpush1.bf16.msra.mxu1 %v3989_v37  ;;  %4182 = vmatpush1.bf16.msra.mxu0 %v4181_v8  ;;  %v1613_v4 = vpop.f32.mrb[13].mxu0  ;;  %v6687_v25 = vsel %vm1728_vm2, %v4493_v32, %v1872_v10  ;;  %v2242_v37 = vld [vmem:[#allocation10 + $0x8e0] sm:$0xff]  ;;  %v2247_v32 = vld [vmem:[#allocation10 + $0x908] sm:$0xff] }
 0x34d   : > { %v4496_v14 = vadd.f32 %v1613_v4, %v1140_v62  ;;  %v6681_v21 = vsel %vm1729_vm1, %v4494_v55, %v1873_v57  ;;  %3992 = vmatprep.subr.bf16.mxu1 %v3991_v56  ;;  %4184 = vmatprep.subr.bf16.mxu0 %v4183_v63  ;;  %v4001_v62 = vpack.c.bf16 %v2240_v30, %v2234_v35  ;;  %v2248_v57 = vld [vmem:[#allocation10 + $0x910] sm:$0xff]  ;;  %v2254_v11 = vld [vmem:[#allocation10 + $0x940] sm:$0xff]  ;;  %v2265_v4 = vld [vmem:[#allocation10 + $0x998] sm:$0xff] }
 0x34e   : > { %v1874_v24 = vmul.f32 %v4495_v58, %v6637_v45  ;;  %2628 = vmatprep.mubr.f32.mxu1 %v6681_v21  ;;  %2967 = vmatprep.mubr.f32.mxu0 %v6681_v21  ;;  %vm1730_vm4 = vcmp.ge.f32.partialorder %v4495_v58, 0.0  ;;  %v4193_v63 = vpack.c.bf16 %v2242_v37, %v2236_v36  ;;  %v4003_v44 = vpack.c.bf16 %v2253_v49, %v2247_v32  ;;  %v2270_v36 = vld [vmem:[#allocation10 + $0x9c0] sm:$0xff]  ;;  %v2272_v49 = vld [vmem:[#allocation10 + $0x9d0] sm:$0xff] }
 0x34f   : > { %v1875_v38 = vmul.f32 %v4496_v14, %v6637_v45  ;;  %v1617_v26 = vpop.f32.mrb[14].mxu0  ;;  %2629 = vmatmul.mubr.f32.gmra.mrb[10].mxu1 %v6687_v25  ;;  %2968 = vmatmul.mubr.f32.gmra.mrb[58].mxu0 %v6687_v25  ;;  %vm1731_vm3 = vcmp.ge.f32.partialorder %v4496_v14, 0.0  ;;  %v6693_v45 = vpop.permute.xlu1 %1799  ;;  %v4197_v7 = vpack.c.bf16 %v2254_v11, %v2248_v57  ;;  %v4009_v35 = vpack.c.bf16 %v2264_v16, %v2258_v6  ;;  %v2284_v11 = vld [vmem:[#allocation10 + $0xa30] sm:$0xff] }
 0x350   : > { %v4497_v39 = vadd.f32 %v1617_v26, %v6654_v33  ;;  %3994 = vmatpush1.bf16.msra.mxu1 %v3993_v40  ;;  %4186 = vmatpush1.bf16.msra.mxu0 %v4185_v1  ;;  %v1619_v15 = vpop.f32.mrb[15].mxu0  ;;  %v6701_v56 = vsel %vm1730_vm4, %v4495_v58, %v1874_v24  ;;  %v2259_v40 = vld [vmem:[#allocation10 + $0x968] sm:$0xff]  ;;  %v2261_v1 = vld [vmem:[#allocation10 + $0x978] sm:$0xff]  ;;  %v2266_v26 = vld [vmem:[#allocation10 + $0x9a0] sm:$0xff] }
 0x351   : > { %v4498_v50 = vadd.f32 %v1619_v15, %v6654_v33  ;;  %v6696_v31 = vsel %vm1731_vm3, %v4496_v14, %v1875_v38  ;;  %3996 = vmatprep.subr.bf16.mxu1 %v3995_v17  ;;  %4188 = vmatprep.subr.bf16.mxu0 %v4187_v42  ;;  %7390 = vst [vmem:[#allocation28_spill] sm:$0xff] %v6701_v56  ;;  %v2267_v17 = vld [vmem:[#allocation10 + $0x9a8] sm:$0xff]  ;;  %v2260_v38 = vld [vmem:[#allocation10 + $0x970] sm:$0xff] }
 0x352   : > { %v1876_v8 = vmul.f32 %v4497_v39, %v1796_v41  ;;  %2634 = vmatprep.mubr.f32.mxu1 %v6696_v31  ;;  %2973 = vmatprep.mubr.f32.mxu0 %v6696_v31  ;;  %vm1732_vm6 = vcmp.ge.f32.partialorder %v4497_v39, 0.0  ;;  %v4005_v42 = vpack.c.bf16 %v2252_v0, %v2246_v29  ;;  %v4007_v19 = vpack.c.bf16 %v2265_v4, %v2259_v40  ;;  %v2279_v15 = vld [vmem:[#allocation10 + $0xa08] sm:$0xff]  ;;  %v2282_v0 = vld [vmem:[#allocation10 + $0xa20] sm:$0xff] }
 0x353   : > { %v1877_v9 = vmul.f32 %v4498_v50, %v1796_v41  ;;  %v6703_v33 = vpop.f32.mrb[16].mxu0  ;;  %2635 = vmatmul.mubr.f32.gmra.mrb[12].mxu1 %v6701_v56  ;;  %2974 = vmatmul.mubr.f32.gmra.mrb[60].mxu0 %v6701_v56  ;;  %vm1733_vm5 = vcmp.ge.f32.partialorder %v4498_v50, 0.0  ;;  %v6715_v12 = vpop.permute.xlu1 %1803  ;;  %v4199_v22 = vpack.c.bf16 %v2267_v17, %v2261_v1  ;;  %v2271_v41 = vld [vmem:[#allocation10 + $0x9c8] sm:$0xff]  ;;  %v4201_v30 = vpack.c.bf16 %v2266_v26, %v2260_v38  ;;  %v2290_v40 = vld [vmem:[#allocation10 + $0xa60] sm:$0xff]  ;;  %v2301_v1 = vld [vmem:[#allocation10 + $0xab8] sm:$0xff] }
 0x354   : > { %3998 = vmatpush1.bf16.msra.mxu1 %v3997_v27  ;;  %4190 = vmatpush1.bf16.msra.mxu0 %v4189_v52  ;;  %v1625_v55 = vpop.f32.mrb[17].mxu0  ;;  %v6713_v58 = vsel %vm1732_vm6, %v4497_v39, %v1876_v8  ;;  %v2277_v27 = vld [vmem:[#allocation10 + $0x9f8] sm:$0xff]  ;;  %v2278_v8 = vld [vmem:[#allocation10 + $0xa00] sm:$0xff]  ;;  %v2295_v4 = vld [vmem:[#allocation10 + $0xa88] sm:$0xff] }
 0x355   : > { %v4500_v10 = vadd.f32 %v1625_v55, %v6676_v47  ;;  %v6708_v46 = vsel %vm1733_vm5, %v4498_v50, %v1877_v9  ;;  %4000 = vmatprep.subr.bf16.mxu1 %v3999_v34  ;;  %4192 = vmatprep.subr.bf16.mxu0 %v4191_v2  ;;  %7392 = vst [vmem:[#allocation30_spill] sm:$0xff] %v6713_v58  ;;  %v2273_v39 = vld [vmem:[#allocation10 + $0x9d8] sm:$0xff]  ;;  %v2276_v50 = vld [vmem:[#allocation10 + $0x9f0] sm:$0xff]  ;;  %v2291_v55 = vld [vmem:[#allocation10 + $0xa68] sm:$0xff] }
 0x356   : > { %7391 = vst [vmem:[#allocation29_spill] sm:$0xff] %v6708_v46  ;;  %2640 = vmatprep.mubr.f32.mxu1 %v6708_v46  ;;  %2979 = vmatprep.mubr.f32.mxu0 %v6708_v46  ;;  %v4011_v37 = vpack.c.bf16 %v2277_v27, %v2271_v41  ;;  %v4203_v32 = vpack.c.bf16 %v2279_v15, %v2273_v39  ;;  %v2285_v9 = vld [vmem:[#allocation10 + $0xa38] sm:$0xff]  ;;  %v2300_v38 = vld [vmem:[#allocation10 + $0xab0] sm:$0xff]  ;;  %v2302_v39 = vld [vmem:[#allocation10 + $0xac0] sm:$0xff] }
 0x357   : > { %v1879_v13 = vmul.f32 %v4500_v10, %v6693_v45  ;;  %v6718_v18 = vpop.f32.mrb[18].mxu0  ;;  %2641 = vmatmul.mubr.f32.gmra.mrb[14].mxu1 %v6713_v58  ;;  %2980 = vmatmul.mubr.f32.gmra.mrb[62].mxu0 %v6713_v58  ;;  %vm1735_vm7 = vcmp.ge.f32.partialorder %v4500_v10, 0.0  ;;  %v6732_v2 = vpop.permute.xlu1 %1159  ;;  %v4205_v29 = vpack.c.bf16 %v2278_v8, %v2272_v49  ;;  %v4207_v57 = vpack.c.bf16 %v2291_v55, %v2285_v9  ;;  %v2297_v17 = vld [vmem:[#allocation10 + $0xa98] sm:$0xff]  ;;  %v2296_v27 = vld [vmem:[#allocation10 + $0xa90] sm:$0xff]  ;;  %v2307_v15 = vld [vmem:[#allocation10 + $0xae8] sm:$0xff] }
 0x358   : > { %4002 = vmatpush1.bf16.msra.mxu1 %v4001_v62  ;;  %4194 = vmatpush1.bf16.msra.mxu0 %v4193_v63  ;;  %v6722_v14 = vpop.f32.mrb[19].mxu0  ;;  %v4019_v26 = vpack.c.bf16 %v2301_v1, %v2295_v4  ;;  %v4213_v49 = vpack.c.bf16 %v2302_v39, %v2296_v27  ;;  %v2306_v8 = vld [vmem:[#allocation10 + $0xae0] sm:$0xff]  ;;  %v2333_v27 = vld [vmem:[#allocation10 + $0xbb8] sm:$0xff]  ;;  %v2339_v39 = vld [vmem:[#allocation10 + $0xbe8] sm:$0xff] }
 0x359   : > { %4004 = vmatprep.subr.bf16.mxu1 %v4003_v44  ;;  %v6724_v24 = vsel %vm1735_vm7, %v4500_v10, %v1879_v13  ;;  %4196 = vmatprep.subr.bf16.mxu0 %v4195_v48  ;;  %v4013_v44 = vpack.c.bf16 %v2276_v50, %v2270_v36  ;;  %v2288_v10 = vld [vmem:[#allocation10 + $0xa50] sm:$0xff]  ;;  %v4015_v48 = vpack.c.bf16 %v2289_v54, %v2283_v51  ;;  %v2303_v13 = vld [vmem:[#allocation10 + $0xac8] sm:$0xff]  ;;  %v2369_v46 = vld [vmem:[#allocation10 + $0xcd8] sm:$0xff] }
 0x35a   : > { %7393 = vst [vmem:[#allocation31_spill] sm:$0xff] %v6724_v24  ;;  %2711 = vmatprep.mubr.f32.mxu1 %v6724_v24  ;;  %3050 = vmatprep.mubr.f32.mxu0 %v6724_v24  ;;  %v4017_v16 = vpack.c.bf16 %v2288_v10, %v2282_v0  ;;  %v4211_v41 = vpack.c.bf16 %v2303_v13, %v2297_v17  ;;  %v2315_v36 = vld [vmem:[#allocation10 + $0xb28] sm:$0xff]  ;;  %v2312_v51 = vld [vmem:[#allocation10 + $0xb10] sm:$0xff]  ;;  %v2325_v10 = vld [vmem:[#allocation10 + $0xb78] sm:$0xff] }
 0x35b   : > { %v6728_v52 = vpop.f32.mrb[20].mxu0  ;;  %v2319_v0 = vld [vmem:[#allocation10 + $0xb48] sm:$0xff]  ;;  %v4025_v4 = vpack.c.bf16 %v2312_v51, %v2306_v8  ;;  %v2318_v17 = vld [vmem:[#allocation10 + $0xb40] sm:$0xff]  ;;  %v2324_v13 = vld [vmem:[#allocation10 + $0xb70] sm:$0xff] }
 0x35c   : > { %4006 = vmatpush1.bf16.msra.mxu1 %v4005_v42  ;;  %4198 = vmatpush1.bf16.msra.mxu0 %v4197_v7  ;;  %v6730_v34 = vpop.f32.mrb[21].mxu0  ;;  %v6738_v42 = vpop.permute.xlu1 %1164  ;;  %v2330_v8 = vld [vmem:[#allocation10 + $0xba0] sm:$0xff]  ;;  %v2336_v51 = vld [vmem:[#allocation10 + $0xbd0] sm:$0xff] }
 0x35d   : > { %4008 = vmatprep.subr.bf16.mxu1 %v4007_v19  ;;  %4200 = vmatprep.subr.bf16.mxu0 %v4199_v22  ;;  %v4209_v19 = vpack.c.bf16 %v2290_v40, %v2284_v11  ;;  %v2294_v22 = vld [vmem:[#allocation10 + $0xa80] sm:$0xff] }
 0x35f   : > { %v6734_v62 = vpop.f32.mrb[22].mxu0 }
 0x360   : > { %4010 = vmatpush1.bf16.msra.mxu1 %v4009_v35  ;;  %4202 = vmatpush1.bf16.msra.mxu0 %v4201_v30  ;;  %v6736_v63 = vpop.f32.mrb[23].mxu0  ;;  %v2313_v35 = vld [vmem:[#allocation10 + $0xb18] sm:$0xff]  ;;  %v6748_v54 = vpop.permute.xlu1 %1811  ;;  %v6815_v56 = vadd.f32 %v6734_v62, %v6738_v42 }
 0x361   : > { %4012 = vmatprep.subr.bf16.mxu1 %v4011_v37  ;;  %4204 = vmatprep.subr.bf16.mxu0 %v4203_v32  ;;  %v2309_v30 = vld [vmem:[#allocation10 + $0xaf8] sm:$0xff]  ;;  %v4021_v32 = vpack.c.bf16 %v2300_v38, %v2294_v22  ;;  %v4023_v9 = vpack.c.bf16 %v2313_v35, %v2307_v15  ;;  %v2320_v22 = vld [vmem:[#allocation10 + $0xb50] sm:$0xff]  ;;  %v2326_v38 = vld [vmem:[#allocation10 + $0xb80] sm:$0xff] }
 0x362   : > { %v4215_v55 = vpack.c.bf16 %v2315_v36, %v2309_v30  ;;  %v1155_v30 = vpop.permute.xlu0 %1154  ;;  %vm1740_vm14 = vcmp.ge.f32.partialorder %v6815_v56, 0.0 }
 0x363   : > { %v6740_v7 = vpop.f32.mrb[24].mxu0 }
 0x364   : > { %4014 = vmatpush1.bf16.msra.mxu1 %v4013_v44  ;;  %4206 = vmatpush1.bf16.msra.mxu0 %v4205_v29  ;;  %v6742_v6 = vpop.f32.mrb[25].mxu0  ;;  %v2308_v44 = vld [vmem:[#allocation10 + $0xaf0] sm:$0xff]  ;;  %v2314_v29 = vld [vmem:[#allocation10 + $0xb20] sm:$0xff]  ;;  %v6754_v15 = vpop.permute.xlu1 %1815 }
 0x365   : > { %4016 = vmatprep.subr.bf16.mxu1 %v4015_v48  ;;  %4208 = vmatprep.subr.bf16.mxu0 %v4207_v57  ;;  %v2321_v48 = vld [vmem:[#allocation10 + $0xb58] sm:$0xff]  ;;  %v2327_v57 = vld [vmem:[#allocation10 + $0xb88] sm:$0xff]  ;;  %v4217_v1 = vpack.c.bf16 %v2314_v29, %v2308_v44  ;;  %v2332_v44 = vld [vmem:[#allocation10 + $0xbb0] sm:$0xff] }
 0x366   : > { %v2338_v29 = vld [vmem:[#allocation10 + $0xbe0] sm:$0xff] }
 0x367   : > { %v6744_v50 = vpop.f32.mrb[26].mxu0 }
 0x368   : > { %4018 = vmatpush1.bf16.msra.mxu1 %v4017_v16  ;;  %4210 = vmatpush1.bf16.msra.mxu0 %v4209_v19  ;;  %v6746_v37 = vpop.f32.mrb[27].mxu0  ;;  %v4027_v16 = vpack.c.bf16 %v2325_v10, %v2319_v0  ;;  %v4219_v19 = vpack.c.bf16 %v2327_v57, %v2321_v48  ;;  %v2343_v0 = vld [vmem:[#allocation10 + $0xc08] sm:$0xff]  ;;  %v4499_v10 = vadd.f32 %v6703_v33, %v6676_v47  ;;  %v2349_v48 = vld [vmem:[#allocation10 + $0xc38] sm:$0xff]  ;;  %v2342_v47 = vld [vmem:[#allocation10 + $0xc00] sm:$0xff] }
 0x369   : > { %4020 = vmatprep.subr.bf16.mxu1 %v4019_v26  ;;  %4212 = vmatprep.subr.bf16.mxu0 %v4211_v41  ;;  %v2331_v26 = vld [vmem:[#allocation10 + $0xba8] sm:$0xff]  ;;  %v2337_v41 = vld [vmem:[#allocation10 + $0xbd8] sm:$0xff]  ;;  %v2348_v33 = vld [vmem:[#allocation10 + $0xc30] sm:$0xff] }
 0x36a   : > { %v2345_v57 = vld [vmem:[#allocation10 + $0xc18] sm:$0xff]  ;;  %vm1734_vm8 = vcmp.ge.f32.partialorder %v4499_v10, 0.0 }
 0x36b   : > { %v6750_v11 = vpop.f32.mrb[28].mxu0 }
 0x36c   : > { %4022 = vmatpush1.bf16.msra.mxu1 %v4021_v32  ;;  %4214 = vmatpush1.bf16.msra.mxu0 %v4213_v49  ;;  %v6752_v40 = vpop.f32.mrb[29].mxu0  ;;  %v4029_v32 = vpack.c.bf16 %v2324_v13, %v2318_v17  ;;  %v4221_v49 = vpack.c.bf16 %v2326_v38, %v2320_v22  ;;  %v4033_v13 = vpack.c.bf16 %v2336_v51, %v2330_v8 }
 0x36d   : > { %4024 = vmatprep.subr.bf16.mxu1 %v4023_v9  ;;  %4216 = vmatprep.subr.bf16.mxu0 %v4215_v55  ;;  %v4031_v9 = vpack.c.bf16 %v2337_v41, %v2331_v26  ;;  %v4223_v55 = vpack.c.bf16 %v2339_v39, %v2333_v27  ;;  %v4035_v22 = vpack.c.bf16 %v2349_v48, %v2343_v0  ;;  %v2344_v26 = vld [vmem:[#allocation10 + $0xc10] sm:$0xff]  ;;  %v2350_v27 = vld [vmem:[#allocation10 + $0xc40] sm:$0xff]  ;;  %v2355_v39 = vld [vmem:[#allocation10 + $0xc68] sm:$0xff] }
 0x36e   : > { %v1878_v41 = vmul.f32 %v4499_v10, %v6693_v45  ;;  %v6774_v8 = vadd.f32 %v6730_v34, %v6732_v2  ;;  %v4229_v0 = vpack.c.bf16 %v2350_v27, %v2344_v26  ;;  %v2362_v34 = vld [vmem:[#allocation10 + $0xca0] sm:$0xff]  ;;  %v6795_v27 = vadd.f32 %v6736_v63, %v6738_v42 }
 0x36f   : > { %v6756_v35 = vpop.f32.mrb[30].mxu0 }
 0x370   : > { %4026 = vmatpush1.bf16.msra.mxu1 %v4025_v4  ;;  %4218 = vmatpush1.bf16.msra.mxu0 %v4217_v1  ;;  %v6758_v36 = vpop.f32.mrb[31].mxu0  ;;  %v2351_v4 = vld [vmem:[#allocation10 + $0xc48] sm:$0xff]  ;;  %v4502_v1 = vadd.f32 %v6722_v14, %v1155_v30  ;;  %v4501_v14 = vadd.f32 %v6718_v18, %v1155_v30  ;;  %v4037_v18 = vpack.c.bf16 %v2348_v33, %v2342_v47  ;;  %v2354_v30 = vld [vmem:[#allocation10 + $0xc60] sm:$0xff]  ;;  %v2373_v33 = vld [vmem:[#allocation10 + $0xcf8] sm:$0xff]  ;;  %vm1739_vm11 = vcmp.ge.f32.partialorder %v6774_v8, 0.0 }
 0x371   : > { %4028 = vmatprep.subr.bf16.mxu1 %v4027_v16  ;;  %4220 = vmatprep.subr.bf16.mxu0 %v4219_v19  ;;  %v4225_v16 = vpack.c.bf16 %v2338_v29, %v2332_v44  ;;  %v6767_v19 = vpop.permute.xlu1 %1174  ;;  %v4227_v38 = vpack.c.bf16 %v2351_v4, %v2345_v57  ;;  %v1808_v44 = vpop.permute.xlu0 %1807  ;;  %v2360_v29 = vld [vmem:[#allocation10 + $0xc90] sm:$0xff]  ;;  %v6780_v4 = vld [vmem:[#allocation10 + $0xcc8] sm:$0xff]  ;;  %v6783_v58 = vsel %vm1734_vm8, %v4499_v10, %v1878_v41  ;;  %v2366_v41 = vld [vmem:[#allocation10 + $0xcc0] sm:$0xff]  ;;  %vm1741_vm13 = vcmp.ge.f32.partialorder %v6795_v27, 0.0 }
 0x372   : > { %vm1737_vm9 = vcmp.ge.f32.partialorder %v4502_v1, 0.0  ;;  %v2356_v57 = vld [vmem:[#allocation10 + $0xc70] sm:$0xff]  ;;  %7394 = vst [vmem:[#allocation32_spill] sm:$0xff] %v6783_v58  ;;  %v1883_v26 = vmul.f32 %v6774_v8, %v1808_v44  ;;  %vm1736_vm10 = vcmp.ge.f32.partialorder %v4501_v14, 0.0  ;;  %v4041_v63 = vpack.c.bf16 %v2360_v29, %v2354_v30  ;;  %v2385_v29 = vld [vmem:[#allocation10 + $0xd58] sm:$0xff] }
 0x373   : > { %v6763_v24 = vpop.f32.mrb[32].mxu0 }
 0x374   : > { %4030 = vmatpush1.bf16.msra.mxu1 %v4029_v32  ;;  %4222 = vmatpush1.bf16.msra.mxu0 %v4221_v49  ;;  %v6765_v17 = vpop.f32.mrb[33].mxu0  ;;  %v2361_v32 = vld [vmem:[#allocation10 + $0xc98] sm:$0xff]  ;;  %v1881_v49 = vmul.f32 %v4502_v1, %v6715_v12  ;;  %v6832_v42 = vsel %vm1739_vm11, %v6774_v8, %v1883_v26  ;;  %v6843_v26 = vld [vmem:[#allocation10 + $0xd88] sm:$0xff] }
 0x375   : > { %4032 = vmatprep.subr.bf16.mxu1 %v4031_v9  ;;  %4224 = vmatprep.subr.bf16.mxu0 %v4223_v55  ;;  %v2357_v9 = vld [vmem:[#allocation10 + $0xc78] sm:$0xff]  ;;  %v2363_v55 = vld [vmem:[#allocation10 + $0xca8] sm:$0xff]  ;;  %v4039_v48 = vpack.c.bf16 %v2361_v32, %v2355_v39  ;;  %v2372_v39 = vld [vmem:[#allocation10 + $0xcf0] sm:$0xff]  ;;  %v4233_v32 = vpack.c.bf16 %v2362_v34, %v2356_v57  ;;  %7395 = vst [vmem:[#allocation33_spill] sm:$0xff] %v6832_v42 }
 0x376   : > { %v4231_v47 = vpack.c.bf16 %v2363_v55, %v2357_v9  ;;  %v4043_v9 = vpack.c.bf16 %v2373_v33, %v6780_v4  ;;  %v2374_v55 = vld [vmem:[#allocation10 + $0xd00] sm:$0xff]  ;;  %v2387_v57 = vld [vmem:[#allocation10 + $0xd68] sm:$0xff]  ;;  %v2380_v33 = vld [vmem:[#allocation10 + $0xd30] sm:$0xff] }
 0x377   : > { %v6776_v51 = vpop.f32.mrb[34].mxu0 }
 0x378   : > { %4034 = vmatpush1.bf16.msra.mxu1 %v4033_v13  ;;  %4226 = vmatpush1.bf16.msra.mxu0 %v4225_v16  ;;  %v6778_v45 = vpop.f32.mrb[35].mxu0  ;;  %v1880_v13 = vmul.f32 %v4501_v14, %v6715_v12  ;;  %v6788_v16 = vadd.f32 %v6728_v52, %v6732_v2  ;;  %v6802_v52 = vsel %vm1737_vm9, %v4502_v1, %v1881_v49  ;;  %v1170_v2 = vpop.permute.xlu0 %1169  ;;  %v2368_v49 = vld [vmem:[#allocation10 + $0xcd0] sm:$0xff] }
 0x379   : > { %4036 = vmatprep.subr.bf16.mxu1 %v4035_v22  ;;  %4228 = vmatprep.subr.bf16.mxu0 %v4227_v38  ;;  %v2375_v22 = vld [vmem:[#allocation10 + $0xd08] sm:$0xff]  ;;  %v6790_v38 = vpop.permute.xlu1 %1179  ;;  %v6823_v34 = vadd.f32 %v6742_v6, %v1170_v2  ;;  %v4045_v6 = vpack.c.bf16 %v2372_v39, %v2366_v41  ;;  %v6848_v41 = vadd.f32 %v6740_v7, %v1170_v2 }
 0x37a   : > { %v4235_v1 = vpack.c.bf16 %v2375_v22, %v2369_v46  ;;  %v6818_v30 = vsel %vm1736_vm10, %v4501_v14, %v1880_v13  ;;  %v1885_v46 = vmul.f32 %v6795_v27, %v6748_v54  ;;  %vm1738_vm12 = vcmp.ge.f32.partialorder %v6788_v16, 0.0  ;;  %v2386_v22 = vld [vmem:[#allocation10 + $0xd60] sm:$0xff] }
 0x37b   : > { %2712 = vmatmul.mubr.f32.vlgmr.msra.gmra.mrb[0].mxu1 %v6783_v58  ;;  %3051 = vmatmul.mubr.f32.vlgmr.msra.gmra.mrb[48].mxu0 %v6783_v58  ;;  %v6799_v12 = vpop.f32.mrb[36].mxu0  ;;  %v6810_v58 = vld [vmem:[#allocation10 + $0xd28] sm:$0xff]  ;;  %v4237_v13 = vpack.c.bf16 %v2374_v55, %v2368_v49  ;;  %v1887_v55 = vmul.f32 %v6823_v34, %v6754_v15  ;;  %vm1743_vm15 = vcmp.ge.f32.partialorder %v6823_v34, 0.0  ;;  %vm1742_vm0 = vcmp.ge.f32.partialorder %v6848_v41, 0.0 }
 0x37c   : > { %2717 = vmatprep.mubr.f32.mxu1 %v6802_v52  ;;  %4038 = vmatpush1.bf16.msra.mxu1 %v4037_v18  ;;  %v6805_v10 = vpop.f32.mrb[37].mxu0  ;;  %v1882_v18 = vmul.f32 %v6788_v16, %v1808_v44  ;;  %v2378_v44 = vld [vmem:[#allocation10 + $0xd20] sm:$0xff]  ;;  %v4047_v8 = vpack.c.bf16 %v2385_v29, %v6810_v58  ;;  %v2393_v58 = vld [vmem:[#allocation10 + $0xd98] sm:$0xff]  ;;  %v2399_v49 = vld [vmem:[#allocation10 + $0xdc8] sm:$0xff]  ;;  %v6859_v29 = vadd.f32 %v6746_v37, %v6767_v19 }
 0x37d   : > { %3056 = vmatprep.mubr.f32.mxu0 %v6802_v52  ;;  %4230 = vmatpush1.bf16.msra.mxu0 %v4229_v0  ;;  %v2381_v0 = vld [vmem:[#allocation10 + $0xd38] sm:$0xff]  ;;  %v6839_v4 = vpop.permute.xlu1 %1823 }
 0x37e   : > { %4040 = vmatprep.subr.bf16.mxu1 %v4039_v48  ;;  %4232 = vmatprep.subr.bf16.mxu0 %v4231_v47  ;;  %v2384_v48 = vld [vmem:[#allocation10 + $0xd50] sm:$0xff]  ;;  %v4239_v47 = vpack.c.bf16 %v2387_v57, %v2381_v0  ;;  %v6853_v39 = vsel %vm1738_vm12, %v6788_v16, %v1882_v18  ;;  %v1820_v16 = vpop.permute.xlu0 %1819  ;;  %v4241_v18 = vpack.c.bf16 %v2386_v22, %v2380_v33  ;;  %v2411_v33 = vld [vmem:[#allocation10 + $0xe28] sm:$0xff]  ;;  %vm1745_vm1 = vcmp.ge.f32.partialorder %v6859_v29, 0.0 }
 0x37f   : > { %2718 = vmatmul.mubr.f32.gmra.mrb[2].mxu1 %v6818_v30  ;;  %3057 = vmatmul.mubr.f32.gmra.mrb[50].mxu0 %v6818_v30  ;;  %v6827_v62 = vpop.f32.mrb[38].mxu0  ;;  %7396 = vst [vmem:[#allocation34_spill] sm:$0xff] %v6853_v39  ;;  %v4049_v37 = vpack.c.bf16 %v2384_v48, %v2378_v44  ;;  %v4243_v0 = vpack.c.bf16 %v2399_v49, %v2393_v58  ;;  %v2392_v57 = vld [vmem:[#allocation10 + $0xd90] sm:$0xff]  ;;  %v2409_v48 = vld [vmem:[#allocation10 + $0xe18] sm:$0xff] }
 0x380   : > { %2723 = vmatprep.mubr.f32.mxu1 %v6832_v42  ;;  %4042 = vmatpush1.bf16.msra.mxu1 %v4041_v63  ;;  %v6836_v14 = vpop.f32.mrb[39].mxu0  ;;  %v1884_v63 = vmul.f32 %v6815_v56, %v6748_v54  ;;  %v6868_v54 = vsel %vm1741_vm13, %v6795_v27, %v1885_v46  ;;  %v2398_v46 = vld [vmem:[#allocation10 + $0xdc0] sm:$0xff]  ;;  %v2404_v49 = vld [vmem:[#allocation10 + $0xdf0] sm:$0xff] }
 0x381   : > { %3062 = vmatprep.mubr.f32.mxu0 %v6832_v42  ;;  %4234 = vmatpush1.bf16.msra.mxu0 %v4233_v32  ;;  %v2397_v32 = vld [vmem:[#allocation10 + $0xdb8] sm:$0xff]  ;;  %7397 = vst [vmem:[#allocation35_spill] sm:$0xff] %v6868_v54  ;;  %v6883_v42 = vadd.f32 %v6744_v50, %v6767_v19  ;;  %v6890_v22 = vpop.permute.xlu1 %1827 }
 0x382   : > { %4044 = vmatprep.subr.bf16.mxu1 %v4043_v9  ;;  %4236 = vmatprep.subr.bf16.mxu0 %v4235_v1  ;;  %v2390_v9 = vld [vmem:[#allocation10 + $0xd80] sm:$0xff]  ;;  %v2396_v1 = vld [vmem:[#allocation10 + $0xdb0] sm:$0xff]  ;;  %v4051_v27 = vpack.c.bf16 %v2397_v32, %v6843_v26  ;;  %v6888_v44 = vsel %vm1740_vm14, %v6815_v56, %v1884_v63  ;;  %v1889_v26 = vmul.f32 %v6859_v29, %v1820_v16  ;;  %v1185_v19 = vpop.permute.xlu0 %1184 }
 0x383   : > { %2724 = vmatmul.mubr.f32.gmra.mrb[4].mxu1 %v6853_v39  ;;  %3063 = vmatmul.mubr.f32.gmra.mrb[52].mxu0 %v6853_v39  ;;  %v6863_v7 = vpop.f32.mrb[40].mxu0  ;;  %v6877_v39 = vld [vmem:[#allocation10 + $0xde8] sm:$0xff]  ;;  %7398 = vst [vmem:[#allocation36_spill] sm:$0xff] %v6888_v44  ;;  %v6904_v56 = vsel %vm1743_vm15, %v6823_v34, %v1887_v55  ;;  %v2408_v63 = vld [vmem:[#allocation10 + $0xe10] sm:$0xff]  ;;  %v4245_v32 = vpack.c.bf16 %v2398_v46, %v2392_v57  ;;  %v2410_v55 = vld [vmem:[#allocation10 + $0xe20] sm:$0xff]  ;;  %vm1744_vm2 = vcmp.ge.f32.partialorder %v6883_v42, 0.0 }
 0x384   : > { %2729 = vmatprep.mubr.f32.mxu1 %v6868_v54  ;;  %4046 = vmatpush1.bf16.msra.mxu1 %v4045_v6  ;;  %v6872_v2 = vpop.f32.mrb[41].mxu0  ;;  %v1886_v6 = vmul.f32 %v6848_v41, %v6754_v15  ;;  %v6895_v15 = vadd.f32 %v6752_v40, %v6790_v38  ;;  %v4053_v40 = vpack.c.bf16 %v2396_v1, %v2390_v9  ;;  %v2421_v1 = vld [vmem:[#allocation10 + $0xe78] sm:$0xff]  ;;  %v2423_v57 = vld [vmem:[#allocation10 + $0xe88] sm:$0xff] }
 0x385   : > { %3068 = vmatprep.mubr.f32.mxu0 %v6868_v54  ;;  %4238 = vmatpush1.bf16.msra.mxu0 %v4237_v13  ;;  %v2405_v13 = vld [vmem:[#allocation10 + $0xdf8] sm:$0xff]  ;;  %v4055_v34 = vpack.c.bf16 %v2409_v48, %v6877_v39  ;;  %v1888_v54 = vmul.f32 %v6883_v42, %v1820_v16  ;;  %v4514_v46 = vadd.f32 %v6758_v36, %v1185_v19  ;;  %v2420_v48 = vld [vmem:[#allocation10 + $0xe70] sm:$0xff] }
 0x386   : > { %4048 = vmatprep.subr.bf16.mxu1 %v4047_v8  ;;  %4240 = vmatprep.subr.bf16.mxu0 %v4239_v47  ;;  %v2402_v47 = vld [vmem:[#allocation10 + $0xde0] sm:$0xff]  ;;  %v4247_v58 = vpack.c.bf16 %v2411_v33, %v2405_v13  ;;  %v6919_v9 = vsel %vm1742_vm0, %v6848_v41, %v1886_v6  ;;  %v1891_v39 = vmul.f32 %v6895_v15, %v6839_v4  ;;  %vm1747_vm3 = vcmp.ge.f32.partialorder %v6895_v15, 0.0  ;;  %v6939_v13 = vpop.permute.xlu1 %1189 }
 0x387   : > { %2730 = vmatmul.mubr.f32.gmra.mrb[6].mxu1 %v6888_v44  ;;  %3069 = vmatmul.mubr.f32.gmra.mrb[54].mxu0 %v6888_v44  ;;  %v6899_v50 = vpop.f32.mrb[42].mxu0  ;;  %v2415_v44 = vld [vmem:[#allocation10 + $0xe48] sm:$0xff]  ;;  %v4057_v36 = vpack.c.bf16 %v2408_v63, %v2402_v47  ;;  %v4249_v16 = vpack.c.bf16 %v2410_v55, %v2404_v49  ;;  %v2414_v6 = vld [vmem:[#allocation10 + $0xe40] sm:$0xff]  ;;  %v4516_v49 = vadd.f32 %v6765_v17, %v6939_v13  ;;  %vm1749_vm5 = vcmp.ge.f32.partialorder %v4514_v46, 0.0 }
 0x388   : > { %2735 = vmatprep.mubr.f32.mxu1 %v6904_v56  ;;  %4050 = vmatpush1.bf16.msra.mxu1 %v4049_v37  ;;  %v6908_v8 = vpop.f32.mrb[43].mxu0  ;;  %v4511_v37 = vadd.f32 %v6750_v11, %v6790_v38  ;;  %v6931_v38 = vsel %vm1745_vm1, %v6859_v29, %v1889_v26  ;;  %v2416_v29 = vld [vmem:[#allocation10 + $0xe50] sm:$0xff]  ;;  %v4513_v26 = vadd.f32 %v6756_v35, %v1185_v19  ;;  %v2422_v47 = vld [vmem:[#allocation10 + $0xe80] sm:$0xff]  ;;  %v2427_v63 = vld [vmem:[#allocation10 + $0xea8] sm:$0xff]  ;;  %v6960_v19 = vpop.permute.xlu0 %1831 }
 0x389   : > { %3074 = vmatprep.mubr.f32.mxu0 %v6904_v56  ;;  %4242 = vmatpush1.bf16.msra.mxu0 %v4241_v18  ;;  %v2417_v18 = vld [vmem:[#allocation10 + $0xe58] sm:$0xff]  ;;  %7399 = vst [vmem:[#allocation37_spill] sm:$0xff] %v6931_v38  ;;  %vm1751_vm7 = vcmp.ge.f32.partialorder %v4516_v49, 0.0 }
 0x38a   : > { %4052 = vmatprep.subr.bf16.mxu1 %v4051_v27  ;;  %4244 = vmatprep.subr.bf16.mxu0 %v4243_v0  ;;  %v4059_v27 = vpack.c.bf16 %v2421_v1, %v2415_v44  ;;  %v4251_v0 = vpack.c.bf16 %v2423_v57, %v2417_v18  ;;  %v1890_v33 = vmul.f32 %v4511_v37, %v6839_v4  ;;  %v2433_v44 = vld [vmem:[#allocation10 + $0xed8] sm:$0xff]  ;;  %vm1746_vm4 = vcmp.ge.f32.partialorder %v4511_v37, 0.0  ;;  %v2426_v1 = vld [vmem:[#allocation10 + $0xea0] sm:$0xff] }
 0x38b   : > { %2736 = vmatmul.mubr.f32.gmra.mrb[8].mxu1 %v6919_v9  ;;  %3075 = vmatmul.mubr.f32.gmra.mrb[56].mxu0 %v6919_v9  ;;  %v6926_v11 = vpop.f32.mrb[44].mxu0  ;;  %v2429_v4 = vld [vmem:[#allocation10 + $0xeb8] sm:$0xff]  ;;  %v4063_v55 = vpack.c.bf16 %v2433_v44, %v2427_v63  ;;  %v1892_v18 = vmul.f32 %v4513_v26, %v6890_v22  ;;  %vm1748_vm6 = vcmp.ge.f32.partialorder %v4513_v26, 0.0  ;;  %v6978_v63 = vpop.permute.xlu1 %1194 }
 0x38c   : > { %2741 = vmatprep.mubr.f32.mxu1 %v6931_v38  ;;  %4054 = vmatpush1.bf16.msra.mxu1 %v4053_v40  ;;  %v6935_v41 = vpop.f32.mrb[45].mxu0  ;;  %v6946_v40 = vsel %vm1744_vm2, %v6883_v42, %v1888_v54  ;;  %v6958_v42 = vsel %vm1747_vm3, %v6895_v15, %v1891_v39  ;;  %v2435_v54 = vld [vmem:[#allocation10 + $0xee8] sm:$0xff]  ;;  %v2432_v15 = vld [vmem:[#allocation10 + $0xed0] sm:$0xff]  ;;  %v6968_v57 = vsel %vm1746_vm4, %v4511_v37, %v1890_v33 }
 0x38d   : > { %3080 = vmatprep.mubr.f32.mxu0 %v6931_v38  ;;  %4246 = vmatpush1.bf16.msra.mxu0 %v4245_v32  ;;  %7400 = vst [vmem:[#allocation38_spill] sm:$0xff] %v6946_v40  ;;  %v1893_v32 = vmul.f32 %v4514_v46, %v6890_v22  ;;  %7401 = vst [vmem:[#allocation39_spill] sm:$0xff] %v6958_v42  ;;  %v4255_v39 = vpack.c.bf16 %v2435_v54, %v2429_v4  ;;  %v2439_v38 = vld [vmem:[#allocation10 + $0xf08] sm:$0xff]  ;;  %v2445_v22 = vld [vmem:[#allocation10 + $0xf38] sm:$0xff] }
 0x38e   : > { %4056 = vmatprep.subr.bf16.mxu1 %v4055_v34  ;;  %4248 = vmatprep.subr.bf16.mxu0 %v4247_v58  ;;  %v4061_v34 = vpack.c.bf16 %v2420_v48, %v2414_v6  ;;  %v4253_v58 = vpack.c.bf16 %v2422_v47, %v2416_v29  ;;  %7402 = vst [vmem:[#allocation40_spill] sm:$0xff] %v6968_v57  ;;  %v2441_v48 = vld [vmem:[#allocation10 + $0xf18] sm:$0xff]  ;;  %v2447_v37 = vld [vmem:[#allocation10 + $0xf48] sm:$0xff]  ;;  %v2438_v29 = vld [vmem:[#allocation10 + $0xf00] sm:$0xff] }
 0x38f   : > { %2742 = vmatmul.mubr.f32.gmra.mrb[10].mxu1 %v6946_v40  ;;  %3081 = vmatmul.mubr.f32.gmra.mrb[58].mxu0 %v6946_v40  ;;  %v6953_v35 = vpop.f32.mrb[46].mxu0  ;;  %v2434_v40 = vld [vmem:[#allocation10 + $0xee0] sm:$0xff]  ;;  %v1895_v6 = vmul.f32 %v4516_v49, %v6960_v19  ;;  %v2444_v33 = vld [vmem:[#allocation10 + $0xf30] sm:$0xff]  ;;  %v4067_v44 = vpack.c.bf16 %v2445_v22, %v2439_v38  ;;  %v2451_v54 = vld [vmem:[#allocation10 + $0xf68] sm:$0xff] }
 0x390   : > { %2747 = vmatprep.mubr.f32.mxu1 %v6958_v42  ;;  %4058 = vmatpush1.bf16.msra.mxu1 %v4057_v36  ;;  %v6963_v17 = vpop.f32.mrb[47].mxu0  ;;  %v2428_v36 = vld [vmem:[#allocation10 + $0xeb0] sm:$0xff]  ;;  %v2446_v4 = vld [vmem:[#allocation10 + $0xf40] sm:$0xff] }
 0x391   : > { %3086 = vmatprep.mubr.f32.mxu0 %v6958_v42  ;;  %4250 = vmatpush1.bf16.msra.mxu0 %v4249_v16  ;;  %v6974_v16 = vsel %vm1749_vm5, %v4514_v46, %v1893_v32  ;;  %v2440_v47 = vld [vmem:[#allocation10 + $0xf10] sm:$0xff]  ;;  %v6980_v46 = vsel %vm1748_vm6, %v4513_v26, %v1892_v18  ;;  %v4259_v32 = vpack.c.bf16 %v2447_v37, %v2441_v48  ;;  %v2458_v22 = vld [vmem:[#allocation10 + $0xfa0] sm:$0xff]  ;;  %v2465_v48 = vld [vmem:[#allocation10 + $0xfd8] sm:$0xff] }
 0x392   : > { %4060 = vmatprep.subr.bf16.mxu1 %v4059_v27  ;;  %4252 = vmatprep.subr.bf16.mxu0 %v4251_v0  ;;  %7403 = vst [vmem:[#allocation41_spill] sm:$0xff] %v6974_v16  ;;  %v4065_v27 = vpack.c.bf16 %v2432_v15, %v2426_v1  ;;  %v4257_v0 = vpack.c.bf16 %v2434_v40, %v2428_v36  ;;  %7404 = vst [vmem:[#allocation42_spill] sm:$0xff] %v6980_v46  ;;  %v2459_v1 = vld [vmem:[#allocation10 + $0xfa8] sm:$0xff]  ;;  %v2450_v15 = vld [vmem:[#allocation10 + $0xf60] sm:$0xff] }
 0x393   : > { %2748 = vmatmul.mubr.f32.gmra.mrb[12].mxu1 %v6968_v57  ;;  %3087 = vmatmul.mubr.f32.gmra.mrb[60].mxu0 %v6968_v57  ;;  %v6985_v40 = vsel %vm1751_vm7, %v4516_v49, %v1895_v6  ;;  %v4069_v26 = vpack.c.bf16 %v2444_v33, %v2438_v29  ;;  %v4261_v38 = vpack.c.bf16 %v2446_v4, %v2440_v47  ;;  %v2456_v18 = vld [vmem:[#allocation10 + $0xf90] sm:$0xff]  ;;  %v2463_v49 = vld [vmem:[#allocation10 + $0xfc8] sm:$0xff]  ;;  %v2469_v6 = vld [vmem:[#allocation10 + $0xff8] sm:$0xff] }
 0x394   : > { %2753 = vmatprep.mubr.f32.mxu1 %v6974_v16  ;;  %4062 = vmatpush1.bf16.msra.mxu1 %v4061_v34  ;;  %v2457_v34 = vld [vmem:[#allocation10 + $0xf98] sm:$0xff]  ;;  %7405 = vst [vmem:[#allocation43_spill] sm:$0xff] %v6985_v40  ;;  %v2471_v37 = vld [vmem:[#allocation10 + $0x1008] sm:$0xff]  ;;  %v4073_v29 = vpack.c.bf16 %v2456_v18, %v2450_v15  ;;  %v4075_v33 = vpack.c.bf16 %v2469_v6, %v2463_v49  ;;  %v2462_v47 = vld [vmem:[#allocation10 + $0xfc0] sm:$0xff] }
 0x395   : > { %3092 = vmatprep.mubr.f32.mxu0 %v6974_v16  ;;  %4254 = vmatpush1.bf16.msra.mxu0 %v4253_v58  ;;  %v2453_v58 = vld [vmem:[#allocation10 + $0xf78] sm:$0xff]  ;;  %v2468_v4 = vld [vmem:[#allocation10 + $0xff0] sm:$0xff]  ;;  %v2487_v49 = vld [vmem:[#allocation10 + $0x1088] sm:$0xff] }
 0x396   : > { %4064 = vmatprep.subr.bf16.mxu1 %v4063_v55  ;;  %4256 = vmatprep.subr.bf16.mxu0 %v4255_v39  ;;  %v4071_v55 = vpack.c.bf16 %v2457_v34, %v2451_v54  ;;  %v2452_v39 = vld [vmem:[#allocation10 + $0xf70] sm:$0xff]  ;;  %v4263_v36 = vpack.c.bf16 %v2459_v1, %v2453_v58  ;;  %v2475_v34 = vld [vmem:[#allocation10 + $0x1028] sm:$0xff]  ;;  %v2481_v58 = vld [vmem:[#allocation10 + $0x1058] sm:$0xff] }
 0x397   : > { %2754 = vmatmul.mubr.f32.gmra.mrb[14].mxu1 %v6980_v46  ;;  %3093 = vmatmul.mubr.f32.gmra.mrb[62].mxu0 %v6980_v46  ;;  %v2464_v54 = vld [vmem:[#allocation10 + $0xfd0] sm:$0xff]  ;;  %v2477_v1 = vld [vmem:[#allocation10 + $0x1038] sm:$0xff]  ;;  %v4077_v46 = vpack.c.bf16 %v2468_v4, %v2462_v47  ;;  %v4079_v15 = vpack.c.bf16 %v2481_v58, %v2475_v34  ;;  %v2499_v34 = vld [vmem:[#allocation10 + $0x10e8] sm:$0xff] }
 0x398   : > { %4066 = vmatpush1.bf16.msra.mxu1 %v4065_v27  ;;  %2824 = vmatprep.mubr.f32.mxu1 %v6985_v40  ;;  %v6989_v27 = vpop.permute.xlu1 %1835  ;;  %v2476_v18 = vld [vmem:[#allocation10 + $0x1030] sm:$0xff]  ;;  %v2493_v6 = vld [vmem:[#allocation10 + $0x10b8] sm:$0xff]  ;;  %v2507_v58 = vld [vmem:[#allocation10 + $0x1128] sm:$0xff] }
 0x399   : > { %4258 = vmatpush1.bf16.msra.mxu0 %v4257_v0  ;;  %3163 = vmatprep.mubr.f32.mxu0 %v6985_v40  ;;  %v4265_v0 = vpack.c.bf16 %v2458_v22, %v2452_v39  ;;  %v2483_v40 = vld [vmem:[#allocation10 + $0x1068] sm:$0xff]  ;;  %v2492_v47 = vld [vmem:[#allocation10 + $0x10b0] sm:$0xff] }
 0x39a   : > { %4068 = vmatprep.subr.bf16.mxu1 %v4067_v44  ;;  %4260 = vmatprep.subr.bf16.mxu0 %v4259_v32  ;;  %v4267_v44 = vpack.c.bf16 %v2471_v37, %v2465_v48  ;;  %v2470_v32 = vld [vmem:[#allocation10 + $0x1000] sm:$0xff]  ;;  %v4271_v22 = vpack.c.bf16 %v2483_v40, %v2477_v1  ;;  %v2489_v48 = vld [vmem:[#allocation10 + $0x1098] sm:$0xff]  ;;  %v2495_v37 = vld [vmem:[#allocation10 + $0x10c8] sm:$0xff] }
 0x39b   : > { %v2488_v4 = vld [vmem:[#allocation10 + $0x1090] sm:$0xff]  ;;  %v2501_v40 = vld [vmem:[#allocation10 + $0x10f8] sm:$0xff] }
 0x39c   : > { %4070 = vmatpush1.bf16.msra.mxu1 %v4069_v26  ;;  %v4269_v26 = vpack.c.bf16 %v2470_v32, %v2464_v54  ;;  %v6991_v39 = vpop.permute.xlu1 %1839  ;;  %v4275_v54 = vpack.c.bf16 %v2495_v37, %v2489_v48  ;;  %v2494_v32 = vld [vmem:[#allocation10 + $0x10c0] sm:$0xff]  ;;  %v2519_v48 = vld [vmem:[#allocation10 + $0x1188] sm:$0xff] }
 0x39d   : > { %4262 = vmatpush1.bf16.msra.mxu0 %v4261_v38  ;;  %4072 = vmatprep.subr.bf16.mxu1 %v4071_v55  ;;  %v2474_v38 = vld [vmem:[#allocation10 + $0x1020] sm:$0xff]  ;;  %v2480_v55 = vld [vmem:[#allocation10 + $0x1050] sm:$0xff] }
 0x39e   : > { %4264 = vmatprep.subr.bf16.mxu0 %v4263_v36  ;;  %v2482_v36 = vld [vmem:[#allocation10 + $0x1060] sm:$0xff]  ;;  %v4081_v16 = vpack.c.bf16 %v2480_v55, %v2474_v38  ;;  %v2504_v38 = vld [vmem:[#allocation10 + $0x1110] sm:$0xff] }
 0x39f   : > { %v2500_v55 = vld [vmem:[#allocation10 + $0x10f0] sm:$0xff] }
 0x3a0   : > { %4074 = vmatpush1.bf16.msra.mxu1 %v4073_v29  ;;  %v4273_v29 = vpack.c.bf16 %v2482_v36, %v2476_v18  ;;  %v6993_v1 = vpop.permute.xlu1 %1204  ;;  %v4279_v18 = vpack.c.bf16 %v2507_v58, %v2501_v40  ;;  %v2511_v36 = vld [vmem:[#allocation10 + $0x1148] sm:$0xff]  ;;  %v2525_v40 = vld [vmem:[#allocation10 + $0x11b8] sm:$0xff] }
 0x3a1   : > { %4266 = vmatpush1.bf16.msra.mxu0 %v4265_v0  ;;  %4076 = vmatprep.subr.bf16.mxu1 %v4075_v33  ;;  %v4083_v0 = vpack.c.bf16 %v2493_v6, %v2487_v49  ;;  %v2486_v33 = vld [vmem:[#allocation10 + $0x1080] sm:$0xff]  ;;  %v2517_v49 = vld [vmem:[#allocation10 + $0x1178] sm:$0xff]  ;;  %v2531_v58 = vld [vmem:[#allocation10 + $0x11e8] sm:$0xff] }
 0x3a2   : > { %4268 = vmatprep.subr.bf16.mxu0 %v4267_v44  ;;  %v2505_v44 = vld [vmem:[#allocation10 + $0x1118] sm:$0xff]  ;;  %v4085_v57 = vpack.c.bf16 %v2492_v47, %v2486_v33  ;;  %v4091_v33 = vpack.c.bf16 %v2517_v49, %v2511_v36  ;;  %v2512_v47 = vld [vmem:[#allocation10 + $0x1150] sm:$0xff]  ;;  %v1963_v36 = vld [vmem:[#allocation10 + $0x28] sm:$0xff] }
 0x3a3   : > { %v2513_v6 = vld [vmem:[#allocation10 + $0x1158] sm:$0xff] }
 0x3a4   : > { %4078 = vmatpush1.bf16.msra.mxu1 %v4077_v46  ;;  %v4277_v46 = vpack.c.bf16 %v2494_v32, %v2488_v4  ;;  %v6995_v4 = vpop.permute.xlu1 %1209  ;;  %v4283_v32 = vpack.c.bf16 %v2519_v48, %v2513_v6  ;;  %v1969_v49 = vld [vmem:[#allocation10 + $0x58] sm:$0xff]  ;;  %v4518_v6 = vadd.f32 %v6778_v45, %v6978_v63  ;;  %v1200_v48 = vpop.permute.xlu0 %1199 }
 0x3a5   : > { %4270 = vmatpush1.bf16.msra.mxu0 %v4269_v26  ;;  %4080 = vmatprep.subr.bf16.mxu1 %v4079_v15  ;;  %v4087_v26 = vpack.c.bf16 %v2505_v44, %v2499_v34  ;;  %v2498_v15 = vld [vmem:[#allocation10 + $0x10e0] sm:$0xff]  ;;  %v2523_v34 = vld [vmem:[#allocation10 + $0x11a8] sm:$0xff]  ;;  %v2529_v44 = vld [vmem:[#allocation10 + $0x11d8] sm:$0xff] }
 0x3a6   : > { %4272 = vmatprep.subr.bf16.mxu0 %v4271_v22  ;;  %v2506_v22 = vld [vmem:[#allocation10 + $0x1120] sm:$0xff]  ;;  %v4089_v37 = vpack.c.bf16 %v2504_v38, %v2498_v15  ;;  %v2528_v15 = vld [vmem:[#allocation10 + $0x11d0] sm:$0xff]  ;;  %v1897_v45 = vmul.f32 %v4518_v6, %v6989_v27  ;;  %vm1753_vm9 = vcmp.ge.f32.partialorder %v4518_v6, 0.0 }
 0x3a7   : > { %v2524_v38 = vld [vmem:[#allocation10 + $0x11b0] sm:$0xff] }
 0x3a8   : > { %4082 = vmatpush1.bf16.msra.mxu1 %v4081_v16  ;;  %v4281_v16 = vpack.c.bf16 %v2506_v22, %v2500_v55  ;;  %v4515_v55 = vadd.f32 %v6763_v24, %v6939_v13  ;;  %v2530_v22 = vld [vmem:[#allocation10 + $0x11e0] sm:$0xff]  ;;  %v4517_v24 = vadd.f32 %v6776_v51, %v6978_v63 }
 0x3a9   : > { %4274 = vmatpush1.bf16.msra.mxu0 %v4273_v29  ;;  %4084 = vmatprep.subr.bf16.mxu1 %v4083_v0  ;;  %v2510_v29 = vld [vmem:[#allocation10 + $0x1140] sm:$0xff]  ;;  %v2516_v0 = vld [vmem:[#allocation10 + $0x1170] sm:$0xff] }
 0x3aa   : > { %4276 = vmatprep.subr.bf16.mxu0 %v4275_v54  ;;  %v2518_v54 = vld [vmem:[#allocation10 + $0x1180] sm:$0xff]  ;;  %v4093_v42 = vpack.c.bf16 %v2516_v0, %v2510_v29  ;;  %v4291_v29 = vpack.c.bf16 %v1969_v49, %v1963_v36  ;;  %v1894_v0 = vmul.f32 %v4515_v55, %v6960_v19  ;;  %vm1750_vm8 = vcmp.ge.f32.partialorder %v4515_v55, 0.0  ;;  %v1992_v49 = vld [vmem:[#allocation10 + $0x110] sm:$0xff] }
 0x3ab   : > { %v1962_v13 = vld [vmem:[#allocation10 + $0x20] sm:$0xff]  ;;  %v1896_v19 = vmul.f32 %v4517_v24, %v6989_v27  ;;  %vm1752_vm10 = vcmp.ge.f32.partialorder %v4517_v24, 0.0  ;;  %v1987_v27 = vld [vmem:[#allocation10 + $0xe8] sm:$0xff] }
 0x3ac   : > { %4086 = vmatpush1.bf16.msra.mxu1 %v4085_v57  ;;  %v4285_v57 = vpack.c.bf16 %v2518_v54, %v2512_v47  ;;  %v1968_v47 = vld [vmem:[#allocation10 + $0x50] sm:$0xff]  ;;  %v1975_v54 = vld [vmem:[#allocation10 + $0x88] sm:$0xff]  ;;  %v7012_v63 = vsel %vm1750_vm8, %v4515_v55, %v1894_v0  ;;  %v1986_v36 = vld [vmem:[#allocation10 + $0xe0] sm:$0xff] }
 0x3ad   : > { %4278 = vmatpush1.bf16.msra.mxu0 %v4277_v46  ;;  %4088 = vmatprep.subr.bf16.mxu1 %v4087_v26  ;;  %v4095_v46 = vpack.c.bf16 %v2529_v44, %v2523_v34  ;;  %v2522_v26 = vld [vmem:[#allocation10 + $0x11a0] sm:$0xff]  ;;  %v4293_v34 = vpack.c.bf16 %v1968_v47, %v1962_v13  ;;  %v4519_v44 = vadd.f32 %v6799_v12, %v1200_v48  ;;  %v1844_v12 = vpop.permute.xlu0 %1843 }
 0x3ae   : > { %4280 = vmatprep.subr.bf16.mxu0 %v4279_v18  ;;  %v4287_v18 = vpack.c.bf16 %v2531_v58, %v2525_v40  ;;  %v1974_v58 = vld [vmem:[#allocation10 + $0x80] sm:$0xff] }
 0x3af   : > { %v1898_v55 = vmul.f32 %v4519_v44, %v6991_v39  ;;  %vm1754_vm12 = vcmp.ge.f32.partialorder %v4519_v44, 0.0  ;;  %v1998_v47 = vld [vmem:[#allocation10 + $0x140] sm:$0xff] }
 0x3b0   : > { %4090 = vmatpush1.bf16.msra.mxu1 %v4089_v37  ;;  %v7001_v37 = vpop.permute.xlu1 %1847 }
 0x3b1   : > { %4282 = vmatpush1.bf16.msra.mxu0 %v4281_v16  ;;  %4092 = vmatprep.subr.bf16.mxu1 %v4091_v33  ;;  %v4097_v16 = vpack.c.bf16 %v2528_v15, %v2522_v26  ;;  %v4289_v33 = vpack.c.bf16 %v2530_v22, %v2524_v38  ;;  %v7018_v26 = vsel %vm1753_vm9, %v4518_v6, %v1897_v45  ;;  %v1993_v15 = vld [vmem:[#allocation10 + $0x118] sm:$0xff]  ;;  %v2004_v45 = vld [vmem:[#allocation10 + $0x170] sm:$0xff] }
 0x3b2   : > { %4284 = vmatprep.subr.bf16.mxu0 %v4283_v32  ;;  %v4520_v32 = vadd.f32 %v6805_v10, %v1200_v48  ;;  %v4299_v22 = vpack.c.bf16 %v1993_v15, %v1987_v27  ;;  %v4524_v48 = vadd.f32 %v6872_v2, %v6995_v4  ;;  %v4523_v2 = vadd.f32 %v6863_v7, %v6995_v4 }
 0x3b3   : > { %v4305_v7 = vpack.c.bf16 %v2004_v45, %v1998_v47 }
 0x3b4   : > { %4094 = vmatpush1.bf16.msra.mxu1 %v4093_v42  ;;  %v1981_v42 = vld [vmem:[#allocation10 + $0xb8] sm:$0xff]  ;;  %v7010_v51 = vpop.permute.xlu1 %1851  ;;  %v1899_v10 = vmul.f32 %v4520_v32, %v6991_v39  ;;  %vm1755_vm11 = vcmp.ge.f32.partialorder %v4520_v32, 0.0  ;;  %vm1759_vm15 = vcmp.ge.f32.partialorder %v4524_v48, 0.0  ;;  %v1902_v4 = vmul.f32 %v4523_v2, %v7001_v37 }
 0x3b5   : > { %4286 = vmatpush1.bf16.msra.mxu0 %v4285_v57  ;;  %4096 = vmatprep.subr.bf16.mxu1 %v4095_v46  ;;  %v4295_v40 = vpack.c.bf16 %v1981_v42, %v1975_v54  ;;  %v1980_v57 = vld [vmem:[#allocation10 + $0xb0] sm:$0xff]  ;;  %v4522_v46 = vadd.f32 %v6836_v14, %v6993_v1  ;;  %v4521_v14 = vadd.f32 %v6827_v62, %v6993_v1  ;;  %v2005_v39 = vld [vmem:[#allocation10 + $0x178] sm:$0xff]  ;;  %vm1758_vm0 = vcmp.ge.f32.partialorder %v4523_v2, 0.0 }
 0x3b6   : > { %4288 = vmatprep.subr.bf16.mxu0 %v4287_v18  ;;  %v4297_v38 = vpack.c.bf16 %v1980_v57, %v1974_v58  ;;  %v7026_v18 = vsel %vm1752_vm10, %v4517_v24, %v1896_v19  ;;  %v4301_v62 = vpack.c.bf16 %v1992_v49, %v1986_v36  ;;  %v7038_v24 = vsel %vm1754_vm12, %v4519_v44, %v1898_v55  ;;  %v2017_v19 = vld [vmem:[#allocation10 + $0x1d8] sm:$0xff]  ;;  %v2010_v57 = vld [vmem:[#allocation10 + $0x1a0] sm:$0xff]  ;;  %v2028_v49 = vld [vmem:[#allocation10 + $0x230] sm:$0xff] }
 0x3b7   : > { %v1901_v6 = vmul.f32 %v4522_v46, %v1844_v12  ;;  %vm1757_vm13 = vcmp.ge.f32.partialorder %v4522_v46, 0.0  ;;  %v1900_v1 = vmul.f32 %v4521_v14, %v1844_v12  ;;  %vm1756_vm14 = vcmp.ge.f32.partialorder %v4521_v14, 0.0  ;;  %v2023_v12 = vld [vmem:[#allocation10 + $0x208] sm:$0xff]  ;;  %v2022_v36 = vld [vmem:[#allocation10 + $0x200] sm:$0xff] }
 0x3b8   : > { %4098 = vmatpush1.bf16.msra.mxu1 %v4097_v16  ;;  %v7031_v16 = vsel %vm1755_vm11, %v4520_v32, %v1899_v10  ;;  %v1220_v0 = vpop.permute.xlu1 %1219  ;;  %v1903_v32 = vmul.f32 %v4524_v48, %v7001_v37  ;;  %v2016_v10 = vld [vmem:[#allocation10 + $0x1d0] sm:$0xff]  ;;  %v2029_v37 = vld [vmem:[#allocation10 + $0x238] sm:$0xff] }
 0x3b9   : > { %4290 = vmatpush1.bf16.msra.mxu0 %v4289_v33  ;;  %4292 = vmatprep.subr.bf16.mxu1 %v4291_v29  ;;  %v1999_v33 = vld [vmem:[#allocation10 + $0x148] sm:$0xff]  ;;  %v1215_v29 = vpop.permute.xlu0 %1214  ;;  %v7043_v42 = vsel %vm1757_vm13, %v4522_v46, %v1901_v6  ;;  %v4528_v27 = vadd.f32 %v6935_v41, %v1220_v0  ;;  %v4527_v41 = vadd.f32 %v6926_v11, %v1220_v0 }
 0x3ba   : > { %v4303_v13 = vpack.c.bf16 %v2005_v39, %v1999_v33  ;;  %v4526_v54 = vadd.f32 %v6908_v8, %v1215_v29  ;;  %v4525_v8 = vadd.f32 %v6899_v50, %v1215_v29  ;;  %v7055_v15 = vsel %vm1759_vm15, %v4524_v48, %v1903_v32  ;;  %v2035_v39 = vld [vmem:[#allocation10 + $0x268] sm:$0xff]  ;;  %v2041_v29 = vld [vmem:[#allocation10 + $0x298] sm:$0xff] }
 0x3bb   : > { %2825 = vmatmul.mubr.f32.vlgmr.msra.gmra.mrb[0].mxu1 %v7012_v63  ;;  %v4309_v50 = vpack.c.bf16 %v2016_v10, %v2010_v57  ;;  %vm1763_vm3 = vcmp.ge.f32.partialorder %v4528_v27, 0.0  ;;  %v4313_v11 = vpack.c.bf16 %v2028_v49, %v2022_v36  ;;  %vm1762_vm4 = vcmp.ge.f32.partialorder %v4527_v41, 0.0  ;;  %v2047_v32 = vld [vmem:[#allocation10 + $0x2c8] sm:$0xff]  ;;  %v2065_v57 = vld [vmem:[#allocation10 + $0x358] sm:$0xff]  ;;  %v2076_v36 = vld [vmem:[#allocation10 + $0x3b0] sm:$0xff] }
 0x3bc   : > { %3164 = vmatmul.mubr.f32.vlgmr.msra.gmra.mrb[48].mxu0 %v7012_v63  ;;  %2830 = vmatprep.mubr.f32.mxu1 %v7018_v26  ;;  %v1225_v44 = vpop.permute.xlu1 %1224  ;;  %v1905_v46 = vmul.f32 %v4526_v54, %v7010_v51  ;;  %vm1761_vm1 = vcmp.ge.f32.partialorder %v4526_v54, 0.0  ;;  %v1904_v55 = vmul.f32 %v4525_v8, %v7010_v51  ;;  %vm1760_vm2 = vcmp.ge.f32.partialorder %v4525_v8, 0.0  ;;  %v2083_v49 = vld [vmem:[#allocation10 + $0x3e8] sm:$0xff] }
 0x3bd   : > { %3169 = vmatprep.mubr.f32.mxu0 %v7018_v26  ;;  %4294 = vmatpush1.bf16.msra.mxu1 %v4293_v34  ;;  %v2011_v34 = vld [vmem:[#allocation10 + $0x1a8] sm:$0xff]  ;;  %v4530_v48 = vadd.f32 %v6963_v17, %v1225_v44  ;;  %v4529_v17 = vadd.f32 %v6953_v35, %v1225_v44 }
 0x3be   : > { %4296 = vmatprep.subr.bf16.mxu1 %v4295_v40  ;;  %v7050_v40 = vsel %vm1756_vm14, %v4521_v14, %v1900_v1  ;;  %v4307_v58 = vpack.c.bf16 %v2017_v19, %v2011_v34  ;;  %v7062_v14 = vsel %vm1758_vm0, %v4523_v2, %v1902_v4  ;;  %v7066_v33 = vsel %vm1761_vm1, %v4526_v54, %v1905_v46  ;;  %v2034_v2 = vld [vmem:[#allocation10 + $0x260] sm:$0xff]  ;;  %v2053_v54 = vld [vmem:[#allocation10 + $0x2f8] sm:$0xff] }
 0x3bf   : > { %2831 = vmatmul.mubr.f32.gmra.mrb[2].mxu1 %v7026_v18  ;;  %v7072_v0 = vsel %vm1760_vm2, %v4525_v8, %v1904_v55  ;;  %v4315_v1 = vpack.c.bf16 %v2041_v29, %v2035_v39  ;;  %vm1765_vm5 = vcmp.ge.f32.partialorder %v4530_v48, 0.0  ;;  %v2046_v4 = vld [vmem:[#allocation10 + $0x2c0] sm:$0xff]  ;;  %v2052_v8 = vld [vmem:[#allocation10 + $0x2f0] sm:$0xff]  ;;  %vm1764_vm6 = vcmp.ge.f32.partialorder %v4529_v17, 0.0 }
 0x3c0   : > { %3170 = vmatmul.mubr.f32.gmra.mrb[50].mxu0 %v7026_v18  ;;  %2836 = vmatprep.mubr.f32.mxu1 %v7031_v16  ;;  %v4321_v10 = vpack.c.bf16 %v2052_v8, %v2046_v4  ;;  %v2082_v29 = vld [vmem:[#allocation10 + $0x3e0] sm:$0xff]  ;;  %v2125_v4 = vld [vmem:[#allocation10 + $0x538] sm:$0xff] }
 0x3c1   : > { %3175 = vmatprep.mubr.f32.mxu0 %v7031_v16  ;;  %4298 = vmatpush1.bf16.msra.mxu1 %v4297_v38  ;;  %v1856_v38 = vpop.permute.xlu0 %1855 }
 0x3c2   : > { %4300 = vmatprep.subr.bf16.mxu1 %v4299_v22  ;;  %v4311_v22 = vpack.c.bf16 %v2029_v37, %v2023_v12  ;;  %v1907_v6 = vmul.f32 %v4528_v27, %v1856_v38  ;;  %v1906_v51 = vmul.f32 %v4527_v41, %v1856_v38  ;;  %v2058_v12 = vld [vmem:[#allocation10 + $0x320] sm:$0xff]  ;;  %v2064_v37 = vld [vmem:[#allocation10 + $0x350] sm:$0xff]  ;;  %v2071_v38 = vld [vmem:[#allocation10 + $0x388] sm:$0xff] }
 0x3c3   : > { %2837 = vmatmul.mubr.f32.gmra.mrb[4].mxu1 %v7038_v24  ;;  %v4325_v55 = vpack.c.bf16 %v2064_v37, %v2058_v12  ;;  %v2137_v12 = vld [vmem:[#allocation10 + $0x598] sm:$0xff] }
 0x3c4   : > { %3176 = vmatmul.mubr.f32.gmra.mrb[52].mxu0 %v7038_v24  ;;  %2842 = vmatprep.mubr.f32.mxu1 %v7043_v42  ;;  %v7075_v45 = vsel %vm1763_vm3, %v4528_v27, %v1907_v6  ;;  %v7080_v19 = vsel %vm1762_vm4, %v4527_v41, %v1906_v51  ;;  %v2089_v6 = vld [vmem:[#allocation10 + $0x418] sm:$0xff] }
 0x3c5   : > { %3181 = vmatprep.mubr.f32.mxu0 %v7043_v42  ;;  %4302 = vmatpush1.bf16.msra.mxu1 %v4301_v62  ;;  %v1860_v62 = vpop.permute.xlu1 %1859  ;;  %v4331_v39 = vpack.c.bf16 %v2089_v6, %v2083_v49  ;;  %v2101_v51 = vld [vmem:[#allocation10 + $0x478] sm:$0xff]  ;;  %v2142_v6 = vld [vmem:[#allocation10 + $0x5c0] sm:$0xff] }
 0x3c6   : > { %4304 = vmatprep.subr.bf16.mxu1 %v4303_v13  ;;  %v2040_v13 = vld [vmem:[#allocation10 + $0x290] sm:$0xff]  ;;  %v1909_v47 = vmul.f32 %v4530_v48, %v1860_v62  ;;  %v1908_v34 = vmul.f32 %v4529_v17, %v1860_v62 }
 0x3c7   : > { %2843 = vmatmul.mubr.f32.gmra.mrb[6].mxu1 %v7050_v40  ;;  %v4317_v35 = vpack.c.bf16 %v2040_v13, %v2034_v2  ;;  %v2088_v62 = vld [vmem:[#allocation10 + $0x410] sm:$0xff]  ;;  %v2107_v13 = vld [vmem:[#allocation10 + $0x4a8] sm:$0xff] }
 0x3c8   : > { %3182 = vmatmul.mubr.f32.gmra.mrb[54].mxu0 %v7050_v40  ;;  %2848 = vmatprep.mubr.f32.mxu1 %v7055_v15  ;;  %v7083_v44 = vsel %vm1765_vm5, %v4530_v48, %v1909_v47  ;;  %v7088_v46 = vsel %vm1764_vm6, %v4529_v17, %v1908_v34  ;;  %v4333_v17 = vpack.c.bf16 %v2088_v62, %v2082_v29  ;;  %v2100_v2 = vld [vmem:[#allocation10 + $0x470] sm:$0xff]  ;;  %v2113_v47 = vld [vmem:[#allocation10 + $0x4d8] sm:$0xff] }
 0x3c9   : > { %3187 = vmatprep.mubr.f32.mxu0 %v7055_v15  ;;  %4306 = vmatpush1.bf16.msra.mxu1 %v4305_v7  ;;  %v4319_v7 = vpack.c.bf16 %v2053_v54, %v2047_v32  ;;  %v4339_v54 = vpack.c.bf16 %v2113_v47, %v2107_v13  ;;  %v2112_v34 = vld [vmem:[#allocation10 + $0x4d0] sm:$0xff]  ;;  %v2161_v29 = vld [vmem:[#allocation10 + $0x658] sm:$0xff]  ;;  %v2166_v47 = vld [vmem:[#allocation10 + $0x680] sm:$0xff] }
 0x3ca   : > { %4308 = vmatprep.subr.bf16.mxu1 %v4307_v58  ;;  %v2059_v58 = vld [vmem:[#allocation10 + $0x328] sm:$0xff] }
 0x3cb   : > { %2849 = vmatmul.mubr.f32.gmra.mrb[8].mxu1 %v7062_v14  ;;  %v4323_v27 = vpack.c.bf16 %v2065_v57, %v2059_v58  ;;  %v2118_v57 = vld [vmem:[#allocation10 + $0x500] sm:$0xff] }
 0x3cc   : > { %3188 = vmatmul.mubr.f32.gmra.mrb[56].mxu0 %v7062_v14  ;;  %2854 = vmatprep.mubr.f32.mxu1 %v7066_v33 }
 0x3cd   : > { %3193 = vmatprep.mubr.f32.mxu0 %v7066_v33  ;;  %4310 = vmatpush1.bf16.msra.mxu1 %v4309_v50  ;;  %v2077_v50 = vld [vmem:[#allocation10 + $0x3b8] sm:$0xff] }
 0x3ce   : > { %4312 = vmatprep.subr.bf16.mxu1 %v4311_v22  ;;  %v4327_v41 = vpack.c.bf16 %v2077_v50, %v2071_v38  ;;  %v2070_v22 = vld [vmem:[#allocation10 + $0x380] sm:$0xff] }
 0x3cf   : > { %2855 = vmatmul.mubr.f32.gmra.mrb[10].mxu1 %v7072_v0  ;;  %v4329_v48 = vpack.c.bf16 %v2076_v36, %v2070_v22  ;;  %v2130_v50 = vld [vmem:[#allocation10 + $0x560] sm:$0xff]  ;;  %v2149_v22 = vld [vmem:[#allocation10 + $0x5f8] sm:$0xff] }
 0x3d0   : > { %3194 = vmatmul.mubr.f32.gmra.mrb[58].mxu0 %v7072_v0  ;;  %2860 = vmatprep.mubr.f32.mxu1 %v7075_v45 }
 0x3d1   : > { %3199 = vmatprep.mubr.f32.mxu0 %v7075_v45  ;;  %4314 = vmatpush1.bf16.msra.mxu1 %v4313_v11  ;;  %v2095_v11 = vld [vmem:[#allocation10 + $0x448] sm:$0xff] }
 0x3d2   : > { %4316 = vmatprep.subr.bf16.mxu1 %v4315_v1  ;;  %v2094_v1 = vld [vmem:[#allocation10 + $0x440] sm:$0xff] }
 0x3d3   : > { %2861 = vmatmul.mubr.f32.gmra.mrb[12].mxu1 %v7080_v19  ;;  %v4337_v32 = vpack.c.bf16 %v2100_v2, %v2094_v1  ;;  %v2173_v1 = vld [vmem:[#allocation10 + $0x6b8] sm:$0xff] }
 0x3d4   : > { %3200 = vmatmul.mubr.f32.gmra.mrb[60].mxu0 %v7080_v19  ;;  %2866 = vmatprep.mubr.f32.mxu1 %v7083_v44 }
 0x3d5   : > { %3205 = vmatprep.mubr.f32.mxu0 %v7083_v44  ;;  %4318 = vmatpush1.bf16.msra.mxu1 %v4317_v35  ;;  %v2106_v35 = vld [vmem:[#allocation10 + $0x4a0] sm:$0xff] }
 0x3d6   : > { %4320 = vmatprep.subr.bf16.mxu1 %v4319_v7  ;;  %v2119_v7 = vld [vmem:[#allocation10 + $0x508] sm:$0xff]  ;;  %v4341_v8 = vpack.c.bf16 %v2112_v34, %v2106_v35  ;;  %v2185_v35 = vld [vmem:[#allocation10 + $0x718] sm:$0xff] }
 0x3d7   : > { %2867 = vmatmul.mubr.f32.gmra.mrb[14].mxu1 %v7088_v46  ;;  %v4343_v58 = vpack.c.bf16 %v2125_v4, %v2119_v7  ;;  %v2178_v4 = vld [vmem:[#allocation10 + $0x6e0] sm:$0xff] }
 0x3d8   : > { %3206 = vmatmul.mubr.f32.gmra.mrb[62].mxu0 %v7088_v46  ;;  %3276 = vmatprep.mubr.f32.mxu1 %v6620_v43  ;;  %v4335_v43 = vpack.c.bf16 %v2101_v51, %v2095_v11  ;;  %v2154_v51 = vld [vmem:[#allocation10 + $0x620] sm:$0xff] }
 0x3d9   : > { %4322 = vmatpush1.bf16.msra.mxu1 %v4321_v10  ;;  %v2124_v10 = vld [vmem:[#allocation10 + $0x530] sm:$0xff] }
 0x3da   : > { %4324 = vmatprep.subr.bf16.mxu1 %v4323_v27  ;;  %v2131_v27 = vld [vmem:[#allocation10 + $0x568] sm:$0xff]  ;;  %v4345_v37 = vpack.c.bf16 %v2124_v10, %v2118_v57  ;;  %v2197_v57 = vld [vmem:[#allocation10 + $0x778] sm:$0xff] }
 0x3db   : > { %v4347_v38 = vpack.c.bf16 %v2137_v12, %v2131_v27  ;;  %v2190_v12 = vld [vmem:[#allocation10 + $0x740] sm:$0xff] }
 0x3dd   : > { %4326 = vmatpush1.bf16.msra.mxu1 %v4325_v55  ;;  %v2136_v55 = vld [vmem:[#allocation10 + $0x590] sm:$0xff] }
 0x3de   : > { %4328 = vmatprep.subr.bf16.mxu1 %v4327_v41  ;;  %v2143_v41 = vld [vmem:[#allocation10 + $0x5c8] sm:$0xff]  ;;  %v4349_v36 = vpack.c.bf16 %v2136_v55, %v2130_v50  ;;  %v2202_v55 = vld [vmem:[#allocation10 + $0x7a0] sm:$0xff] }
 0x3df   : > { %v4351_v49 = vpack.c.bf16 %v2149_v22, %v2143_v41  ;;  %v2215_v41 = vld [vmem:[#allocation10 + $0x808] sm:$0xff] }
 0x3e1   : > { %4330 = vmatpush1.bf16.msra.mxu1 %v4329_v48  ;;  %v2148_v48 = vld [vmem:[#allocation10 + $0x5f0] sm:$0xff] }
 0x3e2   : > { %4332 = vmatprep.subr.bf16.mxu1 %v4331_v39  ;;  %v2155_v39 = vld [vmem:[#allocation10 + $0x628] sm:$0xff]  ;;  %v4353_v62 = vpack.c.bf16 %v2148_v48, %v2142_v6 }
 0x3e3   : > { %v4355_v11 = vpack.c.bf16 %v2161_v29, %v2155_v39  ;;  %v2227_v6 = vld [vmem:[#allocation10 + $0x868] sm:$0xff]  ;;  %v2226_v29 = vld [vmem:[#allocation10 + $0x860] sm:$0xff] }
 0x3e5   : > { %4334 = vmatpush1.bf16.msra.mxu1 %v4333_v17  ;;  %v2160_v17 = vld [vmem:[#allocation10 + $0x650] sm:$0xff] }
 0x3e6   : > { %4336 = vmatprep.subr.bf16.mxu1 %v4335_v43  ;;  %v2167_v43 = vld [vmem:[#allocation10 + $0x688] sm:$0xff]  ;;  %v4357_v2 = vpack.c.bf16 %v2160_v17, %v2154_v51  ;;  %v2238_v17 = vld [vmem:[#allocation10 + $0x8c0] sm:$0xff] }
 0x3e7   : > { %v4359_v13 = vpack.c.bf16 %v2173_v1, %v2167_v43  ;;  %v2251_v43 = vld [vmem:[#allocation10 + $0x928] sm:$0xff]  ;;  %v7406_v1 = vld [vmem:[#allocation28_spill] sm:$0xff] }
 0x3e9   : > { %4338 = vmatpush1.bf16.msra.mxu1 %v4337_v32  ;;  %v2172_v32 = vld [vmem:[#allocation10 + $0x6b0] sm:$0xff] }
 0x3ea   : > { %4340 = vmatprep.subr.bf16.mxu1 %v4339_v54  ;;  %v2179_v54 = vld [vmem:[#allocation10 + $0x6e8] sm:$0xff]  ;;  %v4361_v34 = vpack.c.bf16 %v2172_v32, %v2166_v47  ;;  %v2250_v32 = vld [vmem:[#allocation10 + $0x920] sm:$0xff] }
 0x3eb   : > { %v4363_v7 = vpack.c.bf16 %v2185_v35, %v2179_v54  ;;  %v2263_v54 = vld [vmem:[#allocation10 + $0x988] sm:$0xff]  ;;  %v7408_v35 = vld [vmem:[#allocation30_spill] sm:$0xff] }
 0x3ed   : > { %4342 = vmatpush1.bf16.msra.mxu1 %v4341_v8  ;;  %v2184_v8 = vld [vmem:[#allocation10 + $0x710] sm:$0xff] }
 0x3ee   : > { %4344 = vmatprep.subr.bf16.mxu1 %v4343_v58  ;;  %v2191_v58 = vld [vmem:[#allocation10 + $0x748] sm:$0xff]  ;;  %v4365_v10 = vpack.c.bf16 %v2184_v8, %v2178_v4  ;;  %v2262_v8 = vld [vmem:[#allocation10 + $0x980] sm:$0xff] }
 0x3ef   : > { %v4367_v27 = vpack.c.bf16 %v2197_v57, %v2191_v58  ;;  %v2268_v58 = vld [vmem:[#allocation10 + $0x9b0] sm:$0xff]  ;;  %v2275_v57 = vld [vmem:[#allocation10 + $0x9e8] sm:$0xff] }
 0x3f1   : > { %4346 = vmatpush1.bf16.msra.mxu1 %v4345_v37  ;;  %v2203_v37 = vld [vmem:[#allocation10 + $0x7a8] sm:$0xff] }
 0x3f2   : > { %4348 = vmatprep.subr.bf16.mxu1 %v4347_v38 }
 0x3f5   : > { %4350 = vmatpush1.bf16.msra.mxu1 %v4349_v36 }
 0x3f6   : > { %4352 = vmatprep.subr.bf16.mxu1 %v4351_v49  ;;  %v2214_v49 = vld [vmem:[#allocation10 + $0x800] sm:$0xff] }
 0x3f9   : > { %4354 = vmatpush1.bf16.msra.mxu1 %v4353_v62  ;;  %v2239_v62 = vld [vmem:[#allocation10 + $0x8c8] sm:$0xff] }
 0x3fa   : > { %4356 = vmatprep.subr.bf16.mxu1 %v4355_v11 }
 0x3fc   : > { %3277 = vmatmul.mubr.f32.vlgmr.msra.gmra.mrb[16].mxu1 %v6625_v23  ;;  %v2196_v23 = vld [vmem:[#allocation10 + $0x770] sm:$0xff] }
 0x3fd   : > { %3282 = vmatprep.mubr.f32.mxu1 %v6629_v59  ;;  %4358 = vmatpush1.bf16.msra.mxu1 %v4357_v2  ;;  %v2209_v59 = vld [vmem:[#allocation10 + $0x7d8] sm:$0xff]  ;;  %v4369_v38 = vpack.c.bf16 %v2196_v23, %v2190_v12  ;;  %v7407_v2 = vld [vmem:[#allocation29_spill] sm:$0xff]  ;;  %v2274_v23 = vld [vmem:[#allocation10 + $0x9e0] sm:$0xff] }
 0x3fe   : > { %4360 = vmatprep.subr.bf16.mxu1 %v4359_v13  ;;  %v4371_v50 = vpack.c.bf16 %v2209_v59, %v2203_v37  ;;  %v2280_v37 = vld [vmem:[#allocation10 + $0xa10] sm:$0xff]  ;;  %v2287_v59 = vld [vmem:[#allocation10 + $0xa48] sm:$0xff] }
 0x400   : > { %3283 = vmatmul.mubr.f32.gmra.mrb[18].mxu1 %v6635_v28  ;;  %v2208_v28 = vld [vmem:[#allocation10 + $0x7d0] sm:$0xff] }
 0x401   : > { %3288 = vmatprep.mubr.f32.mxu1 %v6642_v5  ;;  %4362 = vmatpush1.bf16.msra.mxu1 %v4361_v34  ;;  %v2221_v5 = vld [vmem:[#allocation10 + $0x838] sm:$0xff]  ;;  %v4373_v22 = vpack.c.bf16 %v2208_v28, %v2202_v55  ;;  %v2286_v28 = vld [vmem:[#allocation10 + $0xa40] sm:$0xff] }
 0x402   : > { %4364 = vmatprep.subr.bf16.mxu1 %v4363_v7  ;;  %v4375_v36 = vpack.c.bf16 %v2221_v5, %v2215_v41  ;;  %v7409_v34 = vld [vmem:[#allocation31_spill] sm:$0xff]  ;;  %v2292_v41 = vld [vmem:[#allocation10 + $0xa70] sm:$0xff]  ;;  %v2299_v5 = vld [vmem:[#allocation10 + $0xaa8] sm:$0xff] }
 0x404   : > { %3289 = vmatmul.mubr.f32.gmra.mrb[20].mxu1 %v6648_v20  ;;  %v2220_v20 = vld [vmem:[#allocation10 + $0x830] sm:$0xff] }
 0x405   : > { %3294 = vmatprep.mubr.f32.mxu1 %v6657_v60  ;;  %4366 = vmatpush1.bf16.msra.mxu1 %v4365_v10  ;;  %v2233_v60 = vld [vmem:[#allocation10 + $0x898] sm:$0xff]  ;;  %v4377_v48 = vpack.c.bf16 %v2220_v20, %v2214_v49  ;;  %v2298_v20 = vld [vmem:[#allocation10 + $0xaa0] sm:$0xff] }
 0x406   : > { %4368 = vmatprep.subr.bf16.mxu1 %v4367_v27  ;;  %v4379_v39 = vpack.c.bf16 %v2233_v60, %v2227_v6  ;;  %v2281_v10 = vld [vmem:[#allocation10 + $0xa18] sm:$0xff]  ;;  %v4393_v27 = vpack.c.bf16 %v2268_v58, %v2262_v8  ;;  %v2304_v6 = vld [vmem:[#allocation10 + $0xad0] sm:$0xff]  ;;  %v2311_v60 = vld [vmem:[#allocation10 + $0xb08] sm:$0xff] }
 0x407   : > { %v4395_v12 = vpack.c.bf16 %v2281_v10, %v2275_v57  ;;  %v2365_v8 = vld [vmem:[#allocation10 + $0xcb8] sm:$0xff]  ;;  %v2358_v10 = vld [vmem:[#allocation10 + $0xc80] sm:$0xff] }
 0x408   : > { %3295 = vmatmul.mubr.f32.gmra.mrb[22].mxu1 %v6662_v53  ;;  %v2232_v53 = vld [vmem:[#allocation10 + $0x890] sm:$0xff] }
 0x409   : > { %3300 = vmatprep.mubr.f32.mxu1 %v6668_v61  ;;  %4370 = vmatpush1.bf16.msra.mxu1 %v4369_v38  ;;  %v2245_v61 = vld [vmem:[#allocation10 + $0x8f8] sm:$0xff]  ;;  %v4381_v11 = vpack.c.bf16 %v2232_v53, %v2226_v29  ;;  %v2310_v53 = vld [vmem:[#allocation10 + $0xb00] sm:$0xff] }
 0x40a   : > { %4372 = vmatprep.subr.bf16.mxu1 %v4371_v50  ;;  %v4383_v51 = vpack.c.bf16 %v2245_v61, %v2239_v62  ;;  %v2293_v38 = vld [vmem:[#allocation10 + $0xa78] sm:$0xff]  ;;  %v4397_v50 = vpack.c.bf16 %v2280_v37, %v2274_v23  ;;  %v2316_v62 = vld [vmem:[#allocation10 + $0xb30] sm:$0xff]  ;;  %v2323_v61 = vld [vmem:[#allocation10 + $0xb68] sm:$0xff] }
 0x40b   : > { %v4399_v55 = vpack.c.bf16 %v2293_v38, %v2287_v59  ;;  %v2377_v23 = vld [vmem:[#allocation10 + $0xd18] sm:$0xff]  ;;  %v7410_v37 = vld [vmem:[#allocation32_spill] sm:$0xff] }
 0x40c   : > { %3301 = vmatmul.mubr.f32.gmra.mrb[24].mxu1 %v6674_v3  ;;  %v2244_v3 = vld [vmem:[#allocation10 + $0x8f0] sm:$0xff] }
 0x40d   : > { %3306 = vmatprep.mubr.f32.mxu1 %v6681_v21  ;;  %4374 = vmatpush1.bf16.msra.mxu1 %v4373_v22  ;;  %v2257_v21 = vld [vmem:[#allocation10 + $0x958] sm:$0xff]  ;;  %v4385_v13 = vpack.c.bf16 %v2244_v3, %v2238_v17  ;;  %v2322_v3 = vld [vmem:[#allocation10 + $0xb60] sm:$0xff] }
 0x40e   : > { %4376 = vmatprep.subr.bf16.mxu1 %v4375_v36  ;;  %v4387_v47 = vpack.c.bf16 %v2257_v21, %v2251_v43  ;;  %v2305_v22 = vld [vmem:[#allocation10 + $0xad8] sm:$0xff]  ;;  %v4401_v36 = vpack.c.bf16 %v2292_v41, %v2286_v28  ;;  %v2328_v43 = vld [vmem:[#allocation10 + $0xb90] sm:$0xff]  ;;  %v2335_v21 = vld [vmem:[#allocation10 + $0xbc8] sm:$0xff] }
 0x40f   : > { %v4403_v49 = vpack.c.bf16 %v2305_v22, %v2299_v5  ;;  %v2383_v28 = vld [vmem:[#allocation10 + $0xd48] sm:$0xff]  ;;  %v2389_v41 = vld [vmem:[#allocation10 + $0xd78] sm:$0xff] }
 0x410   : > { %3307 = vmatmul.mubr.f32.gmra.mrb[26].mxu1 %v6687_v25  ;;  %v2256_v25 = vld [vmem:[#allocation10 + $0x950] sm:$0xff]  ;;  %v7411_v5 = vld [vmem:[#allocation33_spill] sm:$0xff] }
 0x411   : > { %3312 = vmatprep.mubr.f32.mxu1 %v6696_v31  ;;  %4378 = vmatpush1.bf16.msra.mxu1 %v4377_v48  ;;  %v2269_v31 = vld [vmem:[#allocation10 + $0x9b8] sm:$0xff]  ;;  %v4389_v7 = vpack.c.bf16 %v2256_v25, %v2250_v32  ;;  %v2340_v32 = vld [vmem:[#allocation10 + $0xbf0] sm:$0xff]  ;;  %v2347_v25 = vld [vmem:[#allocation10 + $0xc28] sm:$0xff] }
 0x412   : > { %4380 = vmatprep.subr.bf16.mxu1 %v4379_v39  ;;  %v4391_v4 = vpack.c.bf16 %v2269_v31, %v2263_v54  ;;  %v2317_v48 = vld [vmem:[#allocation10 + $0xb38] sm:$0xff]  ;;  %v4405_v39 = vpack.c.bf16 %v2304_v6, %v2298_v20  ;;  %v2388_v20 = vld [vmem:[#allocation10 + $0xd70] sm:$0xff]  ;;  %v2395_v6 = vld [vmem:[#allocation10 + $0xda8] sm:$0xff] }
 0x413   : > { %v4407_v29 = vpack.c.bf16 %v2317_v48, %v2311_v60  ;;  %v2353_v54 = vld [vmem:[#allocation10 + $0xc58] sm:$0xff]  ;;  %v7412_v60 = vld [vmem:[#allocation34_spill] sm:$0xff] }
 0x414   : > { %3313 = vmatmul.mubr.f32.gmra.mrb[28].mxu1 %v7406_v1  ;;  %v2341_v1 = vld [vmem:[#allocation10 + $0xbf8] sm:$0xff] }
 0x415   : > { %3318 = vmatprep.mubr.f32.mxu1 %v7407_v2  ;;  %4382 = vmatpush1.bf16.msra.mxu1 %v4381_v11  ;;  %v2329_v11 = vld [vmem:[#allocation10 + $0xb98] sm:$0xff]  ;;  %v4413_v2 = vpack.c.bf16 %v2328_v43, %v2322_v3  ;;  %v2406_v3 = vld [vmem:[#allocation10 + $0xe00] sm:$0xff]  ;;  %v2412_v43 = vld [vmem:[#allocation10 + $0xe30] sm:$0xff] }
 0x416   : > { %4384 = vmatprep.subr.bf16.mxu1 %v4383_v51  ;;  %v4409_v51 = vpack.c.bf16 %v2316_v62, %v2310_v53  ;;  %v4411_v17 = vpack.c.bf16 %v2329_v11, %v2323_v61  ;;  %v7413_v48 = vld [vmem:[#allocation35_spill] sm:$0xff]  ;;  %v2394_v53 = vld [vmem:[#allocation10 + $0xda0] sm:$0xff]  ;;  %v2407_v62 = vld [vmem:[#allocation10 + $0xe08] sm:$0xff] }
 0x417   : > { %v2413_v61 = vld [vmem:[#allocation10 + $0xe38] sm:$0xff]  ;;  %v7414_v11 = vld [vmem:[#allocation36_spill] sm:$0xff] }
 0x418   : > { %3319 = vmatmul.mubr.f32.gmra.mrb[30].mxu1 %v7408_v35  ;;  %v4419_v35 = vpack.c.bf16 %v2353_v54, %v2347_v25  ;;  %v2424_v25 = vld [vmem:[#allocation10 + $0xe90] sm:$0xff]  ;;  %v2431_v54 = vld [vmem:[#allocation10 + $0xec8] sm:$0xff] }
 0x419   : > { %4386 = vmatpush1.bf16.msra.mxu1 %v4385_v13  ;;  %3389 = vmatprep.mubr.f32.mxu1 %v7409_v34  ;;  %v4415_v13 = vpack.c.bf16 %v2341_v1, %v2335_v21  ;;  %v2346_v34 = vld [vmem:[#allocation10 + $0xc20] sm:$0xff]  ;;  %v2419_v21 = vld [vmem:[#allocation10 + $0xe68] sm:$0xff]  ;;  %v2425_v1 = vld [vmem:[#allocation10 + $0xe98] sm:$0xff] }
 0x41a   : > { %4388 = vmatprep.subr.bf16.mxu1 %v4387_v47  ;;  %v2334_v47 = vld [vmem:[#allocation10 + $0xbc0] sm:$0xff] }
 0x41b   : > { %v4417_v31 = vpack.c.bf16 %v2340_v32, %v2334_v47  ;;  %v4443_v47 = vpack.c.bf16 %v2425_v1, %v2419_v21  ;;  %v2418_v32 = vld [vmem:[#allocation10 + $0xe60] sm:$0xff]  ;;  %v2503_v21 = vld [vmem:[#allocation10 + $0x1108] sm:$0xff]  ;;  %v2509_v1 = vld [vmem:[#allocation10 + $0x1138] sm:$0xff] }
 0x41d   : > { %4390 = vmatpush1.bf16.msra.mxu1 %v4389_v7  ;;  %v2352_v7 = vld [vmem:[#allocation10 + $0xc50] sm:$0xff] }
 0x41e   : > { %4392 = vmatprep.subr.bf16.mxu1 %v4391_v4  ;;  %v2359_v4 = vld [vmem:[#allocation10 + $0xc88] sm:$0xff]  ;;  %v4421_v58 = vpack.c.bf16 %v2352_v7, %v2346_v34  ;;  %v4445_v34 = vpack.c.bf16 %v2424_v25, %v2418_v32  ;;  %v2508_v32 = vld [vmem:[#allocation10 + $0x1130] sm:$0xff] }
 0x41f   : > { %v4423_v57 = vpack.c.bf16 %v2365_v8, %v2359_v4  ;;  %v2430_v4 = vld [vmem:[#allocation10 + $0xec0] sm:$0xff]  ;;  %v2443_v8 = vld [vmem:[#allocation10 + $0xf28] sm:$0xff] }
 0x420   : > { %v2515_v25 = vld [vmem:[#allocation10 + $0x1168] sm:$0xff] }
 0x421   : > { %4394 = vmatpush1.bf16.msra.mxu1 %v4393_v27  ;;  %v2364_v27 = vld [vmem:[#allocation10 + $0xcb0] sm:$0xff] }
 0x422   : > { %4396 = vmatprep.subr.bf16.mxu1 %v4395_v12  ;;  %v2371_v12 = vld [vmem:[#allocation10 + $0xce8] sm:$0xff]  ;;  %v4425_v59 = vpack.c.bf16 %v2364_v27, %v2358_v10 }
 0x423   : > { %v4427_v38 = vpack.c.bf16 %v2377_v23, %v2371_v12  ;;  %v7419_v10 = vld [vmem:[#allocation41_spill] sm:$0xff]  ;;  %v2442_v23 = vld [vmem:[#allocation10 + $0xf20] sm:$0xff] }
 0x425   : > { %4398 = vmatpush1.bf16.msra.mxu1 %v4397_v50  ;;  %v2370_v50 = vld [vmem:[#allocation10 + $0xce0] sm:$0xff] }
 0x426   : > { %4400 = vmatprep.subr.bf16.mxu1 %v4399_v55  ;;  %v2376_v55 = vld [vmem:[#allocation10 + $0xd10] sm:$0xff] }
 0x427   : > { %v4429_v22 = vpack.c.bf16 %v2376_v55, %v2370_v50  ;;  %v7420_v50 = vld [vmem:[#allocation42_spill] sm:$0xff]  ;;  %v7421_v55 = vld [vmem:[#allocation43_spill] sm:$0xff] }
 0x429   : > { %4402 = vmatpush1.bf16.msra.mxu1 %v4401_v36  ;;  %v4431_v36 = vpack.c.bf16 %v2389_v41, %v2383_v28 }
 0x42a   : > { %4404 = vmatprep.subr.bf16.mxu1 %v4403_v49  ;;  %v2382_v49 = vld [vmem:[#allocation10 + $0xd40] sm:$0xff] }
 0x42d   : > { %4406 = vmatpush1.bf16.msra.mxu1 %v4405_v39  ;;  %v4433_v39 = vpack.c.bf16 %v2388_v20, %v2382_v49  ;;  %v2473_v49 = vld [vmem:[#allocation10 + $0x1018] sm:$0xff] }
 0x42e   : > { %4408 = vmatprep.subr.bf16.mxu1 %v4407_v29 }
 0x431   : > { %4410 = vmatpush1.bf16.msra.mxu1 %v4409_v51 }
 0x432   : > { %4412 = vmatprep.subr.bf16.mxu1 %v4411_v17  ;;  %v4439_v17 = vpack.c.bf16 %v2413_v61, %v2407_v62  ;;  %v2484_v62 = vld [vmem:[#allocation10 + $0x1070] sm:$0xff]  ;;  %v2491_v61 = vld [vmem:[#allocation10 + $0x10a8] sm:$0xff] }
 0x435   : > { %4414 = vmatpush1.bf16.msra.mxu1 %v4413_v2  ;;  %v7415_v2 = vld [vmem:[#allocation37_spill] sm:$0xff] }
 0x436   : > { %4416 = vmatprep.subr.bf16.mxu1 %v4415_v13  ;;  %v4441_v13 = vpack.c.bf16 %v2412_v43, %v2406_v3  ;;  %v2490_v3 = vld [vmem:[#allocation10 + $0x10a0] sm:$0xff]  ;;  %v2496_v43 = vld [vmem:[#allocation10 + $0x10d0] sm:$0xff] }
 0x439   : > { %4418 = vmatpush1.bf16.msra.mxu1 %v4417_v31  ;;  %v7416_v31 = vld [vmem:[#allocation38_spill] sm:$0xff] }
 0x43a   : > { %4420 = vmatprep.subr.bf16.mxu1 %v4419_v35  ;;  %v7417_v35 = vld [vmem:[#allocation39_spill] sm:$0xff] }
 0x43c   : > { %3390 = vmatmul.mubr.f32.vlgmr.msra.gmra.mrb[16].mxu1 %v7410_v37  ;;  %v2448_v37 = vld [vmem:[#allocation10 + $0xf50] sm:$0xff] }
 0x43d   : > { %3395 = vmatprep.mubr.f32.mxu1 %v6802_v52  ;;  %4422 = vmatpush1.bf16.msra.mxu1 %v4421_v58  ;;  %v2401_v52 = vld [vmem:[#allocation10 + $0xdd8] sm:$0xff]  ;;  %v4453_v28 = vpack.c.bf16 %v2448_v37, %v2442_v23 }
 0x43e   : > { %4424 = vmatprep.subr.bf16.mxu1 %v4423_v57  ;;  %v4435_v29 = vpack.c.bf16 %v2401_v52, %v2395_v6  ;;  %v2449_v58 = vld [vmem:[#allocation10 + $0xf58] sm:$0xff]  ;;  %v7418_v57 = vld [vmem:[#allocation40_spill] sm:$0xff] }
 0x43f   : > { %v4451_v12 = vpack.c.bf16 %v2449_v58, %v2443_v8  ;;  %v2466_v52 = vld [vmem:[#allocation10 + $0xfe0] sm:$0xff] }
 0x440   : > { %3396 = vmatmul.mubr.f32.gmra.mrb[18].mxu1 %v6818_v30  ;;  %v2400_v30 = vld [vmem:[#allocation10 + $0xdd0] sm:$0xff]  ;;  %v2526_v58 = vld [vmem:[#allocation10 + $0x11c0] sm:$0xff] }
 0x441   : > { %3401 = vmatprep.mubr.f32.mxu1 %v7411_v5  ;;  %4426 = vmatpush1.bf16.msra.mxu1 %v4425_v59  ;;  %v4437_v51 = vpack.c.bf16 %v2400_v30, %v2394_v53  ;;  %v2455_v59 = vld [vmem:[#allocation10 + $0xf88] sm:$0xff]  ;;  %v2454_v5 = vld [vmem:[#allocation10 + $0xf80] sm:$0xff] }
 0x442   : > { %4428 = vmatprep.subr.bf16.mxu1 %v4427_v38  ;;  %v2461_v38 = vld [vmem:[#allocation10 + $0xfb8] sm:$0xff]  ;;  %v2478_v30 = vld [vmem:[#allocation10 + $0x1040] sm:$0xff] }
 0x443   : > { %v4455_v41 = vpack.c.bf16 %v2461_v38, %v2455_v59 }
 0x444   : > { %3402 = vmatmul.mubr.f32.gmra.mrb[20].mxu1 %v7412_v60  ;;  %v2472_v60 = vld [vmem:[#allocation10 + $0x1010] sm:$0xff] }
 0x445   : > { %3407 = vmatprep.mubr.f32.mxu1 %v7413_v48  ;;  %4430 = vmatpush1.bf16.msra.mxu1 %v4429_v22  ;;  %v2460_v22 = vld [vmem:[#allocation10 + $0xfb0] sm:$0xff]  ;;  %v2479_v48 = vld [vmem:[#allocation10 + $0x1048] sm:$0xff] }
 0x446   : > { %4432 = vmatprep.subr.bf16.mxu1 %v4431_v36  ;;  %v2467_v36 = vld [vmem:[#allocation10 + $0xfe8] sm:$0xff]  ;;  %v4457_v20 = vpack.c.bf16 %v2460_v22, %v2454_v5 }
 0x447   : > { %v4459_v6 = vpack.c.bf16 %v2473_v49, %v2467_v36 }
 0x448   : > { %3408 = vmatmul.mubr.f32.gmra.mrb[22].mxu1 %v7414_v11  ;;  %v2497_v11 = vld [vmem:[#allocation10 + $0x10d8] sm:$0xff] }
 0x449   : > { %3413 = vmatprep.mubr.f32.mxu1 %v6904_v56  ;;  %4434 = vmatpush1.bf16.msra.mxu1 %v4433_v39  ;;  %v2437_v56 = vld [vmem:[#allocation10 + $0xef8] sm:$0xff] }
 0x44a   : > { %4436 = vmatprep.subr.bf16.mxu1 %v4435_v29  ;;  %v4447_v7 = vpack.c.bf16 %v2437_v56, %v2431_v54  ;;  %v2485_v39 = vld [vmem:[#allocation10 + $0x1078] sm:$0xff]  ;;  %v4461_v29 = vpack.c.bf16 %v2472_v60, %v2466_v52 }
 0x44b   : > { %v4463_v53 = vpack.c.bf16 %v2485_v39, %v2479_v48  ;;  %v2521_v54 = vld [vmem:[#allocation10 + $0x1198] sm:$0xff] }
 0x44c   : > { %3414 = vmatmul.mubr.f32.gmra.mrb[24].mxu1 %v6919_v9  ;;  %v2436_v9 = vld [vmem:[#allocation10 + $0xef0] sm:$0xff] }
 0x44d   : > { %3419 = vmatprep.mubr.f32.mxu1 %v7415_v2  ;;  %4438 = vmatpush1.bf16.msra.mxu1 %v4437_v51  ;;  %v4449_v27 = vpack.c.bf16 %v2436_v9, %v2430_v4  ;;  %v4465_v51 = vpack.c.bf16 %v2484_v62, %v2478_v30  ;;  %v4469_v2 = vpack.c.bf16 %v2496_v43, %v2490_v3  ;;  %v2533_v4 = vld [vmem:[#allocation10 + $0x11f8] sm:$0xff] }
 0x44e   : > { %4440 = vmatprep.subr.bf16.mxu1 %v4439_v17  ;;  %v4467_v17 = vpack.c.bf16 %v2497_v11, %v2491_v61 }
 0x450   : > { %3420 = vmatmul.mubr.f32.gmra.mrb[26].mxu1 %v7416_v31  ;;  %v4475_v31 = vpack.c.bf16 %v2521_v54, %v2515_v25 }
 0x451   : > { %3425 = vmatprep.mubr.f32.mxu1 %v7417_v35  ;;  %4442 = vmatpush1.bf16.msra.mxu1 %v4441_v13  ;;  %v4471_v13 = vpack.c.bf16 %v2509_v1, %v2503_v21  ;;  %v2514_v35 = vld [vmem:[#allocation10 + $0x1160] sm:$0xff] }
 0x452   : > { %4444 = vmatprep.subr.bf16.mxu1 %v4443_v47  ;;  %v2502_v47 = vld [vmem:[#allocation10 + $0x1100] sm:$0xff] }
 0x453   : > { %v4473_v56 = vpack.c.bf16 %v2508_v32, %v2502_v47 }
 0x454   : > { %3426 = vmatmul.mubr.f32.gmra.mrb[28].mxu1 %v7418_v57  ;;  %v2532_v57 = vld [vmem:[#allocation10 + $0x11f0] sm:$0xff] }
 0x455   : > { %3431 = vmatprep.mubr.f32.mxu1 %v7419_v10  ;;  %4446 = vmatpush1.bf16.msra.mxu1 %v4445_v34  ;;  %v2520_v34 = vld [vmem:[#allocation10 + $0x1190] sm:$0xff]  ;;  %v4481_v10 = vpack.c.bf16 %v2532_v57, %v2526_v58 }
 0x456   : > { %4448 = vmatprep.subr.bf16.mxu1 %v4447_v7  ;;  %v2527_v7 = vld [vmem:[#allocation10 + $0x11c8] sm:$0xff]  ;;  %v4477_v9 = vpack.c.bf16 %v2520_v34, %v2514_v35 }
 0x457   : > { %v4479_v8 = vpack.c.bf16 %v2533_v4, %v2527_v7 }
 0x458   : > { %3432 = vmatmul.mubr.f32.gmra.mrb[30].mxu1 %v7420_v50 }
 0x459   : > { %4450 = vmatpush1.bf16.msra.mxu1 %v4449_v27  ;;  %3502 = vmatprep.mubr.f32.mxu1 %v7421_v55 }
 0x45a   : > { %4452 = vmatprep.subr.bf16.mxu1 %v4451_v12 }
 0x45d   : > { %4454 = vmatpush1.bf16.msra.mxu1 %v4453_v28 }
 0x45e   : > { %4456 = vmatprep.subr.bf16.mxu1 %v4455_v41 }
 0x461   : > { %4458 = vmatpush1.bf16.msra.mxu1 %v4457_v20 }
 0x462   : > { %4460 = vmatprep.subr.bf16.mxu1 %v4459_v6 }
 0x465   : > { %4462 = vmatpush1.bf16.msra.mxu1 %v4461_v29 }
 0x466   : > { %4464 = vmatprep.subr.bf16.mxu1 %v4463_v53 }
 0x469   : > { %4466 = vmatpush1.bf16.msra.mxu1 %v4465_v51 }
 0x46a   : > { %4468 = vmatprep.subr.bf16.mxu1 %v4467_v17 }
 0x46d   : > { %4470 = vmatpush1.bf16.msra.mxu1 %v4469_v2 }
 0x46e   : > { %4472 = vmatprep.subr.bf16.mxu1 %v4471_v13 }
 0x471   : > { %4474 = vmatpush1.bf16.msra.mxu1 %v4473_v56 }
 0x472   : > { %4476 = vmatprep.subr.bf16.mxu1 %v4475_v31 }
 0x475   : > { %4478 = vmatpush1.bf16.msra.mxu1 %v4477_v9 }
 0x476   : > { %4480 = vmatprep.subr.bf16.mxu1 %v4479_v8 }
 0x479   : > { %4482 = vmatpush1.bf16.msra.mxu1 %v4481_v10 }
 0x47c   : > { %3503 = vmatmul.mubr.f32.vlgmr.msra.gmra.mrb[16].mxu1 %v7012_v63 }
 0x47d   : > { %3508 = vmatprep.mubr.f32.mxu1 %v7018_v26 }
 0x480   : > { %3509 = vmatmul.mubr.f32.gmra.mrb[18].mxu1 %v7026_v18 }
 0x481   : > { %3514 = vmatprep.mubr.f32.mxu1 %v7031_v16 }
 0x484   : > { %3515 = vmatmul.mubr.f32.gmra.mrb[20].mxu1 %v7038_v24 }
 0x485   : > { %3520 = vmatprep.mubr.f32.mxu1 %v7043_v42 }
 0x488   : > { %3521 = vmatmul.mubr.f32.gmra.mrb[22].mxu1 %v7050_v40 }
 0x489   : > { %3526 = vmatprep.mubr.f32.mxu1 %v7055_v15 }
 0x48c   : > { %3527 = vmatmul.mubr.f32.gmra.mrb[24].mxu1 %v7062_v14 }
 0x48d   : > { %3532 = vmatprep.mubr.f32.mxu1 %v7066_v33 }
 0x48e   : > { %v2826_v63 = vpop.f32.mrb[0].mxu1 }
 0x48f   : > { %3551 = vst [vmem:[%s7136_s20] sm:$0xff] %v2826_v63  ;;  %v3165_v26 = vpop.f32.mrb[48].mxu0  ;;  %v2828_v18 = vpop.f32.mrb[1].mxu1 }
 0x490   : > { %3553 = vst [vmem:[%s7136_s20 + $0x10] sm:$0xff] %v3165_v26  ;;  %3552 = vst [vmem:[%s7136_s20 + $0x8] sm:$0xff] %v2828_v18  ;;  %v3167_v16 = vpop.f32.mrb[49].mxu0  ;;  %3533 = vmatmul.mubr.f32.gmra.mrb[26].mxu1 %v7072_v0 }
 0x491   : > { %3554 = vst [vmem:[%s7136_s20 + $0x18] sm:$0xff] %v3167_v16  ;;  %3538 = vmatprep.mubr.f32.mxu1 %v7075_v45 }
 0x492   : > { %v2832_v24 = vpop.f32.mrb[2].mxu1 }
 0x493   : > { %3557 = vst [vmem:[%s7136_s20 + $0x30] sm:$0xff] %v2832_v24  ;;  %v3171_v42 = vpop.f32.mrb[50].mxu0  ;;  %v2834_v40 = vpop.f32.mrb[3].mxu1 }
 0x494   : > { %3559 = vst [vmem:[%s7136_s20 + $0x40] sm:$0xff] %v3171_v42  ;;  %3558 = vst [vmem:[%s7136_s20 + $0x38] sm:$0xff] %v2834_v40  ;;  %v3173_v15 = vpop.f32.mrb[51].mxu0  ;;  %3539 = vmatmul.mubr.f32.gmra.mrb[28].mxu1 %v7080_v19 }
 0x495   : > { %3560 = vst [vmem:[%s7136_s20 + $0x48] sm:$0xff] %v3173_v15  ;;  %3544 = vmatprep.mubr.f32.mxu1 %v7083_v44 }
 0x496   : > { %v2838_v14 = vpop.f32.mrb[4].mxu1 }
 0x497   : > { %3563 = vst [vmem:[%s7136_s20 + $0x60] sm:$0xff] %v2838_v14  ;;  %v3177_v33 = vpop.f32.mrb[52].mxu0  ;;  %v2840_v0 = vpop.f32.mrb[5].mxu1 }
 0x498   : > { %3565 = vst [vmem:[%s7136_s20 + $0x70] sm:$0xff] %v3177_v33  ;;  %3564 = vst [vmem:[%s7136_s20 + $0x68] sm:$0xff] %v2840_v0  ;;  %v3179_v45 = vpop.f32.mrb[53].mxu0  ;;  %3545 = vmatmul.mubr.f32.gmra.mrb[30].mxu1 %v7088_v46 }
 0x499   : > { %3566 = vst [vmem:[%s7136_s20 + $0x78] sm:$0xff] %v3179_v45 }
 0x49a   : > { %v2844_v19 = vpop.f32.mrb[6].mxu1 }
 0x49b   : > { %3569 = vst [vmem:[%s7136_s20 + $0x90] sm:$0xff] %v2844_v19  ;;  %v3183_v27 = vpop.f32.mrb[54].mxu0  ;;  %v2846_v44 = vpop.f32.mrb[7].mxu1 }
 0x49c   : > { %3571 = vst [vmem:[%s7136_s20 + $0xa0] sm:$0xff] %v3183_v27  ;;  %3570 = vst [vmem:[%s7136_s20 + $0x98] sm:$0xff] %v2846_v44  ;;  %v3185_v12 = vpop.f32.mrb[55].mxu0 }
 0x49d   : > { %3572 = vst [vmem:[%s7136_s20 + $0xa8] sm:$0xff] %v3185_v12 }
 0x49e   : > { %v2850_v23 = vpop.f32.mrb[8].mxu1 }
 0x49f   : > { %3575 = vst [vmem:[%s7136_s20 + $0xc0] sm:$0xff] %v2850_v23  ;;  %v3189_v37 = vpop.f32.mrb[56].mxu0  ;;  %v2852_v59 = vpop.f32.mrb[9].mxu1 }
 0x4a0   : > { %3577 = vst [vmem:[%s7136_s20 + $0xd0] sm:$0xff] %v3189_v37  ;;  %3576 = vst [vmem:[%s7136_s20 + $0xc8] sm:$0xff] %v2852_v59  ;;  %v3191_v46 = vpop.f32.mrb[57].mxu0 }
 0x4a1   : > { %3578 = vst [vmem:[%s7136_s20 + $0xd8] sm:$0xff] %v3191_v46 }
 0x4a2   : > { %v2856_v38 = vpop.f32.mrb[10].mxu1 }
 0x4a3   : > { %3581 = vst [vmem:[%s7136_s20 + $0xf0] sm:$0xff] %v2856_v38  ;;  %v3195_v50 = vpop.f32.mrb[58].mxu0  ;;  %v2858_v55 = vpop.f32.mrb[11].mxu1 }
 0x4a4   : > { %3583 = vst [vmem:[%s7136_s20 + $0x100] sm:$0xff] %v3195_v50  ;;  %3582 = vst [vmem:[%s7136_s20 + $0xf8] sm:$0xff] %v2858_v55  ;;  %v3197_v28 = vpop.f32.mrb[59].mxu0 }
 0x4a5   : > { %3584 = vst [vmem:[%s7136_s20 + $0x108] sm:$0xff] %v3197_v28 }
 0x4a6   : > { %v2862_v41 = vpop.f32.mrb[12].mxu1 }
 0x4a7   : > { %3587 = vst [vmem:[%s7136_s20 + $0x120] sm:$0xff] %v2862_v41  ;;  %v3201_v5 = vpop.f32.mrb[60].mxu0  ;;  %v2864_v22 = vpop.f32.mrb[13].mxu1 }
 0x4a8   : > { %3589 = vst [vmem:[%s7136_s20 + $0x130] sm:$0xff] %v3201_v5  ;;  %3588 = vst [vmem:[%s7136_s20 + $0x128] sm:$0xff] %v2864_v22  ;;  %v3203_v36 = vpop.f32.mrb[61].mxu0 }
 0x4a9   : > { %3590 = vst [vmem:[%s7136_s20 + $0x138] sm:$0xff] %v3203_v36 }
 0x4aa   : > { %v2868_v49 = vpop.f32.mrb[14].mxu1 }
 0x4ab   : > { %3593 = vst [vmem:[%s7136_s20 + $0x150] sm:$0xff] %v2868_v49  ;;  %v3207_v20 = vpop.f32.mrb[62].mxu0  ;;  %v2870_v6 = vpop.f32.mrb[15].mxu1 }
 0x4ac   : > { %3595 = vst [vmem:[%s7136_s20 + $0x160] sm:$0xff] %v3207_v20  ;;  %3594 = vst [vmem:[%s7136_s20 + $0x158] sm:$0xff] %v2870_v6  ;;  %v3209_v52 = vpop.f32.mrb[63].mxu0 }
 0x4ad   : > { %3596 = vst [vmem:[%s7136_s20 + $0x168] sm:$0xff] %v3209_v52 }
 0x54f   : > { %v3504_v60 = vpop.f32.mrb[16].mxu1 }
 0x550   : > { %3555 = vst [vmem:[%s7136_s20 + $0x20] sm:$0xff] %v3504_v60  ;;  %v3506_v48 = vpop.f32.mrb[17].mxu1 }
 0x551   : > { %3556 = vst [vmem:[%s7136_s20 + $0x28] sm:$0xff] %v3506_v48 }
 0x553   : > { %v3510_v39 = vpop.f32.mrb[18].mxu1 }
 0x554   : > { %3561 = vst [vmem:[%s7136_s20 + $0x50] sm:$0xff] %v3510_v39  ;;  %v3512_v29 = vpop.f32.mrb[19].mxu1 }
 0x555   : > { %3562 = vst [vmem:[%s7136_s20 + $0x58] sm:$0xff] %v3512_v29 }
 0x557   : > { %v3516_v53 = vpop.f32.mrb[20].mxu1 }
 0x558   : > { %3567 = vst [vmem:[%s7136_s20 + $0x80] sm:$0xff] %v3516_v53  ;;  %v3518_v30 = vpop.f32.mrb[21].mxu1 }
 0x559   : > { %3568 = vst [vmem:[%s7136_s20 + $0x88] sm:$0xff] %v3518_v30 }
 0x55b   : > { %v3522_v62 = vpop.f32.mrb[22].mxu1 }
 0x55c   : > { %3573 = vst [vmem:[%s7136_s20 + $0xb0] sm:$0xff] %v3522_v62  ;;  %v3524_v61 = vpop.f32.mrb[23].mxu1 }
 0x55d   : > { %3574 = vst [vmem:[%s7136_s20 + $0xb8] sm:$0xff] %v3524_v61 }
 0x55f   : > { %v3528_v11 = vpop.f32.mrb[24].mxu1 }
 0x560   : > { %3579 = vst [vmem:[%s7136_s20 + $0xe0] sm:$0xff] %v3528_v11  ;;  %v3530_v51 = vpop.f32.mrb[25].mxu1 }
 0x561   : > { %3580 = vst [vmem:[%s7136_s20 + $0xe8] sm:$0xff] %v3530_v51 }
 0x563   : > { %v3534_v17 = vpop.f32.mrb[26].mxu1 }
 0x564   : > { %3585 = vst [vmem:[%s7136_s20 + $0x110] sm:$0xff] %v3534_v17  ;;  %v3536_v3 = vpop.f32.mrb[27].mxu1 }
 0x565   : > { %3586 = vst [vmem:[%s7136_s20 + $0x118] sm:$0xff] %v3536_v3 }
 0x567   : > { %v3540_v43 = vpop.f32.mrb[28].mxu1 }
 0x568   : > { %3591 = vst [vmem:[%s7136_s20 + $0x140] sm:$0xff] %v3540_v43  ;;  %v3542_v21 = vpop.f32.mrb[29].mxu1 }
 0x569   : > { %3592 = vst [vmem:[%s7136_s20 + $0x148] sm:$0xff] %v3542_v21 }
 0x56b   : > { %v3546_v1 = vpop.f32.mrb[30].mxu1 }
 0x56c   : > { %3597 = vst [vmem:[%s7136_s20 + $0x170] sm:$0xff] %v3546_v1  ;;  %v3548_v2 = vpop.f32.mrb[31].mxu1 }
 0x56d   : > { %3598 = vst [vmem:[%s7136_s20 + $0x178] sm:$0xff] %v3548_v2 }
 0x56e   : > { %5203 = shalt.err (!%p5200_p9)
}
 0x56f   : > { %s5204_s14 = scalar_lea.hbm %s7195_s30, 6144  ;;  %s5208_s21 = scalar_lea.hbm %s7424_s19, 24576 }
 0x570   : > { %p5205_p1 = scmp.ne.s32.totalorder %s7195_s30, %s5204_s14  ;;  %p5209_p8 = scmp.lt.u32.totalorder %s7195_s30, %s7424_s19 }
 0x571   : > { %p5210_p2 = scmp.lt.u32.totalorder %s5208_s21, %s5204_s14  ;;  %p5212_p11 = scmp.lt.u32.totalorder %s5204_s14, %s7195_s30 }
 0x572   : > { %p5206_p12 = pnand %p5205_p1, %p7425_p6 }
 0x573   : > { %p5211_p13 = por %p5210_p2, %p5209_p8 }
 0x574   : > { %p5207_p10 = pneg %p5206_p12 }
 0x575   : > { %p5213_p5 = por %p5212_p11, %p5211_p13 }
 0x577   : > { %p5214_p0 = pnand %p5213_p5, %p5207_p10 }
 0x579   : > { %5217 = shalt.err (!%p5214_p0)
}
 0x57a   : > { %s5374_s27 = smov 768   ;;  %s5375_s3 = smov 1536  }
 0x57b   : > { %s5376_s12 = smov 48  }
 0x57c   : > { %4691 = dma.vmem_to_hbm [thread:$0]  (%p7425_p6), %s7197_s4, 6144, %s7195_s30, %s3600_s6, %s5374_s27, %s5375_s3, %s5376_s12  }
 0x57d PF: > { %s7426_s11 = sld [smem:[#allocation17_spill]]  ;;  %s7427_s15 = sld [smem:[#allocation26_spill]] }
 0x57e   : > { %p4719_p3 = scmp.ge.s32.totalorder %s5352_s10, 2 }
 0x583   : > { %s3630_s25 = sand.u32 1, %s7426_s11   ;;  %p7428_p4 = scmp.ne.s32.totalorder %s7427_s15, 0 }
 0x584   : > { %s3631_s0 = scalar_lea.sflag [#allocation4], %s3630_s25 }
 0x585   : > { %p4711_p7 = pnand %p4719_p3, %p7428_p4 }
 0x587   : > { %5291 = dma.done.wait (!%p4711_p7), %s3631_s0, 6144  }
 0x588   : > { %5293 = vsyncadd (!%p4711_p7), %s3631_s0, 4294961152  ;;  %s26_s10 = sadd.s32 1, %s5352_s10   ;;  %s7430_s24 = sld [smem:[#allocation18_spill]] }
 0x589   : > { %p7230_p9 = scmp.ge.s32.totalorder %s26_s10, 6   ;;  %s7431_s30 = sld [smem:[#allocation21_spill]] }
 0x58a   : > { %s7432_s8 = sld [smem:[#allocation24_spill]]  ;;  %s7433_s4 = sld [smem:[#allocation27_spill]] }
 0x58b   : > { %s7434_s21 = smov %s5304_s22  ;;  %s7435_s22 = smov %s5308_s23 }
 0x58c   : > { %s7436_s23 = smov %s5750_s18  ;;  %s7437_s25 = smov %s5320_s26 }
 0x58d   : > { %s7438_s26 = smov %s5683_s1  ;;  %s7439_s27 = smov %s5328_s28 }
 0x58e   : > { %s7440_s28 = smov %s5332_s29  ;;  %s7441_s29 = smov %s5678_s2 }
 0x58f   : > { %s7442_s7 = smov %s5348_s9  ;;  %25 = sbr.rel (!%p7230_p9) target bundleno = 21 (0x15), region = 121 }
 0x590   : > { %s7443_s9 = smov %s7433_s4 }
 0x596   :  { %3636 = vsyncpa [#allocation3], 1 }
 0x597   :  { %3638 = vsyncpa [#allocation3 + $0x1], 1 }
 0x598   :  { %3639 = vsyncpa [#allocation6], 1 }
 0x599   :  { %3641 = vsyncpa [#allocation6 + $0x1], 1 }
 0x59a   :  { %3642 = vsyncpa [#allocation9], 1 }
 0x59b   :  { %3643 = vsyncpa [#allocation4], 1 }
 0x59c   :  { %3645 = vsyncpa [#allocation4 + $0x1], 1 }

</bundles_post_ra>
